<compile_context>
chip_gen: v7x
topology: tpu7x:2x2x1
jax: 0.10.0
libtpu: 0.0.40
codegen_flags: <defaults>
</compile_context>

<pallas_src>
import jax
import jax.numpy as jnp
from jax.experimental import pallas as pl
from jax.experimental.pallas import tpu as pltpu


# ----------------------------------------------------------------------------
# Pallas kernel: full SPMotifNet_GNN forward (inference), fused in one call.
# ----------------------------------------------------------------------------
def _spmotif_kernel(
    x_ref,        # (Nn, IN)    raw node features
    eoh_ref,      # (Ne, NET)   one-hot(edge_attr)
    gsrc_ref,     # (Ne, Nn)    one-hot(src)      -> gather matrix
    sdst_ref,     # (Nn, Ne)    one-hot(dst).T    -> scatter-add matrix
    pool_ref,     # (G,  Nn)    one-hot(batch).T  -> per-graph sum pooling
    we_ref,       # (IN, E)     node encoder weight
    be_ref,       # (1,  E)     node encoder bias
    etab_ref,     # (L, NET, E) per-layer edge-embedding tables
    w1_ref,       # (L, E, H)   GIN mlp Linear1 (BN1 scale folded in)
    t1_ref,       # (L, 1, H)   folded BN1 shift (absorbs Linear1 bias)
    w2_ref,       # (L, H, E)   GIN mlp Linear2 (layer-BN scale folded in)
    t2_ref,       # (L, 1, E)   folded layer-BN shift (absorbs Linear2 bias)
    eps_ref,      # (L,)        GIN eps, SMEM scalars
    wp1_ref,      # (E, H)      predictor Linear1 (predictor-BN scale folded in)
    tp_ref,       # (1, H)      folded predictor BN shift (absorbs bias)
    wp2_ref,      # (H, T)      predictor Linear2
    bp2_ref,      # (1, T)      predictor Linear2 bias
    out_ref,      # (G, T)
):
    f32 = jnp.float32
    L = etab_ref.shape[0]

    # Node encoder: Linear(IN, E)
    h = jnp.dot(x_ref[...], we_ref[...], preferred_element_type=f32) + be_ref[...]

    eoh = eoh_ref[...]      # (Ne, NET)
    gsrc = gsrc_ref[...]    # (Ne, Nn)
    sdst = sdst_ref[...]    # (Nn, Ne)

    # GIN layers (statically unrolled, all weights VMEM-resident).
    for l in range(L):
        # --- GINConv message passing, all on the MXU ---
        eemb = jnp.dot(eoh, etab_ref[l], preferred_element_type=f32)     # (Ne, E) edge embed
        xj = jnp.dot(gsrc, h, preferred_element_type=f32)                # (Ne, E) = h[src]
        msg = jnp.maximum(xj + eemb, 0.0)                                # relu(x_j + e)
        aggr = jnp.dot(sdst, msg, preferred_element_type=f32)            # (Nn, E) scatter_add
        pre = (1.0 + eps_ref[l]) * h + aggr

        # --- GIN MLP: Linear(E,H)+BN(folded) -> ReLU -> Linear(H,E)+BN(folded) ---
        z1 = jnp.maximum(
            jnp.dot(pre, w1_ref[l], preferred_element_type=f32) + t1_ref[l], 0.0)  # (Nn, H)
        hc = jnp.dot(z1, w2_ref[l], preferred_element_type=f32) + t2_ref[l]        # (Nn, E)

        # --- ReLU (not on last layer), dropout=identity, residual ---
        if l < L - 1:
            hc = jnp.maximum(hc, 0.0)
        h = hc + h

    # Per-graph sum pooling (scatter_add over batch) + predictor MLP.
    hg = jnp.dot(pool_ref[...], h, preferred_element_type=f32)           # (G, E)
    z = jnp.maximum(
        jnp.dot(hg, wp1_ref[...], preferred_element_type=f32) + tp_ref[...], 0.0)  # (G, H)
    out_ref[...] = jnp.dot(z, wp2_ref[...], preferred_element_type=f32) + bp2_ref[...]


def _full(shape):
    nd = len(shape)
    return pl.BlockSpec(shape, lambda i, _nd=nd: (0,) * _nd)


# ----------------------------------------------------------------------------
# Wrapper: builds one-hot gather/scatter matrices, folds BatchNorms (inference)
# into the preceding Linear weights, and launches the fused kernel.
# ----------------------------------------------------------------------------
def spmotif_forward(x_nodes, edge_index, edge_attr, batch, num_graphs, params):
    p = params
    Nn, IN = x_nodes.shape
    L, NET, E = p["etab"].shape
    H = p["w1"].shape[2]
    T = p["wp2"].shape[1]
    Ne = edge_attr.shape[0]
    bn_eps = 1e-5

    src, dst = edge_index[0], edge_index[1]
    eoh = jax.nn.one_hot(edge_attr, NET, dtype=jnp.float32)              # (Ne, NET)
    gsrc = jax.nn.one_hot(src, Nn, dtype=jnp.float32)                    # (Ne, Nn)
    sdst = jax.nn.one_hot(dst, Nn, dtype=jnp.float32).T                  # (Nn, Ne)
    pool = jax.nn.one_hot(batch, num_graphs, dtype=jnp.float32).T        # (G,  Nn)

    # Fold BN running stats: scale into preceding Linear weight, shift absorbs bias.
    s1 = p["bn1_g"] / jnp.sqrt(p["bn1_v"] + bn_eps)                      # (L, H)
    t1 = (p["b1"] - p["bn1_m"]) * s1 + p["bn1_b"]                        # (L, H)
    w1f = p["w1"] * s1[:, None, :]                                       # (L, E, H)

    s2 = p["bn2_g"] / jnp.sqrt(p["bn2_v"] + bn_eps)                      # (L, E)
    t2 = (p["b2"] - p["bn2_m"]) * s2 + p["bn2_b"]                        # (L, E)
    w2f = p["w2"] * s2[:, None, :]                                       # (L, H, E)

    sp = p["bnp_g"] / jnp.sqrt(p["bnp_v"] + bn_eps)                      # (H,)
    tp = (p["bp1"] - p["bnp_m"]) * sp + p["bnp_b"]                       # (H,)
    wp1f = p["wp1"] * sp[None, :]                                        # (E, H)

    args = (
        x_nodes, eoh, gsrc, sdst, pool,
        p["we"], p["be"].reshape(1, E),
        p["etab"],
        w1f, t1.reshape(L, 1, H),
        w2f, t2.reshape(L, 1, E),
        p["eps"].astype(jnp.float32),
        wp1f, tp.reshape(1, H),
        p["wp2"], p["bp2"].reshape(1, T),
    )
    in_specs = [
        _full((Nn, IN)), _full((Ne, NET)), _full((Ne, Nn)), _full((Nn, Ne)),
        _full((num_graphs, Nn)),
        _full((IN, E)), _full((1, E)),
        _full((L, NET, E)),
        _full((L, E, H)), _full((L, 1, H)),
        _full((L, H, E)), _full((L, 1, E)),
        pl.BlockSpec(memory_space=pltpu.SMEM),                           # eps scalars
        _full((E, H)), _full((1, H)),
        _full((H, T)), _full((1, T)),
    ]

    return pl.pallas_call(
        _spmotif_kernel,
        out_shape=jax.ShapeDtypeStruct((num_graphs, T), jnp.float32),
        grid=(1,),
        in_specs=in_specs,
        out_specs=pl.BlockSpec((num_graphs, T), lambda i: (0, 0)),
        compiler_params=pltpu.CompilerParams(
            dimension_semantics=("arbitrary",),
            vmem_limit_bytes=64 << 20,
        ),
    )(*args)


# ----------------------------------------------------------------------------
# Pure-JAX reference mirroring the PyTorch forward (eval mode) exactly.
# ----------------------------------------------------------------------------
def spmotif_ref(x_nodes, edge_index, edge_attr, batch, num_graphs, params):
    p = params
    L = p["w1"].shape[0]

    def bn(x, g, b, m, v, eps=1e-5):
        return (x - m) / jnp.sqrt(v + eps) * g + b

    h = x_nodes @ p["we"] + p["be"]                                      # node encoder
    src, dst = edge_index[0], edge_index[1]
    for l in range(L):
        eemb = p["etab"][l][edge_attr]                                   # edge embedding
        msg = jax.nn.relu(h[src] + eemb)
        aggr = jnp.zeros_like(h).at[dst].add(msg)                        # scatter_add
        pre = (1.0 + p["eps"][l]) * h + aggr
        z1 = jax.nn.relu(bn(pre @ p["w1"][l] + p["b1"][l],
                            p["bn1_g"][l], p["bn1_b"][l], p["bn1_m"][l], p["bn1_v"][l]))
        z2 = z1 @ p["w2"][l] + p["b2"][l]
        hc = bn(z2, p["bn2_g"][l], p["bn2_b"][l], p["bn2_m"][l], p["bn2_v"][l])
        if l < L - 1:
            hc = jax.nn.relu(hc)
        h = hc + h                                                       # residual (dropout=id)
    hg = jnp.zeros((num_graphs, h.shape[1]), h.dtype).at[batch].add(h)   # scatter_add pooling
    z = jax.nn.relu(bn(hg @ p["wp1"] + p["bp1"],
                       p["bnp_g"], p["bnp_b"], p["bnp_m"], p["bnp_v"]))
    return z @ p["wp2"] + p["bp2"]


# ----------------------------------------------------------------------------
# Parameter init (uniform fan-in like torch Linear; synthetic BN running stats).
# ----------------------------------------------------------------------------
def init_params(key, emb_dim, num_layer, num_tasks, in_dim=4, num_edge_types=4):
    E, H = emb_dim, 2 * emb_dim
    it = iter(jax.random.split(key, 256))

    def lin(fan_in, shape):
        s = 1.0 / jnp.sqrt(jnp.float32(fan_in))
        return jax.random.uniform(next(it), shape, jnp.float32, -s, s)

    def bn_stats(dim):
        g = 1.0 + 0.1 * jax.random.normal(next(it), (dim,), jnp.float32)
        b = 0.1 * jax.random.normal(next(it), (dim,), jnp.float32)
        m = 0.1 * jax.random.normal(next(it), (dim,), jnp.float32)
        v = 0.5 + jnp.abs(jax.random.normal(next(it), (dim,), jnp.float32))
        return g, b, m, v

    p = {"we": lin(in_dim, (in_dim, E)), "be": lin(in_dim, (E,))}

    etab, w1, b1, w2, b2, eps = [], [], [], [], [], []
    bn1 = {"g": [], "b": [], "m": [], "v": []}
    bn2 = {"g": [], "b": [], "m": [], "v": []}
    for _ in range(num_layer):
        etab.append(0.1 * jax.random.normal(next(it), (num_edge_types, E), jnp.float32))
        w1.append(lin(E, (E, H)));  b1.append(lin(E, (H,)))
        w2.append(lin(H, (H, E)));  b2.append(lin(H, (E,)))
        g, b_, m, v = bn_stats(H)
        bn1["g"].append(g); bn1["b"].append(b_); bn1["m"].append(m); bn1["v"].append(v)
        g, b_, m, v = bn_stats(E)
        bn2["g"].append(g); bn2["b"].append(b_); bn2["m"].append(m); bn2["v"].append(v)
        eps.append(0.1 * jax.random.normal(next(it), (), jnp.float32))

    p["etab"] = jnp.stack(etab); p["w1"] = jnp.stack(w1); p["b1"] = jnp.stack(b1)
    p["w2"] = jnp.stack(w2); p["b2"] = jnp.stack(b2); p["eps"] = jnp.stack(eps)
    for k in bn1: p[f"bn1_{k}"] = jnp.stack(bn1[k])
    for k in bn2: p[f"bn2_{k}"] = jnp.stack(bn2[k])

    p["wp1"] = lin(E, (E, H)); p["bp1"] = lin(E, (H,))
    p["bnp_g"], p["bnp_b"], p["bnp_m"], p["bnp_v"] = bn_stats(H)
    p["wp2"] = lin(H, (H, num_tasks)); p["bp2"] = lin(H, (num_tasks,))
    return p


if __name__ == "__main__":
    # Keep the pure-JAX reference in full f32 so it matches the f32 Pallas kernel.
    jax.config.update("jax_default_matmul_precision", "float32")

    key = jax.random.PRNGKey(0)
    kp, kx, ke = jax.random.split(key, 3)

    emb_dim = 32          # small synthetic config (module default is 300)
    num_layer = 5
    num_tasks = 3
    nodes_per_graph = 8
    num_graphs = 2
    Nn = nodes_per_graph * num_graphs

    # Bidirectional ring edges per graph, integer edge types in [0, 4).
    src_list, dst_list = [], []
    for g in range(num_graphs):
        off = g * nodes_per_graph
        for i in range(nodes_per_graph):
            a, b = off + i, off + (i + 1) % nodes_per_graph
            src_list += [a, b]
            dst_list += [b, a]
    edge_index = jnp.array([src_list, dst_list], dtype=jnp.int32)
    Ne = edge_index.shape[1]
    edge_attr = jax.random.randint(ke, (Ne,), 0, 4, dtype=jnp.int32)
    batch = jnp.repeat(jnp.arange(num_graphs, dtype=jnp.int32), nodes_per_graph)

    x_nodes = jax.random.normal(kx, (Nn, 4), jnp.float32)
    params = init_params(kp, emb_dim, num_layer, num_tasks)

    fwd = jax.jit(spmotif_forward, static_argnums=(4,))
    pred = fwd(x_nodes, edge_index, edge_attr, batch, num_graphs, params)
    pred = jax.block_until_ready(pred)

    pred_ref = spmotif_ref(x_nodes, edge_index, edge_attr, batch, num_graphs, params)

    assert pred.shape == (num_graphs, num_tasks)
    assert jnp.allclose(pred, pred_ref, atol=1e-3, rtol=1e-3), (pred, pred_ref)
    print("KERNEL_OK")
</pallas_src>

<mosaic_0001>
module attributes {stable_mosaic.version = 11 : i64} {
  func.func @_spmotif_kernel(%arg0: i32, %arg1: memref<16x4xf32, #tpu.memory_space<vmem>>, %arg2: memref<32x4xf32, #tpu.memory_space<vmem>>, %arg3: memref<32x16xf32, #tpu.memory_space<vmem>>, %arg4: memref<16x32xf32, #tpu.memory_space<vmem>>, %arg5: memref<2x16xf32, #tpu.memory_space<vmem>>, %arg6: memref<4x32xf32, #tpu.memory_space<vmem>>, %arg7: memref<1x32xf32, #tpu.memory_space<vmem>>, %arg8: memref<5x4x32xf32, #tpu.memory_space<vmem>>, %arg9: memref<5x32x64xf32, #tpu.memory_space<vmem>>, %arg10: memref<5x1x64xf32, #tpu.memory_space<vmem>>, %arg11: memref<5x64x32xf32, #tpu.memory_space<vmem>>, %arg12: memref<5x1x32xf32, #tpu.memory_space<vmem>>, %arg13: memref<5xf32, #tpu.memory_space<smem>>, %arg14: memref<32x64xf32, #tpu.memory_space<vmem>>, %arg15: memref<1x64xf32, #tpu.memory_space<vmem>>, %arg16: memref<64x3xf32, #tpu.memory_space<vmem>>, %arg17: memref<1x3xf32, #tpu.memory_space<vmem>>, %arg18: memref<2x3xf32, #tpu.memory_space<vmem>>) attributes {dimension_semantics = [#tpu.dimension_semantics<arbitrary>], iteration_bounds = array<i64: 1>, scalar_prefetch = 0 : i64, scratch_operands = 0 : i64, tpu.core_type = #tpu.core_type<tc>, window_params = [{pipeline_mode = #tpu.pipeline_mode<synchronous>, transform_indices = @transform_0, window_bounds = array<i64: 16, 4>}, {pipeline_mode = #tpu.pipeline_mode<synchronous>, transform_indices = @transform_1, window_bounds = array<i64: 32, 4>}, {pipeline_mode = #tpu.pipeline_mode<synchronous>, transform_indices = @transform_2, window_bounds = array<i64: 32, 16>}, {pipeline_mode = #tpu.pipeline_mode<synchronous>, transform_indices = @transform_3, window_bounds = array<i64: 16, 32>}, {pipeline_mode = #tpu.pipeline_mode<synchronous>, transform_indices = @transform_4, window_bounds = array<i64: 2, 16>}, {pipeline_mode = #tpu.pipeline_mode<synchronous>, transform_indices = @transform_5, window_bounds = array<i64: 4, 32>}, {pipeline_mode = #tpu.pipeline_mode<synchronous>, transform_indices = @transform_6, window_bounds = array<i64: 1, 32>}, {pipeline_mode = #tpu.pipeline_mode<synchronous>, transform_indices = @transform_7, window_bounds = array<i64: 5, 4, 32>}, {pipeline_mode = #tpu.pipeline_mode<synchronous>, transform_indices = @transform_8, window_bounds = array<i64: 5, 32, 64>}, {pipeline_mode = #tpu.pipeline_mode<synchronous>, transform_indices = @transform_9, window_bounds = array<i64: 5, 1, 64>}, {pipeline_mode = #tpu.pipeline_mode<synchronous>, transform_indices = @transform_10, window_bounds = array<i64: 5, 64, 32>}, {pipeline_mode = #tpu.pipeline_mode<synchronous>, transform_indices = @transform_11, window_bounds = array<i64: 5, 1, 32>}, {transform_indices = @transform_12, window_bounds = array<i64: 5>}, {pipeline_mode = #tpu.pipeline_mode<synchronous>, transform_indices = @transform_13, window_bounds = array<i64: 32, 64>}, {pipeline_mode = #tpu.pipeline_mode<synchronous>, transform_indices = @transform_14, window_bounds = array<i64: 1, 64>}, {pipeline_mode = #tpu.pipeline_mode<synchronous>, transform_indices = @transform_15, window_bounds = array<i64: 64, 3>}, {pipeline_mode = #tpu.pipeline_mode<synchronous>, transform_indices = @transform_16, window_bounds = array<i64: 1, 3>}, {pipeline_mode = #tpu.pipeline_mode<synchronous>, transform_indices = @transform_17, window_bounds = array<i64: 2, 3>}]} {
    %c0 = arith.constant 0 : index
    %c0_0 = arith.constant 0 : index
    %0 = vector.load %arg1[%c0, %c0_0] : memref<16x4xf32, #tpu.memory_space<vmem>>, vector<16x4xf32>
    %c0_1 = arith.constant 0 : index
    %c0_2 = arith.constant 0 : index
    %1 = vector.load %arg6[%c0_1, %c0_2] : memref<4x32xf32, #tpu.memory_space<vmem>>, vector<4x32xf32>
    %cst = arith.constant dense<0.000000e+00> : vector<16x32xf32>
    %2 = tpu.matmul %0, %1, %cst {dimension_numbers = #tpu.dot_dimension_numbers<[1], [0], [0], [1], [0, 0, 1, 1], [], []>, precision = #tpu.contract_precision<fp32>} : vector<16x4xf32>, vector<4x32xf32>, vector<16x32xf32> -> vector<16x32xf32>
    %c0_3 = arith.constant 0 : index
    %c0_4 = arith.constant 0 : index
    %3 = vector.load %arg7[%c0_3, %c0_4] : memref<1x32xf32, #tpu.memory_space<vmem>>, vector<1x32xf32>
    %4 = vector.broadcast %3 : vector<1x32xf32> to vector<16x32xf32>
    %5 = arith.addf %2, %4 : vector<16x32xf32>
    %c0_5 = arith.constant 0 : index
    %c0_6 = arith.constant 0 : index
    %6 = vector.load %arg2[%c0_5, %c0_6] : memref<32x4xf32, #tpu.memory_space<vmem>>, vector<32x4xf32>
    %c0_7 = arith.constant 0 : index
    %c0_8 = arith.constant 0 : index
    %7 = vector.load %arg3[%c0_7, %c0_8] : memref<32x16xf32, #tpu.memory_space<vmem>>, vector<32x16xf32>
    %c0_9 = arith.constant 0 : index
    %c0_10 = arith.constant 0 : index
    %8 = vector.load %arg4[%c0_9, %c0_10] : memref<16x32xf32, #tpu.memory_space<vmem>>, vector<16x32xf32>
    %c0_11 = arith.constant 0 : index
    %c0_12 = arith.constant 0 : index
    %c0_13 = arith.constant 0 : index
    %9 = vector.load %arg8[%c0_11, %c0_12, %c0_13] : memref<5x4x32xf32, #tpu.memory_space<vmem>>, vector<1x4x32xf32>
    %10 = vector.shape_cast %9 : vector<1x4x32xf32> to vector<4x32xf32>
    %cst_14 = arith.constant dense<0.000000e+00> : vector<32x32xf32>
    %11 = tpu.matmul %6, %10, %cst_14 {dimension_numbers = #tpu.dot_dimension_numbers<[1], [0], [0], [1], [0, 0, 1, 1], [], []>, precision = #tpu.contract_precision<fp32>} : vector<32x4xf32>, vector<4x32xf32>, vector<32x32xf32> -> vector<32x32xf32>
    %cst_15 = arith.constant dense<0.000000e+00> : vector<32x32xf32>
    %12 = tpu.matmul %7, %5, %cst_15 {dimension_numbers = #tpu.dot_dimension_numbers<[1], [0], [0], [1], [0, 0, 1, 1], [], []>, precision = #tpu.contract_precision<fp32>} : vector<32x16xf32>, vector<16x32xf32>, vector<32x32xf32> -> vector<32x32xf32>
    %13 = arith.addf %12, %11 : vector<32x32xf32>
    %cst_16 = arith.constant 0.000000e+00 : f32
    %14 = vector.broadcast %cst_16 : f32 to vector<32x32xf32>
    %15 = arith.maximumf %13, %14 : vector<32x32xf32>
    %cst_17 = arith.constant dense<0.000000e+00> : vector<16x32xf32>
    %16 = tpu.matmul %8, %15, %cst_17 {dimension_numbers = #tpu.dot_dimension_numbers<[1], [0], [0], [1], [0, 0, 1, 1], [], []>, precision = #tpu.contract_precision<fp32>} : vector<16x32xf32>, vector<32x32xf32>, vector<16x32xf32> -> vector<16x32xf32>
    %c0_18 = arith.constant 0 : index
    %17 = memref.load %arg13[%c0_18] : memref<5xf32, #tpu.memory_space<smem>>
    %cst_19 = arith.constant 1.000000e+00 : f32
    %18 = arith.addf %cst_19, %17 : f32
    %19 = vector.broadcast %18 : f32 to vector<16x32xf32>
    %20 = arith.mulf %19, %5 : vector<16x32xf32>
    %21 = arith.addf %20, %16 : vector<16x32xf32>
    %c0_20 = arith.constant 0 : index
    %c0_21 = arith.constant 0 : index
    %c0_22 = arith.constant 0 : index
    %22 = vector.load %arg9[%c0_20, %c0_21, %c0_22] : memref<5x32x64xf32, #tpu.memory_space<vmem>>, vector<1x32x64xf32>
    %23 = vector.shape_cast %22 : vector<1x32x64xf32> to vector<32x64xf32>
    %cst_23 = arith.constant dense<0.000000e+00> : vector<16x64xf32>
    %24 = tpu.matmul %21, %23, %cst_23 {dimension_numbers = #tpu.dot_dimension_numbers<[1], [0], [0], [1], [0, 0, 1, 1], [], []>, precision = #tpu.contract_precision<fp32>} : vector<16x32xf32>, vector<32x64xf32>, vector<16x64xf32> -> vector<16x64xf32>
    %c0_24 = arith.constant 0 : index
    %c0_25 = arith.constant 0 : index
    %c0_26 = arith.constant 0 : index
    %25 = vector.load %arg10[%c0_24, %c0_25, %c0_26] : memref<5x1x64xf32, #tpu.memory_space<vmem>>, vector<1x1x64xf32>
    %26 = vector.shape_cast %25 : vector<1x1x64xf32> to vector<1x64xf32>
    %27 = vector.broadcast %26 : vector<1x64xf32> to vector<16x64xf32>
    %28 = arith.addf %24, %27 : vector<16x64xf32>
    %cst_27 = arith.constant 0.000000e+00 : f32
    %29 = vector.broadcast %cst_27 : f32 to vector<16x64xf32>
    %30 = arith.maximumf %28, %29 : vector<16x64xf32>
    %c0_28 = arith.constant 0 : index
    %c0_29 = arith.constant 0 : index
    %c0_30 = arith.constant 0 : index
    %31 = vector.load %arg11[%c0_28, %c0_29, %c0_30] : memref<5x64x32xf32, #tpu.memory_space<vmem>>, vector<1x64x32xf32>
    %32 = vector.shape_cast %31 : vector<1x64x32xf32> to vector<64x32xf32>
    %cst_31 = arith.constant dense<0.000000e+00> : vector<16x32xf32>
    %33 = tpu.matmul %30, %32, %cst_31 {dimension_numbers = #tpu.dot_dimension_numbers<[1], [0], [0], [1], [0, 0, 1, 1], [], []>, precision = #tpu.contract_precision<fp32>} : vector<16x64xf32>, vector<64x32xf32>, vector<16x32xf32> -> vector<16x32xf32>
    %c0_32 = arith.constant 0 : index
    %c0_33 = arith.constant 0 : index
    %c0_34 = arith.constant 0 : index
    %34 = vector.load %arg12[%c0_32, %c0_33, %c0_34] : memref<5x1x32xf32, #tpu.memory_space<vmem>>, vector<1x1x32xf32>
    %35 = vector.shape_cast %34 : vector<1x1x32xf32> to vector<1x32xf32>
    %36 = vector.broadcast %35 : vector<1x32xf32> to vector<16x32xf32>
    %37 = arith.addf %33, %36 : vector<16x32xf32>
    %cst_35 = arith.constant 0.000000e+00 : f32
    %38 = vector.broadcast %cst_35 : f32 to vector<16x32xf32>
    %39 = arith.maximumf %37, %38 : vector<16x32xf32>
    %40 = arith.addf %39, %5 : vector<16x32xf32>
    %c1 = arith.constant 1 : index
    %c0_36 = arith.constant 0 : index
    %c0_37 = arith.constant 0 : index
    %41 = vector.load %arg8[%c1, %c0_36, %c0_37] : memref<5x4x32xf32, #tpu.memory_space<vmem>>, vector<1x4x32xf32>
    %42 = vector.shape_cast %41 : vector<1x4x32xf32> to vector<4x32xf32>
    %cst_38 = arith.constant dense<0.000000e+00> : vector<32x32xf32>
    %43 = tpu.matmul %6, %42, %cst_38 {dimension_numbers = #tpu.dot_dimension_numbers<[1], [0], [0], [1], [0, 0, 1, 1], [], []>, precision = #tpu.contract_precision<fp32>} : vector<32x4xf32>, vector<4x32xf32>, vector<32x32xf32> -> vector<32x32xf32>
    %cst_39 = arith.constant dense<0.000000e+00> : vector<32x32xf32>
    %44 = tpu.matmul %7, %40, %cst_39 {dimension_numbers = #tpu.dot_dimension_numbers<[1], [0], [0], [1], [0, 0, 1, 1], [], []>, precision = #tpu.contract_precision<fp32>} : vector<32x16xf32>, vector<16x32xf32>, vector<32x32xf32> -> vector<32x32xf32>
    %45 = arith.addf %44, %43 : vector<32x32xf32>
    %cst_40 = arith.constant 0.000000e+00 : f32
    %46 = vector.broadcast %cst_40 : f32 to vector<32x32xf32>
    %47 = arith.maximumf %45, %46 : vector<32x32xf32>
    %cst_41 = arith.constant dense<0.000000e+00> : vector<16x32xf32>
    %48 = tpu.matmul %8, %47, %cst_41 {dimension_numbers = #tpu.dot_dimension_numbers<[1], [0], [0], [1], [0, 0, 1, 1], [], []>, precision = #tpu.contract_precision<fp32>} : vector<16x32xf32>, vector<32x32xf32>, vector<16x32xf32> -> vector<16x32xf32>
    %c1_42 = arith.constant 1 : index
    %49 = memref.load %arg13[%c1_42] : memref<5xf32, #tpu.memory_space<smem>>
    %cst_43 = arith.constant 1.000000e+00 : f32
    %50 = arith.addf %cst_43, %49 : f32
    %51 = vector.broadcast %50 : f32 to vector<16x32xf32>
    %52 = arith.mulf %51, %40 : vector<16x32xf32>
    %53 = arith.addf %52, %48 : vector<16x32xf32>
    %c1_44 = arith.constant 1 : index
    %c0_45 = arith.constant 0 : index
    %c0_46 = arith.constant 0 : index
    %54 = vector.load %arg9[%c1_44, %c0_45, %c0_46] : memref<5x32x64xf32, #tpu.memory_space<vmem>>, vector<1x32x64xf32>
    %55 = vector.shape_cast %54 : vector<1x32x64xf32> to vector<32x64xf32>
    %cst_47 = arith.constant dense<0.000000e+00> : vector<16x64xf32>
    %56 = tpu.matmul %53, %55, %cst_47 {dimension_numbers = #tpu.dot_dimension_numbers<[1], [0], [0], [1], [0, 0, 1, 1], [], []>, precision = #tpu.contract_precision<fp32>} : vector<16x32xf32>, vector<32x64xf32>, vector<16x64xf32> -> vector<16x64xf32>
    %c1_48 = arith.constant 1 : index
    %c0_49 = arith.constant 0 : index
    %c0_50 = arith.constant 0 : index
    %57 = vector.load %arg10[%c1_48, %c0_49, %c0_50] : memref<5x1x64xf32, #tpu.memory_space<vmem>>, vector<1x1x64xf32>
    %58 = vector.shape_cast %57 : vector<1x1x64xf32> to vector<1x64xf32>
    %59 = vector.broadcast %58 : vector<1x64xf32> to vector<16x64xf32>
    %60 = arith.addf %56, %59 : vector<16x64xf32>
    %cst_51 = arith.constant 0.000000e+00 : f32
    %61 = vector.broadcast %cst_51 : f32 to vector<16x64xf32>
    %62 = arith.maximumf %60, %61 : vector<16x64xf32>
    %c1_52 = arith.constant 1 : index
    %c0_53 = arith.constant 0 : index
    %c0_54 = arith.constant 0 : index
    %63 = vector.load %arg11[%c1_52, %c0_53, %c0_54] : memref<5x64x32xf32, #tpu.memory_space<vmem>>, vector<1x64x32xf32>
    %64 = vector.shape_cast %63 : vector<1x64x32xf32> to vector<64x32xf32>
    %cst_55 = arith.constant dense<0.000000e+00> : vector<16x32xf32>
    %65 = tpu.matmul %62, %64, %cst_55 {dimension_numbers = #tpu.dot_dimension_numbers<[1], [0], [0], [1], [0, 0, 1, 1], [], []>, precision = #tpu.contract_precision<fp32>} : vector<16x64xf32>, vector<64x32xf32>, vector<16x32xf32> -> vector<16x32xf32>
    %c1_56 = arith.constant 1 : index
    %c0_57 = arith.constant 0 : index
    %c0_58 = arith.constant 0 : index
    %66 = vector.load %arg12[%c1_56, %c0_57, %c0_58] : memref<5x1x32xf32, #tpu.memory_space<vmem>>, vector<1x1x32xf32>
    %67 = vector.shape_cast %66 : vector<1x1x32xf32> to vector<1x32xf32>
    %68 = vector.broadcast %67 : vector<1x32xf32> to vector<16x32xf32>
    %69 = arith.addf %65, %68 : vector<16x32xf32>
    %cst_59 = arith.constant 0.000000e+00 : f32
    %70 = vector.broadcast %cst_59 : f32 to vector<16x32xf32>
    %71 = arith.maximumf %69, %70 : vector<16x32xf32>
    %72 = arith.addf %71, %40 : vector<16x32xf32>
    %c2 = arith.constant 2 : index
    %c0_60 = arith.constant 0 : index
    %c0_61 = arith.constant 0 : index
    %73 = vector.load %arg8[%c2, %c0_60, %c0_61] : memref<5x4x32xf32, #tpu.memory_space<vmem>>, vector<1x4x32xf32>
    %74 = vector.shape_cast %73 : vector<1x4x32xf32> to vector<4x32xf32>
    %cst_62 = arith.constant dense<0.000000e+00> : vector<32x32xf32>
    %75 = tpu.matmul %6, %74, %cst_62 {dimension_numbers = #tpu.dot_dimension_numbers<[1], [0], [0], [1], [0, 0, 1, 1], [], []>, precision = #tpu.contract_precision<fp32>} : vector<32x4xf32>, vector<4x32xf32>, vector<32x32xf32> -> vector<32x32xf32>
    %cst_63 = arith.constant dense<0.000000e+00> : vector<32x32xf32>
    %76 = tpu.matmul %7, %72, %cst_63 {dimension_numbers = #tpu.dot_dimension_numbers<[1], [0], [0], [1], [0, 0, 1, 1], [], []>, precision = #tpu.contract_precision<fp32>} : vector<32x16xf32>, vector<16x32xf32>, vector<32x32xf32> -> vector<32x32xf32>
    %77 = arith.addf %76, %75 : vector<32x32xf32>
    %cst_64 = arith.constant 0.000000e+00 : f32
    %78 = vector.broadcast %cst_64 : f32 to vector<32x32xf32>
    %79 = arith.maximumf %77, %78 : vector<32x32xf32>
    %cst_65 = arith.constant dense<0.000000e+00> : vector<16x32xf32>
    %80 = tpu.matmul %8, %79, %cst_65 {dimension_numbers = #tpu.dot_dimension_numbers<[1], [0], [0], [1], [0, 0, 1, 1], [], []>, precision = #tpu.contract_precision<fp32>} : vector<16x32xf32>, vector<32x32xf32>, vector<16x32xf32> -> vector<16x32xf32>
    %c2_66 = arith.constant 2 : index
    %81 = memref.load %arg13[%c2_66] : memref<5xf32, #tpu.memory_space<smem>>
    %cst_67 = arith.constant 1.000000e+00 : f32
    %82 = arith.addf %cst_67, %81 : f32
    %83 = vector.broadcast %82 : f32 to vector<16x32xf32>
    %84 = arith.mulf %83, %72 : vector<16x32xf32>
    %85 = arith.addf %84, %80 : vector<16x32xf32>
    %c2_68 = arith.constant 2 : index
    %c0_69 = arith.constant 0 : index
    %c0_70 = arith.constant 0 : index
    %86 = vector.load %arg9[%c2_68, %c0_69, %c0_70] : memref<5x32x64xf32, #tpu.memory_space<vmem>>, vector<1x32x64xf32>
    %87 = vector.shape_cast %86 : vector<1x32x64xf32> to vector<32x64xf32>
    %cst_71 = arith.constant dense<0.000000e+00> : vector<16x64xf32>
    %88 = tpu.matmul %85, %87, %cst_71 {dimension_numbers = #tpu.dot_dimension_numbers<[1], [0], [0], [1], [0, 0, 1, 1], [], []>, precision = #tpu.contract_precision<fp32>} : vector<16x32xf32>, vector<32x64xf32>, vector<16x64xf32> -> vector<16x64xf32>
    %c2_72 = arith.constant 2 : index
    %c0_73 = arith.constant 0 : index
    %c0_74 = arith.constant 0 : index
    %89 = vector.load %arg10[%c2_72, %c0_73, %c0_74] : memref<5x1x64xf32, #tpu.memory_space<vmem>>, vector<1x1x64xf32>
    %90 = vector.shape_cast %89 : vector<1x1x64xf32> to vector<1x64xf32>
    %91 = vector.broadcast %90 : vector<1x64xf32> to vector<16x64xf32>
    %92 = arith.addf %88, %91 : vector<16x64xf32>
    %cst_75 = arith.constant 0.000000e+00 : f32
    %93 = vector.broadcast %cst_75 : f32 to vector<16x64xf32>
    %94 = arith.maximumf %92, %93 : vector<16x64xf32>
    %c2_76 = arith.constant 2 : index
    %c0_77 = arith.constant 0 : index
    %c0_78 = arith.constant 0 : index
    %95 = vector.load %arg11[%c2_76, %c0_77, %c0_78] : memref<5x64x32xf32, #tpu.memory_space<vmem>>, vector<1x64x32xf32>
    %96 = vector.shape_cast %95 : vector<1x64x32xf32> to vector<64x32xf32>
    %cst_79 = arith.constant dense<0.000000e+00> : vector<16x32xf32>
    %97 = tpu.matmul %94, %96, %cst_79 {dimension_numbers = #tpu.dot_dimension_numbers<[1], [0], [0], [1], [0, 0, 1, 1], [], []>, precision = #tpu.contract_precision<fp32>} : vector<16x64xf32>, vector<64x32xf32>, vector<16x32xf32> -> vector<16x32xf32>
    %c2_80 = arith.constant 2 : index
    %c0_81 = arith.constant 0 : index
    %c0_82 = arith.constant 0 : index
    %98 = vector.load %arg12[%c2_80, %c0_81, %c0_82] : memref<5x1x32xf32, #tpu.memory_space<vmem>>, vector<1x1x32xf32>
    %99 = vector.shape_cast %98 : vector<1x1x32xf32> to vector<1x32xf32>
    %100 = vector.broadcast %99 : vector<1x32xf32> to vector<16x32xf32>
    %101 = arith.addf %97, %100 : vector<16x32xf32>
    %cst_83 = arith.constant 0.000000e+00 : f32
    %102 = vector.broadcast %cst_83 : f32 to vector<16x32xf32>
    %103 = arith.maximumf %101, %102 : vector<16x32xf32>
    %104 = arith.addf %103, %72 : vector<16x32xf32>
    %c3 = arith.constant 3 : index
    %c0_84 = arith.constant 0 : index
    %c0_85 = arith.constant 0 : index
    %105 = vector.load %arg8[%c3, %c0_84, %c0_85] : memref<5x4x32xf32, #tpu.memory_space<vmem>>, vector<1x4x32xf32>
    %106 = vector.shape_cast %105 : vector<1x4x32xf32> to vector<4x32xf32>
    %cst_86 = arith.constant dense<0.000000e+00> : vector<32x32xf32>
    %107 = tpu.matmul %6, %106, %cst_86 {dimension_numbers = #tpu.dot_dimension_numbers<[1], [0], [0], [1], [0, 0, 1, 1], [], []>, precision = #tpu.contract_precision<fp32>} : vector<32x4xf32>, vector<4x32xf32>, vector<32x32xf32> -> vector<32x32xf32>
    %cst_87 = arith.constant dense<0.000000e+00> : vector<32x32xf32>
    %108 = tpu.matmul %7, %104, %cst_87 {dimension_numbers = #tpu.dot_dimension_numbers<[1], [0], [0], [1], [0, 0, 1, 1], [], []>, precision = #tpu.contract_precision<fp32>} : vector<32x16xf32>, vector<16x32xf32>, vector<32x32xf32> -> vector<32x32xf32>
    %109 = arith.addf %108, %107 : vector<32x32xf32>
    %cst_88 = arith.constant 0.000000e+00 : f32
    %110 = vector.broadcast %cst_88 : f32 to vector<32x32xf32>
    %111 = arith.maximumf %109, %110 : vector<32x32xf32>
    %cst_89 = arith.constant dense<0.000000e+00> : vector<16x32xf32>
    %112 = tpu.matmul %8, %111, %cst_89 {dimension_numbers = #tpu.dot_dimension_numbers<[1], [0], [0], [1], [0, 0, 1, 1], [], []>, precision = #tpu.contract_precision<fp32>} : vector<16x32xf32>, vector<32x32xf32>, vector<16x32xf32> -> vector<16x32xf32>
    %c3_90 = arith.constant 3 : index
    %113 = memref.load %arg13[%c3_90] : memref<5xf32, #tpu.memory_space<smem>>
    %cst_91 = arith.constant 1.000000e+00 : f32
    %114 = arith.addf %cst_91, %113 : f32
    %115 = vector.broadcast %114 : f32 to vector<16x32xf32>
    %116 = arith.mulf %115, %104 : vector<16x32xf32>
    %117 = arith.addf %116, %112 : vector<16x32xf32>
    %c3_92 = arith.constant 3 : index
    %c0_93 = arith.constant 0 : index
    %c0_94 = arith.constant 0 : index
    %118 = vector.load %arg9[%c3_92, %c0_93, %c0_94] : memref<5x32x64xf32, #tpu.memory_space<vmem>>, vector<1x32x64xf32>
    %119 = vector.shape_cast %118 : vector<1x32x64xf32> to vector<32x64xf32>
    %cst_95 = arith.constant dense<0.000000e+00> : vector<16x64xf32>
    %120 = tpu.matmul %117, %119, %cst_95 {dimension_numbers = #tpu.dot_dimension_numbers<[1], [0], [0], [1], [0, 0, 1, 1], [], []>, precision = #tpu.contract_precision<fp32>} : vector<16x32xf32>, vector<32x64xf32>, vector<16x64xf32> -> vector<16x64xf32>
    %c3_96 = arith.constant 3 : index
    %c0_97 = arith.constant 0 : index
    %c0_98 = arith.constant 0 : index
    %121 = vector.load %arg10[%c3_96, %c0_97, %c0_98] : memref<5x1x64xf32, #tpu.memory_space<vmem>>, vector<1x1x64xf32>
    %122 = vector.shape_cast %121 : vector<1x1x64xf32> to vector<1x64xf32>
    %123 = vector.broadcast %122 : vector<1x64xf32> to vector<16x64xf32>
    %124 = arith.addf %120, %123 : vector<16x64xf32>
    %cst_99 = arith.constant 0.000000e+00 : f32
    %125 = vector.broadcast %cst_99 : f32 to vector<16x64xf32>
    %126 = arith.maximumf %124, %125 : vector<16x64xf32>
    %c3_100 = arith.constant 3 : index
    %c0_101 = arith.constant 0 : index
    %c0_102 = arith.constant 0 : index
    %127 = vector.load %arg11[%c3_100, %c0_101, %c0_102] : memref<5x64x32xf32, #tpu.memory_space<vmem>>, vector<1x64x32xf32>
    %128 = vector.shape_cast %127 : vector<1x64x32xf32> to vector<64x32xf32>
    %cst_103 = arith.constant dense<0.000000e+00> : vector<16x32xf32>
    %129 = tpu.matmul %126, %128, %cst_103 {dimension_numbers = #tpu.dot_dimension_numbers<[1], [0], [0], [1], [0, 0, 1, 1], [], []>, precision = #tpu.contract_precision<fp32>} : vector<16x64xf32>, vector<64x32xf32>, vector<16x32xf32> -> vector<16x32xf32>
    %c3_104 = arith.constant 3 : index
    %c0_105 = arith.constant 0 : index
    %c0_106 = arith.constant 0 : index
    %130 = vector.load %arg12[%c3_104, %c0_105, %c0_106] : memref<5x1x32xf32, #tpu.memory_space<vmem>>, vector<1x1x32xf32>
    %131 = vector.shape_cast %130 : vector<1x1x32xf32> to vector<1x32xf32>
    %132 = vector.broadcast %131 : vector<1x32xf32> to vector<16x32xf32>
    %133 = arith.addf %129, %132 : vector<16x32xf32>
    %cst_107 = arith.constant 0.000000e+00 : f32
    %134 = vector.broadcast %cst_107 : f32 to vector<16x32xf32>
    %135 = arith.maximumf %133, %134 : vector<16x32xf32>
    %136 = arith.addf %135, %104 : vector<16x32xf32>
    %c4 = arith.constant 4 : index
    %c0_108 = arith.constant 0 : index
    %c0_109 = arith.constant 0 : index
    %137 = vector.load %arg8[%c4, %c0_108, %c0_109] : memref<5x4x32xf32, #tpu.memory_space<vmem>>, vector<1x4x32xf32>
    %138 = vector.shape_cast %137 : vector<1x4x32xf32> to vector<4x32xf32>
    %cst_110 = arith.constant dense<0.000000e+00> : vector<32x32xf32>
    %139 = tpu.matmul %6, %138, %cst_110 {dimension_numbers = #tpu.dot_dimension_numbers<[1], [0], [0], [1], [0, 0, 1, 1], [], []>, precision = #tpu.contract_precision<fp32>} : vector<32x4xf32>, vector<4x32xf32>, vector<32x32xf32> -> vector<32x32xf32>
    %cst_111 = arith.constant dense<0.000000e+00> : vector<32x32xf32>
    %140 = tpu.matmul %7, %136, %cst_111 {dimension_numbers = #tpu.dot_dimension_numbers<[1], [0], [0], [1], [0, 0, 1, 1], [], []>, precision = #tpu.contract_precision<fp32>} : vector<32x16xf32>, vector<16x32xf32>, vector<32x32xf32> -> vector<32x32xf32>
    %141 = arith.addf %140, %139 : vector<32x32xf32>
    %cst_112 = arith.constant 0.000000e+00 : f32
    %142 = vector.broadcast %cst_112 : f32 to vector<32x32xf32>
    %143 = arith.maximumf %141, %142 : vector<32x32xf32>
    %cst_113 = arith.constant dense<0.000000e+00> : vector<16x32xf32>
    %144 = tpu.matmul %8, %143, %cst_113 {dimension_numbers = #tpu.dot_dimension_numbers<[1], [0], [0], [1], [0, 0, 1, 1], [], []>, precision = #tpu.contract_precision<fp32>} : vector<16x32xf32>, vector<32x32xf32>, vector<16x32xf32> -> vector<16x32xf32>
    %c4_114 = arith.constant 4 : index
    %145 = memref.load %arg13[%c4_114] : memref<5xf32, #tpu.memory_space<smem>>
    %cst_115 = arith.constant 1.000000e+00 : f32
    %146 = arith.addf %cst_115, %145 : f32
    %147 = vector.broadcast %146 : f32 to vector<16x32xf32>
    %148 = arith.mulf %147, %136 : vector<16x32xf32>
    %149 = arith.addf %148, %144 : vector<16x32xf32>
    %c4_116 = arith.constant 4 : index
    %c0_117 = arith.constant 0 : index
    %c0_118 = arith.constant 0 : index
    %150 = vector.load %arg9[%c4_116, %c0_117, %c0_118] : memref<5x32x64xf32, #tpu.memory_space<vmem>>, vector<1x32x64xf32>
    %151 = vector.shape_cast %150 : vector<1x32x64xf32> to vector<32x64xf32>
    %cst_119 = arith.constant dense<0.000000e+00> : vector<16x64xf32>
    %152 = tpu.matmul %149, %151, %cst_119 {dimension_numbers = #tpu.dot_dimension_numbers<[1], [0], [0], [1], [0, 0, 1, 1], [], []>, precision = #tpu.contract_precision<fp32>} : vector<16x32xf32>, vector<32x64xf32>, vector<16x64xf32> -> vector<16x64xf32>
    %c4_120 = arith.constant 4 : index
    %c0_121 = arith.constant 0 : index
    %c0_122 = arith.constant 0 : index
    %153 = vector.load %arg10[%c4_120, %c0_121, %c0_122] : memref<5x1x64xf32, #tpu.memory_space<vmem>>, vector<1x1x64xf32>
    %154 = vector.shape_cast %153 : vector<1x1x64xf32> to vector<1x64xf32>
    %155 = vector.broadcast %154 : vector<1x64xf32> to vector<16x64xf32>
    %156 = arith.addf %152, %155 : vector<16x64xf32>
    %cst_123 = arith.constant 0.000000e+00 : f32
    %157 = vector.broadcast %cst_123 : f32 to vector<16x64xf32>
    %158 = arith.maximumf %156, %157 : vector<16x64xf32>
    %c4_124 = arith.constant 4 : index
    %c0_125 = arith.constant 0 : index
    %c0_126 = arith.constant 0 : index
    %159 = vector.load %arg11[%c4_124, %c0_125, %c0_126] : memref<5x64x32xf32, #tpu.memory_space<vmem>>, vector<1x64x32xf32>
    %160 = vector.shape_cast %159 : vector<1x64x32xf32> to vector<64x32xf32>
    %cst_127 = arith.constant dense<0.000000e+00> : vector<16x32xf32>
    %161 = tpu.matmul %158, %160, %cst_127 {dimension_numbers = #tpu.dot_dimension_numbers<[1], [0], [0], [1], [0, 0, 1, 1], [], []>, precision = #tpu.contract_precision<fp32>} : vector<16x64xf32>, vector<64x32xf32>, vector<16x32xf32> -> vector<16x32xf32>
    %c4_128 = arith.constant 4 : index
    %c0_129 = arith.constant 0 : index
    %c0_130 = arith.constant 0 : index
    %162 = vector.load %arg12[%c4_128, %c0_129, %c0_130] : memref<5x1x32xf32, #tpu.memory_space<vmem>>, vector<1x1x32xf32>
    %163 = vector.shape_cast %162 : vector<1x1x32xf32> to vector<1x32xf32>
    %164 = vector.broadcast %163 : vector<1x32xf32> to vector<16x32xf32>
    %165 = arith.addf %161, %164 : vector<16x32xf32>
    %166 = arith.addf %165, %136 : vector<16x32xf32>
    %c0_131 = arith.constant 0 : index
    %c0_132 = arith.constant 0 : index
    %167 = vector.load %arg5[%c0_131, %c0_132] : memref<2x16xf32, #tpu.memory_space<vmem>>, vector<2x16xf32>
    %cst_133 = arith.constant dense<0.000000e+00> : vector<2x32xf32>
    %168 = tpu.matmul %167, %166, %cst_133 {dimension_numbers = #tpu.dot_dimension_numbers<[1], [0], [0], [1], [0, 0, 1, 1], [], []>, precision = #tpu.contract_precision<fp32>} : vector<2x16xf32>, vector<16x32xf32>, vector<2x32xf32> -> vector<2x32xf32>
    %c0_134 = arith.constant 0 : index
    %c0_135 = arith.constant 0 : index
    %169 = vector.load %arg14[%c0_134, %c0_135] : memref<32x64xf32, #tpu.memory_space<vmem>>, vector<32x64xf32>
    %cst_136 = arith.constant dense<0.000000e+00> : vector<2x64xf32>
    %170 = tpu.matmul %168, %169, %cst_136 {dimension_numbers = #tpu.dot_dimension_numbers<[1], [0], [0], [1], [0, 0, 1, 1], [], []>, precision = #tpu.contract_precision<fp32>} : vector<2x32xf32>, vector<32x64xf32>, vector<2x64xf32> -> vector<2x64xf32>
    %c0_137 = arith.constant 0 : index
    %c0_138 = arith.constant 0 : index
    %171 = vector.load %arg15[%c0_137, %c0_138] : memref<1x64xf32, #tpu.memory_space<vmem>>, vector<1x64xf32>
    %172 = vector.broadcast %171 : vector<1x64xf32> to vector<2x64xf32>
    %173 = arith.addf %170, %172 : vector<2x64xf32>
    %cst_139 = arith.constant 0.000000e+00 : f32
    %174 = vector.broadcast %cst_139 : f32 to vector<2x64xf32>
    %175 = arith.maximumf %173, %174 : vector<2x64xf32>
    %c0_140 = arith.constant 0 : index
    %c0_141 = arith.constant 0 : index
    %176 = vector.load %arg16[%c0_140, %c0_141] : memref<64x3xf32, #tpu.memory_space<vmem>>, vector<64x3xf32>
    %cst_142 = arith.constant dense<0.000000e+00> : vector<2x3xf32>
    %177 = tpu.matmul %175, %176, %cst_142 {dimension_numbers = #tpu.dot_dimension_numbers<[1], [0], [0], [1], [0, 0, 1, 1], [], []>, precision = #tpu.contract_precision<fp32>} : vector<2x64xf32>, vector<64x3xf32>, vector<2x3xf32> -> vector<2x3xf32>
    %c0_143 = arith.constant 0 : index
    %c0_144 = arith.constant 0 : index
    %178 = vector.load %arg17[%c0_143, %c0_144] : memref<1x3xf32, #tpu.memory_space<vmem>>, vector<1x3xf32>
    %179 = vector.broadcast %178 : vector<1x3xf32> to vector<2x3xf32>
    %180 = arith.addf %177, %179 : vector<2x3xf32>
    %c0_145 = arith.constant 0 : index
    %c0_146 = arith.constant 0 : index
    %181 = vector.load %arg18[%c0_145, %c0_146] : memref<2x3xf32, #tpu.memory_space<vmem>>, vector<2x3xf32>
    tpu.vector_store %arg18[%c0_145, %c0_146], %180 {strides = array<i32>} : memref<2x3xf32, #tpu.memory_space<vmem>>, vector<2x3xf32>,
    return
  }
  func.func @transform_0(%arg0: i32) -> (i32, i32) {
    %c0_i32 = arith.constant 0 : i32
    %c0_i32_0 = arith.constant 0 : i32
    %c0_i32_1 = arith.constant 0 : i32
    return %c0_i32, %c0_i32_0 : i32, i32
  }
  func.func @transform_1(%arg0: i32) -> (i32, i32) {
    %c0_i32 = arith.constant 0 : i32
    %c0_i32_0 = arith.constant 0 : i32
    %c0_i32_1 = arith.constant 0 : i32
    return %c0_i32, %c0_i32_0 : i32, i32
  }
  func.func @transform_2(%arg0: i32) -> (i32, i32) {
    %c0_i32 = arith.constant 0 : i32
    %c0_i32_0 = arith.constant 0 : i32
    %c0_i32_1 = arith.constant 0 : i32
    return %c0_i32, %c0_i32_0 : i32, i32
  }
  func.func @transform_3(%arg0: i32) -> (i32, i32) {
    %c0_i32 = arith.constant 0 : i32
    %c0_i32_0 = arith.constant 0 : i32
    %c0_i32_1 = arith.constant 0 : i32
    return %c0_i32, %c0_i32_0 : i32, i32
  }
  func.func @transform_4(%arg0: i32) -> (i32, i32) {
    %c0_i32 = arith.constant 0 : i32
    %c0_i32_0 = arith.constant 0 : i32
    %c0_i32_1 = arith.constant 0 : i32
    return %c0_i32, %c0_i32_0 : i32, i32
  }
  func.func @transform_5(%arg0: i32) -> (i32, i32) {
    %c0_i32 = arith.constant 0 : i32
    %c0_i32_0 = arith.constant 0 : i32
    %c0_i32_1 = arith.constant 0 : i32
    return %c0_i32, %c0_i32_0 : i32, i32
  }
  func.func @transform_6(%arg0: i32) -> (i32, i32) {
    %c0_i32 = arith.constant 0 : i32
    %c0_i32_0 = arith.constant 0 : i32
    %c0_i32_1 = arith.constant 0 : i32
    return %c0_i32, %c0_i32_0 : i32, i32
  }
  func.func @transform_7(%arg0: i32) -> (i32, i32, i32) {
    %c0_i32 = arith.constant 0 : i32
    %c0_i32_0 = arith.constant 0 : i32
    %c0_i32_1 = arith.constant 0 : i32
    %c0_i32_2 = arith.constant 0 : i32
    return %c0_i32, %c0_i32_0, %c0_i32_1 : i32, i32, i32
  }
  func.func @transform_8(%arg0: i32) -> (i32, i32, i32) {
    %c0_i32 = arith.constant 0 : i32
    %c0_i32_0 = arith.constant 0 : i32
    %c0_i32_1 = arith.constant 0 : i32
    %c0_i32_2 = arith.constant 0 : i32
    return %c0_i32, %c0_i32_0, %c0_i32_1 : i32, i32, i32
  }
  func.func @transform_9(%arg0: i32) -> (i32, i32, i32) {
    %c0_i32 = arith.constant 0 : i32
    %c0_i32_0 = arith.constant 0 : i32
    %c0_i32_1 = arith.constant 0 : i32
    %c0_i32_2 = arith.constant 0 : i32
    return %c0_i32, %c0_i32_0, %c0_i32_1 : i32, i32, i32
  }
  func.func @transform_10(%arg0: i32) -> (i32, i32, i32) {
    %c0_i32 = arith.constant 0 : i32
    %c0_i32_0 = arith.constant 0 : i32
    %c0_i32_1 = arith.constant 0 : i32
    %c0_i32_2 = arith.constant 0 : i32
    return %c0_i32, %c0_i32_0, %c0_i32_1 : i32, i32, i32
  }
  func.func @transform_11(%arg0: i32) -> (i32, i32, i32) {
    %c0_i32 = arith.constant 0 : i32
    %c0_i32_0 = arith.constant 0 : i32
    %c0_i32_1 = arith.constant 0 : i32
    %c0_i32_2 = arith.constant 0 : i32
    return %c0_i32, %c0_i32_0, %c0_i32_1 : i32, i32, i32
  }
  func.func @transform_12(%arg0: i32) -> i32 {
    %c0_i32 = arith.constant 0 : i32
    %c0_i32_0 = arith.constant 0 : i32
    return %c0_i32 : i32
  }
  func.func @transform_13(%arg0: i32) -> (i32, i32) {
    %c0_i32 = arith.constant 0 : i32
    %c0_i32_0 = arith.constant 0 : i32
    %c0_i32_1 = arith.constant 0 : i32
    return %c0_i32, %c0_i32_0 : i32, i32
  }
  func.func @transform_14(%arg0: i32) -> (i32, i32) {
    %c0_i32 = arith.constant 0 : i32
    %c0_i32_0 = arith.constant 0 : i32
    %c0_i32_1 = arith.constant 0 : i32
    return %c0_i32, %c0_i32_0 : i32, i32
  }
  func.func @transform_15(%arg0: i32) -> (i32, i32) {
    %c0_i32 = arith.constant 0 : i32
    %c0_i32_0 = arith.constant 0 : i32
    %c0_i32_1 = arith.constant 0 : i32
    return %c0_i32, %c0_i32_0 : i32, i32
  }
  func.func @transform_16(%arg0: i32) -> (i32, i32) {
    %c0_i32 = arith.constant 0 : i32
    %c0_i32_0 = arith.constant 0 : i32
    %c0_i32_1 = arith.constant 0 : i32
    return %c0_i32, %c0_i32_0 : i32, i32
  }
  func.func @transform_17(%arg0: i32) -> (i32, i32) {
    %c0_i32 = arith.constant 0 : i32
    %c0_i32_0 = arith.constant 0 : i32
    %c0_i32_1 = arith.constant 0 : i32
    return %c0_i32, %c0_i32_0 : i32, i32
  }
}

</mosaic_0001>

<bundles_post_ra>
// kernel: spmotif_forward.1
= control target key start
LH: loop header
LB: loop body
LE: loop exit
PB: predicated region body
PF: predicated region fallthrough
CT: control target
= control target key end

     0   :  { %s23426_s0 = inlined_call_operand.hbm [shape: f32[16,4], index: 0, kind: input, shape index: {}]   ;;  %s23427_s1 = inlined_call_operand.hbm [shape: f32[32,4], index: 1, kind: input, shape index: {}]   ;;  %s23428_s2 = inlined_call_operand.hbm [shape: f32[32,16], index: 2, kind: input, shape index: {}]   ;;  %s23429_s3 = inlined_call_operand.hbm [shape: f32[16,32], index: 3, kind: input, shape index: {}]   ;;  %s23430_s4 = inlined_call_operand.hbm [shape: f32[2,16], index: 4, kind: input, shape index: {}]   ;;  %s23431_s5 = inlined_call_operand.hbm [shape: f32[4,32], index: 5, kind: input, shape index: {}]   ;;  %s23432_s6 = inlined_call_operand.hbm [shape: f32[1,32], index: 6, kind: input, shape index: {}]   ;;  %s23433_s7 = inlined_call_operand.hbm [shape: f32[5,4,32], index: 7, kind: input, shape index: {}]   ;;  %s23434_s8 = inlined_call_operand.hbm [shape: f32[5,32,64], index: 8, kind: input, shape index: {}]   ;;  %s23435_s9 = inlined_call_operand.hbm [shape: f32[5,1,64], index: 9, kind: input, shape index: {}]   ;;  %s23436_s10 = inlined_call_operand.hbm [shape: f32[5,64,32], index: 10, kind: input, shape index: {}]   ;;  %s23437_s11 = inlined_call_operand.hbm [shape: f32[5,1,32], index: 11, kind: input, shape index: {}]   ;;  %s23438_s12 = inlined_call_operand.hbm [shape: f32[5], index: 12, kind: input, shape index: {}]   ;;  %s23439_s13 = inlined_call_operand.hbm [shape: f32[32,64], index: 13, kind: input, shape index: {}]   ;;  %s23440_s14 = inlined_call_operand.hbm [shape: f32[1,64], index: 14, kind: input, shape index: {}]   ;;  %s23441_s15 = inlined_call_operand.hbm [shape: f32[64,3], index: 15, kind: input, shape index: {}]   ;;  %s23442_s16 = inlined_call_operand.hbm [shape: f32[1,3], index: 16, kind: input, shape index: {}]   ;;  %s23443_s17 = inlined_call_operand.hbm [shape: f32[2,3], index: 17, kind: output, shape index: {}]  }
   0x1   :  { %23495 = sst [smem:[#allocation61_spill]] %s23426_s0 }
   0x2   :  { %23496 = sst [smem:[#allocation62_spill]] %s23427_s1 }
   0x3   :  { %23497 = sst [smem:[#allocation63_spill]] %s23443_s17 }
   0x4   :  { %22 = vsyncpa [#allocation3], 0 }
   0x5   :  { %23 = vsyncpa [#allocation7], 0 }
   0x6   :  { %24 = vsyncpa [#allocation10], 0 }
   0x7   :  { %25 = vsyncpa [#allocation13], 0 }
   0x8   :  { %26 = vsyncpa [#allocation16], 0 }
   0x9   :  { %27 = vsyncpa [#allocation19], 0 }
   0xa   :  { %28 = vsyncpa [#allocation22], 0 }
   0xb   :  { %29 = vsyncpa [#allocation5], 0 }
   0xc   :  { %30 = vsyncpa [#allocation26], 0 }
   0xd   :  { %31 = vsyncpa [#allocation29], 0 }
   0xe   :  { %32 = vsyncpa [#allocation4], 0  ;;  %s21903_s24 = smov [#allocation6]   ;;  %s21904_s26 = smov [#allocation9]  }
   0xf   :  { %s50_s25 = sshll.u32 %s21903_s24, 4  ;;  %s74_s27 = sshll.u32 %s21904_s26, 4  ;;  %s51_s25 = int_to_ptr.vmem [resolvable:$true] %s50_s25  ;;  %s22020_s27 = int_to_ptr.vmem [resolvable:$true] %s74_s27 }
  0x10   :  { %s23498_s0 = sld [smem:[#allocation62_spill]] }
  0x16   :  { %s21495_s30 = scalar_lea.hbm %s23498_s0, 512 }
  0x17   :  { %p21496_p0 = scmp.ne.s32.totalorder %s23498_s0, %s21495_s30  ;;  %p21499_p1 = scmp.lt.u32.totalorder %s21495_s30, %s23498_s0 }
  0x19   :  { %p21501_p2 = pnand %p21499_p1, %p21496_p0 }
  0x1b   :  { %21504 = shalt.err (!%p21501_p2)
}
  0x1c   :  { %s21505_s21 = scalar_lea.vmem %s51_s25, 512  ;;  %p21510_p4 = scmp.lt.s32.totalorder %s51_s25, %s51_s25 }
  0x1d   :  { %p21506_p3 = scmp.ne.s32.totalorder %s51_s25, %s21505_s21  ;;  %p21511_p5 = scmp.lt.s32.totalorder %s21505_s21, %s21505_s21 }
  0x1f   :  { %p21512_p6 = por %p21511_p5, %p21510_p4 }
  0x21   :  { %p21513_p7 = pnand %p21512_p6, %p21506_p3 }
  0x23   :  { %21516 = shalt.err (!%p21513_p7)
}
  0x24   :  { %s21905_s22 = smov 128   ;;  %s21906_s23 = smov 8  }
  0x25   :  { %56 = dma.hbm_to_vmem [thread:$0]  %s23498_s0, 512, %s51_s25, [#allocation7], %s21905_s22, %s21905_s22, %s21906_s23  }
  0x26   :  { %s21517_s30 = scalar_lea.hbm %s23429_s3, 256 }
  0x27   :  { %p21518_p8 = scmp.ne.s32.totalorder %s23429_s3, %s21517_s30  ;;  %p21521_p9 = scmp.lt.u32.totalorder %s21517_s30, %s23429_s3 }
  0x29   :  { %p21523_p10 = pnand %p21521_p9, %p21518_p8 }
  0x2b   :  { %21526 = shalt.err (!%p21523_p10)
}
  0x2c   :  { %s21527_s21 = scalar_lea.vmem %s22020_s27, 256  ;;  %p21532_p12 = scmp.lt.s32.totalorder %s22020_s27, %s22020_s27 }
  0x2d   :  { %p21528_p11 = scmp.ne.s32.totalorder %s22020_s27, %s21527_s21  ;;  %p21533_p13 = scmp.lt.s32.totalorder %s21527_s21, %s21527_s21 }
  0x2f   :  { %p21534_p0 = por %p21533_p13, %p21532_p12 }
  0x31   :  { %p21535_p1 = pnand %p21534_p0, %p21528_p11 }
  0x33   :  { %21538 = shalt.err (!%p21535_p1)
}
  0x34   :  { %80 = dma.hbm_to_vmem [thread:$0]  %s23429_s3, 256, %s22020_s27, [#allocation10], %s21905_s22, %s21905_s22, %s21906_s23  }
  0x35   :  { %s21907_s24 = smov [#allocation12]   ;;  %s21908_s28 = smov [#allocation15]  }
  0x36   :  { %s97_s26 = sshll.u32 %s21907_s24, 4  ;;  %s116_s29 = sshll.u32 %s21908_s28, 4  ;;  %s98_s26 = int_to_ptr.vmem [resolvable:$true] %s97_s26  ;;  %s22057_s29 = int_to_ptr.vmem [resolvable:$true] %s116_s29 }
  0x37   :  { %s21539_s19 = scalar_lea.hbm %s23431_s5, 64 }
  0x38   :  { %p21540_p2 = scmp.ne.s32.totalorder %s23431_s5, %s21539_s19  ;;  %p21543_p3 = scmp.lt.u32.totalorder %s21539_s19, %s23431_s5 }
  0x3a   :  { %p21545_p4 = pnand %p21543_p3, %p21540_p2 }
  0x3c   :  { %21548 = shalt.err (!%p21545_p4)
}
  0x3d   :  { %s21549_s3 = scalar_lea.vmem %s98_s26, 64  ;;  %p21554_p6 = scmp.lt.s32.totalorder %s98_s26, %s98_s26 }
  0x3e   :  { %p21550_p5 = scmp.ne.s32.totalorder %s98_s26, %s21549_s3  ;;  %p21555_p7 = scmp.lt.s32.totalorder %s21549_s3, %s21549_s3 }
  0x40   :  { %p21556_p8 = por %p21555_p7, %p21554_p6 }
  0x42   :  { %p21557_p9 = pnand %p21556_p8, %p21550_p5 }
  0x44   :  { %21560 = shalt.err (!%p21557_p9)
}
  0x45   :  { %100 = dma.hbm_to_vmem [thread:$0]  %s23431_s5, 64, %s98_s26, [#allocation13]  }
  0x46   :  { %s21561_s28 = scalar_lea.hbm %s23433_s7, 320 }
  0x47   :  { %p21562_p10 = scmp.ne.s32.totalorder %s23433_s7, %s21561_s28  ;;  %p21565_p11 = scmp.lt.u32.totalorder %s21561_s28, %s23433_s7 }
  0x49   :  { %p21567_p12 = pnand %p21565_p11, %p21562_p10 }
  0x4b   :  { %21570 = shalt.err (!%p21567_p12)
}
  0x4c   :  { %s21571_s1 = scalar_lea.vmem %s22057_s29, 320  ;;  %p21576_p0 = scmp.lt.s32.totalorder %s22057_s29, %s22057_s29 }
  0x4d   :  { %p21572_p13 = scmp.ne.s32.totalorder %s22057_s29, %s21571_s1  ;;  %p21577_p1 = scmp.lt.s32.totalorder %s21571_s1, %s21571_s1 }
  0x4f   :  { %p21578_p2 = por %p21577_p1, %p21576_p0 }
  0x51   :  { %p21579_p3 = pnand %p21578_p2, %p21572_p13 }
  0x53   :  { %21582 = shalt.err (!%p21579_p3)
}
  0x54   :  { %s21909_s5 = smov 64   ;;  %s21910_s26 = smov 4  }
  0x55   :  { %122 = dma.hbm_to_vmem [thread:$0]  %s23433_s7, 320, %s22057_s29, [#allocation16], %s21909_s5, %s21909_s5, %s21910_s26  }
  0x56   :  { %s21911_s3 = smov [#allocation18]   ;;  %s21583_s24 = scalar_lea.hbm %s23435_s9, 80 }
  0x57   :  { %s140_s27 = sshll.u32 %s21911_s3, 4  ;;  %p21584_p4 = scmp.ne.s32.totalorder %s23435_s9, %s21583_s24  ;;  %s141_s27 = int_to_ptr.vmem [resolvable:$true] %s140_s27 }
  0x58   :  { %p21587_p5 = scmp.lt.u32.totalorder %s21583_s24, %s23435_s9 }
  0x5a   :  { %p21589_p6 = pnand %p21587_p5, %p21584_p4 }
  0x5c   :  { %21592 = shalt.err (!%p21589_p6)
}
  0x5d   :  { %s21593_s19 = scalar_lea.vmem %s141_s27, 80  ;;  %s21597_s7 = scalar_lea.vmem %s141_s27, 96 }
  0x5e   :  { %p21594_p7 = scmp.ne.s32.totalorder %s141_s27, %s21593_s19  ;;  %p21598_p8 = scmp.lt.s32.totalorder %s141_s27, %s141_s27 }
  0x5f   :  { %p21599_p9 = scmp.lt.s32.totalorder %s21597_s7, %s21593_s19 }
  0x61   :  { %p21600_p10 = por %p21599_p9, %p21598_p8 }
  0x63   :  { %p21601_p11 = pnand %p21600_p10, %p21594_p7 }
  0x65   :  { %21604 = shalt.err (!%p21601_p11)
}
  0x66   :  { %s21912_s29 = smov 16   ;;  %s21913_s1 = smov 1  }
  0x67   :  { %146 = dma.hbm_to_vmem [thread:$0]  %s23435_s9, 80, %s141_s27, [#allocation19], %s21912_s29, %s21912_s29, %s21913_s1  }
  0x68   :  { %s21914_s20 = smov [#allocation21]   ;;  %s21915_s3 = smov [#allocation25]  }
  0x69   :  { %s164_s21 = sshll.u32 %s21914_s20, 4  ;;  %s197_s25 = sshll.u32 %s21915_s3, 4  ;;  %s165_s21 = int_to_ptr.vmem [resolvable:$true] %s164_s21  ;;  %s198_s25 = int_to_ptr.vmem [resolvable:$true] %s197_s25 }
  0x6a   :  { %s21605_s28 = scalar_lea.hbm %s23437_s11, 80 }
  0x6b   :  { %p21606_p12 = scmp.ne.s32.totalorder %s23437_s11, %s21605_s28  ;;  %p21609_p13 = scmp.lt.u32.totalorder %s21605_s28, %s23437_s11 }
  0x6d   :  { %p21611_p0 = pnand %p21609_p13, %p21606_p12 }
  0x6f   :  { %21614 = shalt.err (!%p21611_p0)
}
  0x70   :  { %s21615_s9 = scalar_lea.vmem %s165_s21, 80  ;;  %s21619_s27 = scalar_lea.vmem %s165_s21, 96 }
  0x71   :  { %p21616_p1 = scmp.ne.s32.totalorder %s165_s21, %s21615_s9  ;;  %p21620_p2 = scmp.lt.s32.totalorder %s165_s21, %s165_s21 }
  0x72   :  { %p21621_p3 = scmp.lt.s32.totalorder %s21619_s27, %s21615_s9 }
  0x74   :  { %p21622_p4 = por %p21621_p3, %p21620_p2 }
  0x76   :  { %p21623_p5 = pnand %p21622_p4, %p21616_p1 }
  0x78   :  { %21626 = shalt.err (!%p21623_p5)
}
  0x79   :  { %170 = dma.hbm_to_vmem [thread:$0]  %s23437_s11, 80, %s165_s21, [#allocation22], %s21912_s29, %s21912_s29, %s21913_s1  }
  0x7a   :  { %s21627_s3 = scalar_lea.hbm %s23440_s14, 16 }
  0x7b   :  { %p21628_p6 = scmp.ne.s32.totalorder %s23440_s14, %s21627_s3  ;;  %p21631_p7 = scmp.lt.u32.totalorder %s21627_s3, %s23440_s14 }
  0x7d   :  { %p21633_p8 = pnand %p21631_p7, %p21628_p6 }
  0x7f   :  { %21636 = shalt.err (!%p21633_p8)
}
  0x80   :  { %s21637_s17 = scalar_lea.vmem %s198_s25, 16  ;;  %s21641_s18 = scalar_lea.vmem %s198_s25, 32 }
  0x81   :  { %p21638_p9 = scmp.ne.s32.totalorder %s198_s25, %s21637_s17  ;;  %p21642_p10 = scmp.lt.s32.totalorder %s198_s25, %s198_s25 }
  0x82   :  { %p21643_p11 = scmp.lt.s32.totalorder %s21641_s18, %s21637_s17 }
  0x84   :  { %p21644_p12 = por %p21643_p11, %p21642_p10 }
  0x86   :  { %p21645_p13 = pnand %p21644_p12, %p21638_p9 }
  0x88   :  { %21648 = shalt.err (!%p21645_p13)
}
  0x89   :  { %200 = dma.hbm_to_vmem [thread:$0]  %s23440_s14, 16, %s198_s25, [#allocation26]  }
  0x8a   :  { %s21916_s1 = smov [#allocation2]   ;;  %s21917_s19 = smov [#allocation8]  }
  0x8b   :  { %s38_s21 = sshll.u32 %s21916_s1, 4  ;;  %s62_s9 = sshll.u32 %s21917_s19, 4  ;;  %s39_s21 = int_to_ptr.vmem [resolvable:$true] %s38_s21  ;;  %s63_s9 = int_to_ptr.vmem [resolvable:$true] %s62_s9 }
  0x8c   :  { %s23499_s5 = sld [smem:[#allocation61_spill]] }
  0x92   :  { %s21649_s26 = scalar_lea.hbm %s23499_s5, 256 }
  0x93   :  { %p21650_p0 = scmp.ne.s32.totalorder %s23499_s5, %s21649_s26  ;;  %p21653_p1 = scmp.lt.u32.totalorder %s21649_s26, %s23499_s5 }
  0x95   :  { %p21655_p2 = pnand %p21653_p1, %p21650_p0 }
  0x97   :  { %21658 = shalt.err (!%p21655_p2)
}
  0x98   :  { %s21659_s14 = scalar_lea.vmem %s39_s21, 256  ;;  %p21664_p4 = scmp.lt.s32.totalorder %s39_s21, %s39_s21 }
  0x99   :  { %p21660_p3 = scmp.ne.s32.totalorder %s39_s21, %s21659_s14  ;;  %p21665_p5 = scmp.lt.s32.totalorder %s21659_s14, %s21659_s14 }
  0x9b   :  { %p21666_p6 = por %p21665_p5, %p21664_p4 }
  0x9d   :  { %p21667_p7 = pnand %p21666_p6, %p21660_p3 }
  0x9f   :  { %21670 = shalt.err (!%p21667_p7)
}
  0xa0   :  { %44 = dma.hbm_to_vmem [thread:$0]  %s23499_s5, 256, %s39_s21, [#allocation3], %s21905_s22, %s21905_s22, %s21906_s23  }
  0xa1   :  { %s21671_s18 = scalar_lea.hbm %s23428_s2, 512 }
  0xa2   :  { %p21672_p8 = scmp.ne.s32.totalorder %s23428_s2, %s21671_s18  ;;  %p21675_p9 = scmp.lt.u32.totalorder %s21671_s18, %s23428_s2 }
  0xa4   :  { %p21677_p10 = pnand %p21675_p9, %p21672_p8 }
  0xa6   :  { %21680 = shalt.err (!%p21677_p10)
}
  0xa7   :  { %s21681_s27 = scalar_lea.vmem %s63_s9, 512  ;;  %p21686_p12 = scmp.lt.s32.totalorder %s63_s9, %s63_s9 }
  0xa8   :  { %p21682_p11 = scmp.ne.s32.totalorder %s63_s9, %s21681_s27  ;;  %p21687_p13 = scmp.lt.s32.totalorder %s21681_s27, %s21681_s27 }
  0xaa   :  { %p21688_p0 = por %p21687_p13, %p21686_p12 }
  0xac   :  { %p21689_p1 = pnand %p21688_p0, %p21682_p11 }
  0xae   :  { %21692 = shalt.err (!%p21689_p1)
}
  0xaf   :  { %68 = dma.hbm_to_vmem [thread:$0]  %s23428_s2, 512, %s63_s9, [#allocation7], %s21905_s22, %s21905_s22, %s21906_s23  }
  0xb0   :  { %s21918_s5 = smov [#allocation11]   ;;  %s21919_s20 = smov [#allocation14]  }
  0xb1   :  { %s87_s26 = sshll.u32 %s21918_s5, 4  ;;  %s107_s3 = sshll.u32 %s21919_s20, 4  ;;  %s88_s26 = int_to_ptr.vmem [resolvable:$true] %s87_s26  ;;  %s108_s3 = int_to_ptr.vmem [resolvable:$true] %s107_s3 }
  0xb2   :  { %s21693_s14 = scalar_lea.hbm %s23430_s4, 32 }
  0xb3   :  { %p21694_p2 = scmp.ne.s32.totalorder %s23430_s4, %s21693_s14  ;;  %p21697_p3 = scmp.lt.u32.totalorder %s21693_s14, %s23430_s4 }
  0xb5   :  { %p21699_p4 = pnand %p21697_p3, %p21694_p2 }
  0xb7   :  { %21702 = shalt.err (!%p21699_p4)
}
  0xb8   :  { %s21703_s2 = scalar_lea.vmem %s88_s26, 32  ;;  %p21708_p6 = scmp.lt.s32.totalorder %s88_s26, %s88_s26 }
  0xb9   :  { %p21704_p5 = scmp.ne.s32.totalorder %s88_s26, %s21703_s2  ;;  %p21709_p7 = scmp.lt.s32.totalorder %s21703_s2, %s21703_s2 }
  0xbb   :  { %p21710_p8 = por %p21709_p7, %p21708_p6 }
  0xbd   :  { %p21711_p9 = pnand %p21710_p8, %p21704_p5 }
  0xbf   :  { %21714 = shalt.err (!%p21711_p9)
}
  0xc0   :  { %90 = dma.hbm_to_vmem [thread:$0]  %s23430_s4, 32, %s88_s26, [#allocation10]  }
  0xc1   :  { %s21715_s1 = scalar_lea.hbm %s23432_s6, 16 }
  0xc2   :  { %p21716_p10 = scmp.ne.s32.totalorder %s23432_s6, %s21715_s1  ;;  %p21719_p11 = scmp.lt.u32.totalorder %s21715_s1, %s23432_s6 }
  0xc4   :  { %p21721_p12 = pnand %p21719_p11, %p21716_p10 }
  0xc6   :  { %21724 = shalt.err (!%p21721_p12)
}
  0xc7   :  { %s21725_s5 = scalar_lea.vmem %s108_s3, 16  ;;  %s21729_s20 = scalar_lea.vmem %s108_s3, 32 }
  0xc8   :  { %p21726_p13 = scmp.ne.s32.totalorder %s108_s3, %s21725_s5  ;;  %p21730_p0 = scmp.lt.s32.totalorder %s108_s3, %s108_s3 }
  0xc9   :  { %p21731_p1 = scmp.lt.s32.totalorder %s21729_s20, %s21725_s5 }
  0xcb   :  { %p21732_p2 = por %p21731_p1, %p21730_p0 }
  0xcd   :  { %p21733_p3 = pnand %p21732_p2, %p21726_p13 }
  0xcf   :  { %21736 = shalt.err (!%p21733_p3)
}
  0xd0   :  { %110 = dma.hbm_to_vmem [thread:$0]  %s23432_s6, 16, %s108_s3, [#allocation13]  }
  0xd1   :  { %s21920_s0 = smov [#allocation17]   ;;  %s21921_s14 = smov [#allocation20]  }
  0xd2   :  { %s128_s24 = sshll.u32 %s21920_s0, 4  ;;  %s152_s25 = sshll.u32 %s21921_s14, 4  ;;  %s129_s24 = int_to_ptr.vmem [resolvable:$true] %s128_s24  ;;  %s153_s25 = int_to_ptr.vmem [resolvable:$true] %s152_s25 }
  0xd3   :  { %s21737_s17 = scalar_lea.hbm %s23434_s8, 2560 }
  0xd4   :  { %p21738_p4 = scmp.ne.s32.totalorder %s23434_s8, %s21737_s17  ;;  %p21741_p5 = scmp.lt.u32.totalorder %s21737_s17, %s23434_s8 }
  0xd6   :  { %p21743_p6 = pnand %p21741_p5, %p21738_p4 }
  0xd8   :  { %21746 = shalt.err (!%p21743_p6)
}
  0xd9   :  { %s21747_s6 = scalar_lea.vmem %s129_s24, 2560  ;;  %p21752_p8 = scmp.lt.s32.totalorder %s129_s24, %s129_s24 }
  0xda   :  { %p21748_p7 = scmp.ne.s32.totalorder %s129_s24, %s21747_s6  ;;  %p21753_p9 = scmp.lt.s32.totalorder %s21747_s6, %s21747_s6 }
  0xdc   :  { %p21754_p10 = por %p21753_p9, %p21752_p8 }
  0xde   :  { %p21755_p11 = pnand %p21754_p10, %p21748_p7 }
  0xe0   :  { %21758 = shalt.err (!%p21755_p11)
}
  0xe1   :  { %134 = dma.hbm_to_vmem [thread:$0]  %s23434_s8, 2560, %s129_s24, [#allocation16], %s21905_s22, %s21905_s22, %s21906_s23  }
  0xe2   :  { %s21759_s27 = scalar_lea.hbm %s23436_s10, 5120 }
  0xe3   :  { %p21760_p12 = scmp.ne.s32.totalorder %s23436_s10, %s21759_s27  ;;  %p21763_p13 = scmp.lt.u32.totalorder %s21759_s27, %s23436_s10 }
  0xe5   :  { %p21765_p0 = pnand %p21763_p13, %p21760_p12 }
  0xe7   :  { %21768 = shalt.err (!%p21765_p0)
}
  0xe8   :  { %s21769_s4 = scalar_lea.vmem %s153_s25, 5120  ;;  %p21774_p2 = scmp.lt.s32.totalorder %s153_s25, %s153_s25 }
  0xe9   :  { %p21770_p1 = scmp.ne.s32.totalorder %s153_s25, %s21769_s4  ;;  %p21775_p3 = scmp.lt.s32.totalorder %s21769_s4, %s21769_s4 }
  0xeb   :  { %p21776_p4 = por %p21775_p3, %p21774_p2 }
  0xed   :  { %p21777_p5 = pnand %p21776_p4, %p21770_p1 }
  0xef   :  { %21780 = shalt.err (!%p21777_p5)
}
  0xf0   :  { %158 = dma.hbm_to_vmem [thread:$0]  %s23436_s10, 5120, %s153_s25, [#allocation19], %s21905_s22, %s21905_s22, %s21906_s23  }
  0xf1   :  { %s21781_s14 = scalar_lea.hbm %s23438_s12, 16 }
  0xf2   :  { %p21782_p6 = scmp.ne.s32.totalorder %s23438_s12, %s21781_s14  ;;  %p21785_p7 = scmp.lt.u32.totalorder %s21781_s14, %s23438_s12 }
  0xf4   :  { %p21787_p8 = pnand %p21785_p7, %p21782_p6 }
  0xf6   :  { %21790 = shalt.err (!%p21787_p8)
}
  0xf7   :  { %s21922_s9 = smov [#allocation23]   ;;  %s21923_s10 = smov [#allocation24]  }
  0xf8   :  { %178 = dma.hbm_to_smem %s23438_s12, 16, %s21922_s9, [#allocation5]  }
  0xf9   :  { %s184_s25 = sshll.u32 %s21923_s10, 4  ;;  %s21924_s6 = smov [#allocation27]   ;;  %s185_s25 = int_to_ptr.vmem [resolvable:$true] %s184_s25 }
  0xfa   :  { %s206_s3 = sshll.u32 %s21924_s6, 4  ;;  %s21791_s19 = scalar_lea.hbm %s23439_s13, 512  ;;  %s22220_s3 = int_to_ptr.vmem [resolvable:$true] %s206_s3 }
  0xfb   :  { %p21792_p9 = scmp.ne.s32.totalorder %s23439_s13, %s21791_s19  ;;  %p21795_p10 = scmp.lt.u32.totalorder %s21791_s19, %s23439_s13 }
  0xfd   :  { %p21797_p11 = pnand %p21795_p10, %p21792_p9 }
  0xff   :  { %21800 = shalt.err (!%p21797_p11)
}
 0x100   :  { %s21801_s12 = scalar_lea.vmem %s185_s25, 512  ;;  %p21806_p13 = scmp.lt.s32.totalorder %s185_s25, %s185_s25 }
 0x101   :  { %p21802_p12 = scmp.ne.s32.totalorder %s185_s25, %s21801_s12  ;;  %p21807_p0 = scmp.lt.s32.totalorder %s21801_s12, %s21801_s12 }
 0x103   :  { %p21808_p1 = por %p21807_p0, %p21806_p13 }
 0x105   :  { %p21809_p2 = pnand %p21808_p1, %p21802_p12 }
 0x107   :  { %21812 = shalt.err (!%p21809_p2)
}
 0x108   :  { %190 = dma.hbm_to_vmem [thread:$0]  %s23439_s13, 512, %s185_s25, [#allocation22], %s21905_s22, %s21905_s22, %s21906_s23  }
 0x109   :  { %s21813_s0 = scalar_lea.hbm %s23441_s15, 1024 }
 0x10a   :  { %p21814_p3 = scmp.ne.s32.totalorder %s23441_s15, %s21813_s0  ;;  %p21817_p4 = scmp.lt.u32.totalorder %s21813_s0, %s23441_s15 }
 0x10c   :  { %p21819_p5 = pnand %p21817_p4, %p21814_p3 }
 0x10e   :  { %21822 = shalt.err (!%p21819_p5)
}
 0x10f   :  { %s21823_s17 = scalar_lea.vmem %s22220_s3, 1024  ;;  %p21828_p7 = scmp.lt.s32.totalorder %s22220_s3, %s22220_s3 }
 0x110   :  { %p21824_p6 = scmp.ne.s32.totalorder %s22220_s3, %s21823_s17  ;;  %p21829_p8 = scmp.lt.s32.totalorder %s21823_s17, %s21823_s17 }
 0x112   :  { %p21830_p9 = por %p21829_p8, %p21828_p7 }
 0x114   :  { %p21831_p10 = pnand %p21830_p9, %p21824_p6 }
 0x116   :  { %21834 = shalt.err (!%p21831_p10)
}
 0x117   :  { %212 = dma.hbm_to_vmem [thread:$0]  %s23441_s15, 1024, %s22220_s3, [#allocation26], %s21905_s22, %s21905_s22, %s21906_s23  }
 0x118   :  { %s21925_s9 = smov [#allocation28]   ;;  %s21835_s25 = scalar_lea.hbm %s23442_s16, 16 }
 0x119   :  { %s219_s18 = sshll.u32 %s21925_s9, 4  ;;  %p21836_p11 = scmp.ne.s32.totalorder %s23442_s16, %s21835_s25  ;;  %s220_s18 = int_to_ptr.vmem [resolvable:$true] %s219_s18 }
 0x11a   :  { %p21839_p12 = scmp.lt.u32.totalorder %s21835_s25, %s23442_s16 }
 0x11c   :  { %p21841_p13 = pnand %p21839_p12, %p21836_p11 }
 0x11e   :  { %21844 = shalt.err (!%p21841_p13)
}
 0x11f   :  { %s21845_s27 = scalar_lea.vmem %s220_s18, 16  ;;  %s21849_s15 = scalar_lea.vmem %s220_s18, 32 }
 0x120   :  { %p21846_p0 = scmp.ne.s32.totalorder %s220_s18, %s21845_s27  ;;  %p21850_p1 = scmp.lt.s32.totalorder %s220_s18, %s220_s18 }
 0x121   :  { %p21851_p2 = scmp.lt.s32.totalorder %s21849_s15, %s21845_s27 }
 0x123   :  { %p21852_p3 = por %p21851_p2, %p21850_p1 }
 0x125   :  { %p21853_p4 = pnand %p21852_p3, %p21846_p0 }
 0x127   :  { %21856 = shalt.err (!%p21853_p4)
}
 0x128   :  { %222 = dma.hbm_to_vmem [thread:$0]  %s23442_s16, 16, %s220_s18, [#allocation29]  }
 0x129   :  { %21879 = dma.done.wait [#allocation3], 256  }
 0x12a   :  { %21880 = vsyncadd [#allocation3], 4294967040 }
 0x12b   :  { %21881 = dma.done.wait [#allocation7], 1024  }
 0x12c   :  { %21882 = vsyncadd [#allocation7], 4294966272 }
 0x12d   :  { %21883 = dma.done.wait [#allocation10], 288  }
 0x12e   :  { %21884 = vsyncadd [#allocation10], 4294967008 }
 0x12f   :  { %21885 = dma.done.wait [#allocation13], 80  }
 0x130   :  { %21886 = vsyncadd [#allocation13], 4294967216 }
 0x131   :  { %21887 = dma.done.wait [#allocation16], 2880  }
 0x132   :  { %21888 = vsyncadd [#allocation16], 4294964416 }
 0x133   :  { %21889 = dma.done.wait [#allocation19], 5200  }
 0x134   :  { %21890 = vsyncadd [#allocation19], 4294962096 }
 0x135   :  { %21891 = dma.done.wait [#allocation22], 80  }
 0x136   :  { %21892 = vsyncadd [#allocation22], 4294967216 }
 0x137   :  { %21893 = dma.done.wait [#allocation5], 16  }
 0x138   :  { %21894 = vsyncadd [#allocation5], 4294967280 }
 0x139   :  { %21895 = dma.done.wait [#allocation22], 512  }
 0x13a   :  { %21896 = vsyncadd [#allocation22], 4294966784 }
 0x13b   :  { %21897 = dma.done.wait [#allocation26], 1040  }
 0x13c   :  { %21898 = vsyncadd [#allocation26], 4294966256 }
 0x13d   :  { %21899 = dma.done.wait [#allocation29], 16  }
 0x13e   :  { %21900 = vsyncadd [#allocation29], 4294967280 }
 0x13f   :  { %274 = sfence }
 0x140   :  { %v277_v0 = vld [vmem:[#allocation12] sm:$0xf]  ;;  %vm292_vm0 = vcmask 1043456   ;;  %vm285_vm1 = vcmask 31744   ;;  %v785_v2 = vld [vmem:[#allocation6] sm:$0xff]  ;;  %v786_v5 = vld [vmem:[#allocation6 + $0x8] sm:$0xff] }
 0x141   :  { %v275_v1 = vld [vmem:[#allocation2] sm:$0xff]  ;;  %v294_v3 = vsel %vm292_vm0, %v277_v0, 0  ;;  %v788_v7 = vld [vmem:[#allocation6 + $0x18] sm:$0xff]  ;;  %v797_v8 = vsel %vm285_vm1, %v785_v2, 0  ;;  %v800_v11 = vsel %vm285_vm1, %v786_v5, 0  ;;  %v789_v56 = vld [vmem:[#allocation8] sm:$0xff] }
 0x142   :  { %v287_v4 = vsel %vm285_vm1, %v275_v1, 0  ;;  %v787_v6 = vld [vmem:[#allocation6 + $0x10] sm:$0xff]  ;;  %v22272_v9 = vand.u32 4294901760, %v294_v3  ;;  %v276_v13 = vld [vmem:[#allocation2 + $0x8] sm:$0xff]  ;;  %v806_v14 = vsel %vm285_vm1, %v788_v7, 0  ;;  %v22279_v15 = vand.u32 4294901760, %v797_v8 }
 0x143   :  { %v22274_v10 = vand.u32 4294901760, %v287_v4  ;;  %v803_v12 = vsel %vm285_vm1, %v787_v6, 0  ;;  %v22281_v16 = vand.u32 4294901760, %v800_v11  ;;  %v795_v18 = vld [vmem:[#allocation15] sm:$0xf]  ;;  %v22289_v20 = vand.u32 4294901760, %v806_v14 }
 0x144   :  { %v22283_v17 = vand.u32 4294901760, %v803_v12  ;;  %17807 = vmatprep.subr.mxu0 %v22272_v9  ;;  %v290_v21 = vsel %vm285_vm1, %v276_v13, 0  ;;  %v384_v22 = vsub.f32 %v294_v3, %v22272_v9  ;;  %v22295_v23 = vsub.f32 %v797_v8, %v22279_v15  ;;  %v790_v63 = vld [vmem:[#allocation8 + $0x8] sm:$0xff]  ;;  %v791_v0 = vld [vmem:[#allocation8 + $0x10] sm:$0xff]  ;;  %v792_v3 = vld [vmem:[#allocation8 + $0x18] sm:$0xff]  ;;  %s2526_s16 = sld [smem:[#allocation23]] }
 0x145   :  { %v22287_v19 = vsub.f32 %v287_v4, %v22274_v10  ;;  %17808 = vmatpush3.msra.mxu0 %v22272_v9  ;;  %v22298_v24 = vsub.f32 %v800_v11, %v22281_v16  ;;  %v22303_v26 = vand.u32 4294901760, %v290_v21  ;;  %v22307_v28 = vsub.f32 %v806_v14, %v22289_v20  ;;  %s16683_s21 = sld [smem:[#allocation23 + $0x1]]  ;;  %s16686_s5 = sld [smem:[#allocation23 + $0x2]] }
 0x146   :  { %v22301_v25 = vsub.f32 %v803_v12, %v22283_v17  ;;  %v22309_v29 = vand.u32 4294901760, %v384_v22  ;;  %v809_v30 = vsel %vm292_vm0, %v795_v18, 0  ;;  %v22316_v33 = vand.u32 4294901760, %v22295_v23  ;;  %s16689_s20 = sld [smem:[#allocation23 + $0x3]]  ;;  %s16692_s8 = sld [smem:[#allocation23 + $0x4]] }
 0x147   :  { %v364_v27 = vand.u32 4294901760, %v22287_v19  ;;  %v373_v31 = vsub.f32 %v290_v21, %v22303_v26  ;;  %v22313_v32 = vand.u32 4294901760, %v809_v30  ;;  %v22319_v34 = vand.u32 4294901760, %v22298_v24  ;;  %s21929_s0 = smov [#allocation30]  }
 0x148   :  { %v386_v36 = vsub.f32 %v384_v22, %v22309_v29  ;;  %v22324_v37 = vand.u32 4294901760, %v22301_v25  ;;  %v22327_v38 = vand.u32 4294901760, %v22307_v28  ;;  %v880_v40 = vsub.f32 %v22295_v23, %v22316_v33  ;;  %s16662_s24 = sshll.u32 %s21929_s0, 4  ;;  %s16663_s24 = int_to_ptr.vmem [resolvable:$true] %s16662_s24 }
 0x149   :  { %v365_v35 = vsub.f32 %v22287_v19, %v364_v27  ;;  %v374_v39 = vand.u32 4294901760, %v373_v31  ;;  %17837 = vmatprep.subr.mxu1 %v22313_v32  ;;  %v890_v41 = vsub.f32 %v22298_v24, %v22319_v34  ;;  %v919_v42 = vsub.f32 %v809_v30, %v22313_v32  ;;  %s21857_s14 = scalar_lea.vmem %s16663_s24, 32  ;;  %p21862_p6 = scmp.lt.s32.totalorder %s16663_s24, %s16663_s24 }
 0x14a   :  { %v387_v44 = vand.u32 4294901760, %v386_v36  ;;  %17838 = vmatpush3.msra.mxu1 %v22313_v32  ;;  %v900_v45 = vsub.f32 %v22301_v25, %v22324_v37  ;;  %v910_v46 = vsub.f32 %v22307_v28, %v22327_v38  ;;  %v22340_v48 = vand.u32 4294901760, %v880_v40  ;;  %s2527_s3 = sadd.f32 1.0, %s2526_s16  ;;  %p21858_p5 = scmp.ne.s32.totalorder %s16663_s24, %s21857_s14 }
 0x14b   :  { %v366_v43 = vand.u32 4294901760, %v365_v35  ;;  %v375_v47 = vsub.f32 %v373_v31, %v374_v39  ;;  %v22342_v49 = vand.u32 4294901760, %v890_v41  ;;  %v920_v50 = vand.u32 4294901760, %v919_v42  ;;  %s5387_s7 = sadd.f32 1.0, %s16683_s21  ;;  %p21863_p7 = scmp.lt.s32.totalorder %s21857_s14, %s21857_s14 }
 0x14c   :  { %23500 = vst [vmem:[#allocation43_spill] sm:$0xff] %v22340_v48  ;;  %17812 = vmatprep.subr.mxu0 %v387_v44  ;;  %v22344_v51 = vand.u32 4294901760, %v900_v45  ;;  %17839 = vmatprep.mubr.f32.mxu1 %v22340_v48  ;;  %v22348_v54 = vand.u32 4294901760, %v910_v46  ;;  %vm1386_vm2 = vcmask 130048   ;;  %vm1991_vm3 = vcmask 261120   ;;  %s8250_s12 = sadd.f32 1.0, %s16686_s5 }
 0x14d   :  { %17809 = vmatprep.mubr.f32.mxu0 %v366_v43  ;;  %v376_v52 = vand.u32 4294901760, %v375_v47  ;;  %v921_v53 = vsub.f32 %v919_v42, %v920_v50  ;;  %17840 = vmatmul.mubr.f32.vlgmr.msra.gmra.mrb[0].mxu1 %v22342_v49  ;;  %v1388_v57 = vsel %vm1386_vm2, %v789_v56, 0  ;;  %v1391_v1 = vsel %vm1386_vm2, %v790_v63, 0  ;;  %s11113_s4 = sadd.f32 1.0, %s16689_s20  ;;  %p21864_p8 = por %p21863_p7, %p21862_p6 }
 0x14e   :  { %17842 = vmatprep.mubr.f32.mxu1 %v22344_v51  ;;  %v22390_v58 = vand.u32 4294901760, %v1388_v57  ;;  %v1394_v2 = vsel %vm1386_vm2, %v791_v0, 0  ;;  %v22405_v4 = vand.u32 4294901760, %v1391_v1  ;;  %v1397_v6 = vsel %vm1386_vm2, %v792_v3, 0  ;;  %s13976_s26 = sadd.f32 1.0, %s16692_s8 }
 0x14f   :  { %17810 = vmatmul.mubr.f32.vlgmr.msra.gmra.mrb[0].mxu0 %v376_v52  ;;  %v922_v55 = vand.u32 4294901760, %v921_v53  ;;  %v22407_v5 = vand.u32 4294901760, %v1394_v2  ;;  %v22413_v8 = vand.u32 4294901760, %v1397_v6  ;;  %vm3095_vm4 = vcmask 523264   ;;  %p21865_p9 = pnand %p21864_p8, %p21858_p5 }
 0x150   :  { %17813 = vmatpush3.msra.mxu0 %v387_v44  ;;  %17814 = vmatprep.mubr.f32.mxu0 %v22274_v10  ;;  %v22393_v59 = vsub.f32 %v1388_v57, %v22390_v58  ;;  %v22411_v7 = vsub.f32 %v1391_v1, %v22405_v4  ;;  %vm21927_vm5 = vmmov 0   ;;  %vm16654_vm6 = vcmask 17408  }
 0x151   :  { %17817 = vmatprep.subr.mxu0 %v384_v22  ;;  %17845 = vmatprep.subr.mxu1 %v922_v55  ;;  %23503 = vst [vmem:[#allocation46_spill] sm:$0xff] %v22407_v5  ;;  %23505 = vst [vmem:[#allocation48_spill] sm:$0xff] %v22413_v8  ;;  %v22422_v13 = vsub.f32 %v1397_v6, %v22413_v8 }
 0x152   :  { %17843 = vmatmul.mubr.f32.gmra.mrb[2].mxu1 %v22348_v54  ;;  %23501 = vst [vmem:[#allocation44_spill] sm:$0xff] %v22393_v59  ;;  %v22396_v60 = vand.u32 4294901760, %v22393_v59  ;;  %23504 = vst [vmem:[#allocation47_spill] sm:$0xff] %v22411_v7  ;;  %v22419_v12 = vand.u32 4294901760, %v22411_v7 }
 0x153   :  { %17846 = vmatpush3.msra.mxu1 %v922_v55  ;;  %17847 = vmatprep.mubr.f32.mxu1 %v22279_v15  ;;  %23508 = vst [vmem:[#allocation51_spill] sm:$0xff] %v22422_v13  ;;  %v793_v55 = vld [vmem:[#allocation9] sm:$0xff] }
 0x154   :  { %17853 = vmatprep.subr.mxu1 %v919_v42  ;;  %23502 = vst [vmem:[#allocation45_spill] sm:$0xff] %v22396_v60  ;;  %v1469_v61 = vsub.f32 %v22393_v59, %v22396_v60  ;;  %23507 = vst [vmem:[#allocation50_spill] sm:$0xff] %v22419_v12  ;;  %v1993_v56 = vsel %vm1991_vm3, %v793_v55, 0 }
 0x155   :  { %v22474_v57 = vand.u32 4294901760, %v1993_v56 }
 0x156   :  { %17848 = vmatmul.mubr.f32.vlgmr.msra.gmra.mrb[0].mxu1 %v22281_v16  ;;  %v22400_v62 = vand.u32 4294901760, %v1469_v61 }
 0x157   :  { %17815 = vmatmul.mubr.f32.vlgmr.msra.gmra.mrb[0].mxu0 %v22303_v26  ;;  %17850 = vmatprep.mubr.f32.mxu1 %v22283_v17  ;;  %23511 = vst [vmem:[#allocation54_spill] sm:$0xff] %v22474_v57  ;;  %v22478_v61 = vsub.f32 %v1993_v56, %v22474_v57 }
 0x158   :  { %17818 = vmatpush3.msra.mxu0 %v384_v22  ;;  %17819 = vmatprep.mubr.f32.mxu0 %v22287_v19 }
 0x159   :  { %17822 = vmatprep.subr.mxu0 %v22272_v9  ;;  %17854 = vmatpush3.msra.mxu1 %v919_v42  ;;  %23512 = vst [vmem:[#allocation55_spill] sm:$0xff] %v22478_v61  ;;  %v22481_v63 = vand.u32 4294901760, %v22478_v61 }
 0x15a   :  { %17851 = vmatmul.mubr.f32.gmra.mrb[2].mxu1 %v22289_v20  ;;  %17861 = vmatprep.subr.mxu1 %v22313_v32 }
 0x15b   :  { %17855 = vmatprep.mubr.f32.mxu1 %v22295_v23  ;;  %23513 = vst [vmem:[#allocation56_spill] sm:$0xff] %v22481_v63  ;;  %v2070_v0 = vsub.f32 %v22478_v61, %v22481_v63 }
 0x15d   :  { %v22485_v1 = vand.u32 4294901760, %v2070_v0 }
 0x15e   :  { %17856 = vmatmul.mubr.f32.vlgmr.msra.gmra.mrb[0].mxu1 %v22298_v24 }
 0x15f   :  { %17820 = vmatmul.mubr.f32.vlgmr.msra.gmra.mrb[0].mxu0 %v373_v31  ;;  %17858 = vmatprep.mubr.f32.mxu1 %v22301_v25 }
 0x160   :  { %17823 = vmatpush3.msra.mxu0 %v22272_v9  ;;  %17824 = vmatprep.mubr.f32.mxu0 %v364_v27  ;;  %v1479_v27 = vsub.f32 %v22411_v7, %v22419_v12 }
 0x161   :  { %17827 = vmatprep.subr.mxu0 %v22309_v29  ;;  %17862 = vmatpush3.msra.mxu1 %v22313_v32 }
 0x162   :  { %17859 = vmatmul.mubr.f32.gmra.mrb[2].mxu1 %v22307_v28  ;;  %17869 = vmatprep.subr.mxu1 %v920_v50 }
 0x163   :  { %17863 = vmatprep.mubr.f32.mxu1 %v22316_v33 }
 0x166   :  { %17864 = vmatmul.mubr.f32.vlgmr.msra.gmra.mrb[0].mxu1 %v22319_v34 }
 0x167   :  { %17825 = vmatmul.mubr.f32.vlgmr.msra.gmra.mrb[0].mxu0 %v374_v39  ;;  %17866 = vmatprep.mubr.f32.mxu1 %v22324_v37  ;;  %v22442_v39 = vand.u32 4294901760, %v1479_v27 }
 0x168   :  { %17828 = vmatpush3.msra.mxu0 %v22309_v29  ;;  %17829 = vmatprep.mubr.f32.mxu0 %v22274_v10  ;;  %v22436_v29 = vand.u32 4294901760, %v22422_v13 }
 0x169   :  { %17832 = vmatprep.subr.mxu0 %v22272_v9  ;;  %17870 = vmatpush3.msra.mxu1 %v920_v50 }
 0x16a   :  { %17867 = vmatmul.mubr.f32.gmra.mrb[2].mxu1 %v22327_v38  ;;  %17877 = vmatprep.subr.mxu1 %v22313_v32  ;;  %23510 = vst [vmem:[#allocation53_spill] sm:$0xff] %v22436_v29  ;;  %v1499_v40 = vsub.f32 %v22422_v13, %v22436_v29 }
 0x16b   :  { %17871 = vmatprep.mubr.f32.mxu1 %v22279_v15 }
 0x16c   :  { %v22449_v46 = vand.u32 4294901760, %v1499_v40 }
 0x16e   :  { %17872 = vmatmul.mubr.f32.vlgmr.msra.gmra.mrb[0].mxu1 %v22281_v16 }
 0x16f   :  { %17830 = vmatmul.mubr.f32.vlgmr.msra.gmra.mrb[0].mxu0 %v22303_v26  ;;  %17874 = vmatprep.mubr.f32.mxu1 %v22283_v17 }
 0x170   :  { %17833 = vmatpush3.msra.mxu0 %v22272_v9  ;;  %17834 = vmatprep.mubr.f32.mxu0 %v22274_v10  ;;  %v22416_v9 = vsub.f32 %v1394_v2, %v22407_v5  ;;  %v16680_v10 = vld [vmem:[#allocation14] ss:$0 sm:$0xff]  ;;  %v794_v2 = vld [vmem:[#allocation9 + $0x8] sm:$0xff] }
 0x171   :  { %17878 = vmatpush3.msra.mxu1 %v22313_v32  ;;  %v1996_v3 = vsel %vm1991_vm3, %v794_v2, 0 }
 0x172   :  { %17875 = vmatmul.mubr.f32.gmra.mrb[2].mxu1 %v22289_v20  ;;  %23506 = vst [vmem:[#allocation49_spill] sm:$0xff] %v22416_v9  ;;  %v22427_v19 = vand.u32 4294901760, %v22416_v9 }
 0x173   :  { %17879 = vmatprep.mubr.f32.mxu1 %v22279_v15 }
 0x174   :  { %23509 = vst [vmem:[#allocation52_spill] sm:$0xff] %v22427_v19  ;;  %v1489_v31 = vsub.f32 %v22416_v9, %v22427_v19 }
 0x176   :  { %17880 = vmatmul.mubr.f32.vlgmr.msra.gmra.mrb[0].mxu1 %v22281_v16  ;;  %v22446_v42 = vand.u32 4294901760, %v1489_v31 }
 0x177   :  { %17835 = vmatmul.mubr.f32.vlgmr.msra.gmra.mrb[0].mxu0 %v22303_v26  ;;  %17882 = vmatprep.mubr.f32.mxu1 %v22283_v17 }
 0x178   :  { %17964 = vmatprep.mubr.f32.mxu0 %v22474_v57 }
 0x17a   :  { %17883 = vmatmul.mubr.f32.gmra.mrb[2].mxu1 %v22289_v20 }
 0x17b   :  { %17889 = vmatprep.mubr.f32.mxu1 %v22400_v62 }
 0x24a   :  { %v17836_v11 = vpop.f32.mrb[0].mxu0 }
 0x24b   :  { %v22424_v14 = vadd.f32 %v17836_v11, %v16680_v10  ;;  %v775_v18 = vpop.f32.mrb[1].mxu0 }
 0x24c   :  { %v22429_v21 = vadd.f32 %v16680_v10, %v775_v18 }
 0x24d   :  { %v1403_v22 = vand.u32 4294901760, %v22424_v14 }
 0x24e   :  { %v1400_v26 = vand.u32 4294901760, %v22429_v21 }
 0x24f   :  { %v1515_v30 = vsub.f32 %v22424_v14, %v1403_v22 }
 0x250   :  { %v19829_v32 = vpack.c.bf16 %v1403_v22, %v1400_v26  ;;  %v1508_v35 = vsub.f32 %v22429_v21, %v1400_v26  ;;  %v22489_v22 = vand.u32 4294901760, %v1996_v3 }
 0x251   :  { %v1516_v36 = vand.u32 4294901760, %v1515_v30 }
 0x252   :  { %19830 = vmatprep.subr.bf16.mxu1 %v19829_v32  ;;  %v1509_v41 = vand.u32 4294901760, %v1508_v35  ;;  %v19837_v52 = vpack.c.bf16 %v1515_v30, %v1508_v35  ;;  %23514 = vst [vmem:[#allocation57_spill] sm:$0xff] %v22489_v22  ;;  %v22492_v31 = vsub.f32 %v1996_v3, %v22489_v22 }
 0x253   :  { %19832 = vmatpush3.bf16.msra.mxu1 %v19829_v32  ;;  %v1517_v43 = vsub.f32 %v1515_v30, %v1516_v36 }
 0x254   :  { %v1510_v44 = vsub.f32 %v1508_v35, %v1509_v41  ;;  %v19845_v53 = vpack.c.bf16 %v1516_v36, %v1509_v41  ;;  %23515 = vst [vmem:[#allocation58_spill] sm:$0xff] %v22492_v31 }
 0x255   :  { %v1518_v45 = vand.u32 4294901760, %v1517_v43 }
 0x256   :  { %17890 = vmatmul.mubr.f32.vlgmr.msra.gmra.mrb[0].mxu1 %v22442_v39  ;;  %v1511_v47 = vand.u32 4294901760, %v1510_v44  ;;  %v22495_v44 = vand.u32 4294901760, %v22492_v31 }
 0x257   :  { %17892 = vmatprep.mubr.f32.mxu1 %v22446_v42 }
 0x258   :  { %v19833_v50 = vpack.c.bf16 %v1518_v45, %v1511_v47  ;;  %23516 = vst [vmem:[#allocation59_spill] sm:$0xff] %v22495_v44  ;;  %v2080_v55 = vsub.f32 %v22492_v31, %v22495_v44 }
 0x25a   :  { %17893 = vmatmul.mubr.f32.gmra.mrb[2].mxu1 %v22449_v46  ;;  %19834 = vmatprep.subr.bf16.mxu1 %v19833_v50 }
 0x25b   :  { %19836 = vmatpush3.bf16.msra.mxu1 %v19833_v50  ;;  %17899 = vmatprep.mubr.f32.mxu1 %v22390_v58 }
 0x25c   :  { %19838 = vmatprep.subr.bf16.mxu1 %v19837_v52 }
 0x25e   :  { %17900 = vmatmul.mubr.f32.vlgmr.msra.gmra.mrb[0].mxu1 %v22405_v4 }
 0x25f   :  { %19840 = vmatpush3.bf16.msra.mxu1 %v19837_v52  ;;  %17902 = vmatprep.mubr.f32.mxu1 %v22407_v5 }
 0x260   :  { %19842 = vmatprep.subr.bf16.mxu1 %v19829_v32 }
 0x262   :  { %17903 = vmatmul.mubr.f32.gmra.mrb[2].mxu1 %v22413_v8 }
 0x263   :  { %17909 = vmatprep.mubr.f32.mxu1 %v22393_v59 }
 0x266   :  { %17910 = vmatmul.mubr.f32.vlgmr.msra.gmra.mrb[0].mxu1 %v22411_v7 }
 0x267   :  { %19844 = vmatpush3.bf16.msra.mxu1 %v19829_v32  ;;  %17912 = vmatprep.mubr.f32.mxu1 %v22416_v9 }
 0x268   :  { %19846 = vmatprep.subr.bf16.mxu1 %v19845_v53 }
 0x26a   :  { %17913 = vmatmul.mubr.f32.gmra.mrb[2].mxu1 %v22422_v13 }
 0x26b   :  { %17919 = vmatprep.mubr.f32.mxu1 %v22396_v60 }
 0x26e   :  { %17920 = vmatmul.mubr.f32.vlgmr.msra.gmra.mrb[0].mxu1 %v22419_v12 }
 0x26f   :  { %19848 = vmatpush3.bf16.msra.mxu1 %v19845_v53  ;;  %17922 = vmatprep.mubr.f32.mxu1 %v22427_v19 }
 0x270   :  { %19850 = vmatprep.subr.bf16.mxu1 %v19829_v32 }
 0x272   :  { %17923 = vmatmul.mubr.f32.gmra.mrb[2].mxu1 %v22436_v29 }
 0x273   :  { %17929 = vmatprep.mubr.f32.mxu1 %v22390_v58 }
 0x276   :  { %17930 = vmatmul.mubr.f32.vlgmr.msra.gmra.mrb[0].mxu1 %v22405_v4 }
 0x277   :  { %19852 = vmatpush3.bf16.msra.mxu1 %v19829_v32  ;;  %17932 = vmatprep.mubr.f32.mxu1 %v22407_v5 }
 0x27a   :  { %17933 = vmatmul.mubr.f32.gmra.mrb[2].mxu1 %v22413_v8 }
 0x27b   :  { %17939 = vmatprep.mubr.f32.mxu1 %v22390_v58 }
 0x27e   :  { %17940 = vmatmul.mubr.f32.vlgmr.msra.gmra.mrb[0].mxu1 %v22405_v4 }
 0x27f   :  { %17942 = vmatprep.mubr.f32.mxu1 %v22407_v5 }
 0x282   :  { %17943 = vmatmul.mubr.f32.gmra.mrb[2].mxu1 %v22413_v8 }
 0x283   :  { %17953 = vmatprep.mubr.f32.mxu1 %v22485_v1 }
 0x351   :  { %v17941_v6 = vpop.f32.mrb[0].mxu1 }
 0x352   :  { %v1988_v10 = vmax.f32 %v17941_v6, 0.0  ;;  %v1965_v11 = vpop.f32.mrb[1].mxu1 }
 0x353   :  { %v1987_v18 = vmax.f32 %v1965_v11, 0.0 }
 0x354   :  { %v2002_v26 = vand.u32 4294901760, %v1988_v10 }
 0x355   :  { %v1999_v27 = vand.u32 4294901760, %v1987_v18  ;;  %v17944_v30 = vpop.f32.mrb[2].mxu1 }
 0x356   :  { %v2096_v32 = vsub.f32 %v1988_v10, %v2002_v26  ;;  %v1990_v35 = vmax.f32 %v17944_v30, 0.0  ;;  %v1977_v36 = vpop.f32.mrb[3].mxu1 }
 0x357   :  { %v19853_v40 = vpack.c.bf16 %v2002_v26, %v1999_v27  ;;  %v2089_v41 = vsub.f32 %v1987_v18, %v1999_v27  ;;  %v1989_v43 = vmax.f32 %v1977_v36, 0.0  ;;  %v22499_v36 = vand.u32 4294901760, %v2080_v55 }
 0x358   :  { %v2097_v45 = vand.u32 4294901760, %v2096_v32  ;;  %v2008_v47 = vand.u32 4294901760, %v1990_v35 }
 0x359   :  { %v2090_v50 = vand.u32 4294901760, %v2089_v41  ;;  %v2005_v52 = vand.u32 4294901760, %v1989_v43  ;;  %19854 = vmatprep.subr.bf16.mxu1 %v19853_v40  ;;  %v19869_v53 = vpack.c.bf16 %v2096_v32, %v2089_v41  ;;  %23517 = vst [vmem:[#allocation60_spill] sm:$0xff] %v22499_v36 }
 0x35a   :  { %v2110_v56 = vsub.f32 %v1990_v35, %v2008_v47  ;;  %19856 = vmatpush3.bf16.msra.mxu1 %v19853_v40  ;;  %v2098_v0 = vsub.f32 %v2096_v32, %v2097_v45 }
 0x35b   :  { %v19857_v2 = vpack.c.bf16 %v2008_v47, %v2005_v52  ;;  %v2103_v3 = vsub.f32 %v1989_v43, %v2005_v52  ;;  %v2091_v6 = vsub.f32 %v2089_v41, %v2090_v50  ;;  %v19885_v10 = vpack.c.bf16 %v2097_v45, %v2090_v50  ;;  %v2535_v47 = vld [vmem:[#allocation17 + $0x10] sm:$0xff]  ;;  %v2536_v50 = vld [vmem:[#allocation17 + $0x18] sm:$0xff] }
 0x35c   :  { %v2111_v11 = vand.u32 4294901760, %v2110_v56  ;;  %v2099_v18 = vand.u32 4294901760, %v2098_v0  ;;  %v2560_v55 = vand.u32 4294901760, %v2536_v50 }
 0x35d   :  { %v2104_v26 = vand.u32 4294901760, %v2103_v3  ;;  %19858 = vmatprep.subr.bf16.mxu1 %v19857_v2  ;;  %v2092_v27 = vand.u32 4294901760, %v2091_v6  ;;  %v19873_v30 = vpack.c.bf16 %v2110_v56, %v2103_v3 }
 0x35e   :  { %19860 = vmatpush3.bf16.msra.mxu1 %v19857_v2  ;;  %v2112_v29 = vsub.f32 %v2110_v56, %v2111_v11 }
 0x35f   :  { %v19861_v19 = vpack.c.bf16 %v2099_v18, %v2092_v27  ;;  %v2105_v12 = vsub.f32 %v2103_v3, %v2104_v26  ;;  %v19889_v60 = vpack.c.bf16 %v2111_v11, %v2104_v26 }
 0x360   :  { %v2113_v35 = vand.u32 4294901760, %v2112_v29 }
 0x361   :  { %19862 = vmatprep.subr.bf16.mxu0 %v19861_v19  ;;  %v2106_v32 = vand.u32 4294901760, %v2105_v12  ;;  %17954 = vmatmul.mubr.f32.vlgmr.msra.gmra.mrb[4].mxu1 %v22499_v36  ;;  %v2533_v12 = vld [vmem:[#allocation17] sm:$0xff] }
 0x362   :  { %19864 = vmatpush3.bf16.msra.mxu0 %v19861_v19  ;;  %v2534_v19 = vld [vmem:[#allocation17 + $0x8] sm:$0xff]  ;;  %v2551_v29 = vand.u32 4294901760, %v2533_v12 }
 0x363   :  { %v19865_v41 = vpack.c.bf16 %v2113_v35, %v2106_v32  ;;  %v2554_v43 = vand.u32 4294901760, %v2534_v19 }
 0x364   :  { %v2641_v52 = vsub.f32 %v2533_v12, %v2551_v29 }
 0x365   :  { %19866 = vmatprep.subr.bf16.mxu0 %v19865_v41  ;;  %v22511_v45 = vpack.c.bf16 %v2554_v43, %v2551_v29 }
 0x366   :  { %19868 = vmatpush3.bf16.msra.mxu0 %v19865_v41 }
 0x367   :  { %19870 = vmatprep.subr.bf16.mxu0 %v19869_v53 }
 0x369   :  { %17965 = vmatmul.mubr.f32.vlgmr.msra.gmra.mrb[2].mxu0 %v22489_v22 }
 0x36a   :  { %19872 = vmatpush3.bf16.msra.mxu0 %v19869_v53  ;;  %17975 = vmatprep.mubr.f32.mxu0 %v22478_v61  ;;  %v2557_v53 = vand.u32 4294901760, %v2535_v47 }
 0x36b   :  { %19874 = vmatprep.subr.bf16.mxu0 %v19873_v30 }
 0x36c   :  { %v22515_v0 = vpack.c.bf16 %v2560_v55, %v2557_v53  ;;  %v2655_v6 = vsub.f32 %v2535_v47, %v2557_v53 }
 0x36e   :  { %19876 = vmatpush3.bf16.msra.mxu0 %v19873_v30  ;;  %v2656_v26 = vand.u32 4294901760, %v2655_v6 }
 0x36f   :  { %19878 = vmatprep.subr.bf16.mxu0 %v19853_v40 }
 0x370   :  { %v2657_v35 = vsub.f32 %v2655_v6, %v2656_v26 }
 0x371   :  { %17976 = vmatmul.mubr.f32.vlgmr.msra.gmra.mrb[2].mxu0 %v22492_v31 }
 0x372   :  { %19880 = vmatpush3.bf16.msra.mxu0 %v19853_v40  ;;  %17986 = vmatprep.mubr.f32.mxu0 %v22481_v63  ;;  %v2658_v41 = vand.u32 4294901760, %v2657_v35 }
 0x373   :  { %19882 = vmatprep.subr.bf16.mxu0 %v19857_v2 }
 0x376   :  { %19884 = vmatpush3.bf16.msra.mxu0 %v19857_v2 }
 0x377   :  { %19886 = vmatprep.subr.bf16.mxu0 %v19885_v10 }
 0x379   :  { %17987 = vmatmul.mubr.f32.vlgmr.msra.gmra.mrb[2].mxu0 %v22495_v44 }
 0x37a   :  { %19888 = vmatpush3.bf16.msra.mxu0 %v19885_v10  ;;  %17997 = vmatprep.mubr.f32.mxu0 %v22474_v57  ;;  %v2662_v10 = vsub.f32 %v2536_v50, %v2560_v55  ;;  %v2528_v55 = vstv %s2527_s3 }
 0x37b   :  { %19890 = vmatprep.subr.bf16.mxu0 %v19889_v60  ;;  %v2530_v63 = vmul.f32 %v22424_v14, %v2528_v55  ;;  %v2529_v31 = vmul.f32 %v22429_v21, %v2528_v55  ;;  %v3085_v55 = vld [vmem:[#allocation20 + $0x28] sm:$0xff] }
 0x37c   :  { %v2663_v27 = vand.u32 4294901760, %v2662_v10 }
 0x37e   :  { %19892 = vmatpush3.bf16.msra.mxu0 %v19889_v60  ;;  %v2648_v60 = vsub.f32 %v2534_v19, %v2554_v43  ;;  %v2664_v32 = vsub.f32 %v2662_v10, %v2663_v27  ;;  %v19921_v43 = vpack.c.bf16 %v2662_v10, %v2655_v6  ;;  %v19937_v47 = vpack.c.bf16 %v2663_v27, %v2656_v26 }
 0x37f   :  { %19894 = vmatprep.subr.bf16.mxu0 %v19853_v40 }
 0x380   :  { %v2649_v56 = vand.u32 4294901760, %v2648_v60  ;;  %v2665_v12 = vand.u32 4294901760, %v2664_v32  ;;  %v19917_v29 = vpack.c.bf16 %v2648_v60, %v2641_v52 }
 0x381   :  { %17998 = vmatmul.mubr.f32.vlgmr.msra.gmra.mrb[2].mxu0 %v22489_v22 }
 0x382   :  { %19896 = vmatpush3.bf16.msra.mxu0 %v19853_v40  ;;  %18008 = vmatprep.mubr.f32.mxu0 %v22474_v57  ;;  %v2642_v40 = vand.u32 4294901760, %v2641_v52  ;;  %v2650_v3 = vsub.f32 %v2648_v60, %v2649_v56  ;;  %v19913_v19 = vpack.c.bf16 %v2665_v12, %v2658_v41 }
 0x383   :  { %19898 = vmatprep.subr.bf16.mxu0 %v19857_v2 }
 0x384   :  { %v2651_v18 = vand.u32 4294901760, %v2650_v3  ;;  %v19933_v44 = vpack.c.bf16 %v2649_v56, %v2642_v40 }
 0x386   :  { %19900 = vmatpush3.bf16.msra.mxu0 %v19857_v2  ;;  %v2643_v2 = vsub.f32 %v2641_v52, %v2642_v40 }
 0x387   :  { %19902 = vmatprep.subr.bf16.mxu0 %v22511_v45 }
 0x388   :  { %v2644_v11 = vand.u32 4294901760, %v2643_v2 }
 0x389   :  { %18009 = vmatmul.mubr.f32.vlgmr.msra.gmra.mrb[2].mxu0 %v22489_v22 }
 0x38a   :  { %19904 = vmatpush3.bf16.msra.mxu0 %v22511_v45  ;;  %v19909_v30 = vpack.c.bf16 %v2651_v18, %v2644_v11 }
 0x38b   :  { %19906 = vmatprep.subr.bf16.mxu0 %v22515_v0 }
 0x38e   :  { %19908 = vmatpush3.bf16.msra.mxu0 %v22515_v0 }
 0x38f   :  { %19910 = vmatprep.subr.bf16.mxu0 %v19909_v30 }
 0x434   :  { %v17955_v50 = vpop.f32.mrb[4].mxu1 }
 0x435   :  { %v2073_v53 = vpop.f32.mrb[5].mxu1 }
 0x45c   :  { %v18010_v2 = vpop.f32.mrb[2].mxu0 }
 0x45d   :  { %v21037_v3 = vadd.f32 %v18010_v2, %v17955_v50  ;;  %v2516_v11 = vpop.f32.mrb[3].mxu0 }
 0x45e   :  { %v21038_v18 = vadd.f32 %v2516_v11, %v2073_v53  ;;  %v3118_v11 = vand.u32 4294901760, %v3085_v55 }
 0x45f   :  { %v2532_v35 = vadd.f32 %v21037_v3, %v2530_v63  ;;  %v3080_v63 = vld [vmem:[#allocation20] sm:$0xff] }
 0x460   :  { %v2531_v32 = vadd.f32 %v21038_v18, %v2529_v31  ;;  %v3081_v31 = vld [vmem:[#allocation20 + $0x8] sm:$0xff]  ;;  %v3232_v22 = vsub.f32 %v3085_v55, %v3118_v11 }
 0x461   :  { %v2548_v52 = vsel %vm1991_vm3, %v2532_v35, 0 }
 0x462   :  { %v2629_v60 = vand.u32 4294901760, %v2548_v52  ;;  %v2545_v40 = vsel %vm1991_vm3, %v2531_v32, 0 }
 0x463   :  { %v2619_v56 = vand.u32 4294901760, %v2545_v40 }
 0x464   :  { %v2630_v6 = vsub.f32 %v2548_v52, %v2629_v60  ;;  %v3086_v52 = vld [vmem:[#allocation20 + $0x30] sm:$0xff] }
 0x465   :  { %v2620_v10 = vsub.f32 %v2545_v40, %v2619_v56  ;;  %v3121_v40 = vand.u32 4294901760, %v3086_v52 }
 0x466   :  { %v2631_v26 = vand.u32 4294901760, %v2630_v6 }
 0x467   :  { %v2621_v27 = vand.u32 4294901760, %v2620_v10 }
 0x468   :  { %v2632_v41 = vsub.f32 %v2630_v6, %v2631_v26 }
 0x469   :  { %v2622_v12 = vsub.f32 %v2620_v10, %v2621_v27 }
 0x46a   :  { %v2633_v2 = vand.u32 4294901760, %v2632_v41 }
 0x46b   :  { %v2623_v50 = vand.u32 4294901760, %v2622_v12 }
 0x46d   :  { %18019 = vmatprep.mubr.f32.mxu0 %v2623_v50 }
 0x46e   :  { %18020 = vmatmul.mubr.f32.vlgmr.msra.gmra.mrb[4].mxu0 %v2633_v2 }
 0x46f   :  { %19912 = vmatpush3.bf16.msra.mxu0 %v19909_v30  ;;  %18030 = vmatprep.mubr.f32.mxu0 %v2619_v56  ;;  %v3103_v30 = vand.u32 4294901760, %v3080_v63 }
 0x470   :  { %19914 = vmatprep.subr.bf16.mxu0 %v19913_v19 }
 0x471   :  { %v3197_v35 = vsub.f32 %v3080_v63, %v3103_v30 }
 0x473   :  { %19916 = vmatpush3.bf16.msra.mxu0 %v19913_v19 }
 0x474   :  { %19918 = vmatprep.subr.bf16.mxu0 %v19917_v29 }
 0x476   :  { %18031 = vmatmul.mubr.f32.vlgmr.msra.gmra.mrb[4].mxu0 %v2629_v60 }
 0x477   :  { %19920 = vmatpush3.bf16.msra.mxu0 %v19917_v29  ;;  %18041 = vmatprep.mubr.f32.mxu0 %v2620_v10  ;;  %v3082_v29 = vld [vmem:[#allocation20 + $0x10] sm:$0xff] }
 0x478   :  { %19922 = vmatprep.subr.bf16.mxu0 %v19921_v43 }
 0x47b   :  { %19924 = vmatpush3.bf16.msra.mxu0 %v19921_v43  ;;  %v3083_v43 = vld [vmem:[#allocation20 + $0x18] sm:$0xff] }
 0x47c   :  { %19926 = vmatprep.subr.bf16.mxu0 %v22511_v45 }
 0x47e   :  { %18042 = vmatmul.mubr.f32.vlgmr.msra.gmra.mrb[4].mxu0 %v2630_v6  ;;  %v3198_v6 = vand.u32 4294901760, %v3197_v35 }
 0x47f   :  { %19928 = vmatpush3.bf16.msra.mxu0 %v22511_v45  ;;  %18052 = vmatprep.mubr.f32.mxu0 %v2621_v27 }
 0x480   :  { %19930 = vmatprep.subr.bf16.mxu0 %v22515_v0  ;;  %v3199_v27 = vsub.f32 %v3197_v35, %v3198_v6 }
 0x482   :  { %v3200_v2 = vand.u32 4294901760, %v3199_v27  ;;  %v3239_v27 = vsub.f32 %v3086_v52, %v3121_v40 }
 0x483   :  { %19932 = vmatpush3.bf16.msra.mxu0 %v22515_v0 }
 0x484   :  { %19934 = vmatprep.subr.bf16.mxu0 %v19933_v44 }
 0x486   :  { %18053 = vmatmul.mubr.f32.vlgmr.msra.gmra.mrb[4].mxu0 %v2631_v26 }
 0x487   :  { %19936 = vmatpush3.bf16.msra.mxu0 %v19933_v44  ;;  %18063 = vmatprep.mubr.f32.mxu0 %v2619_v56  ;;  %v3106_v44 = vand.u32 4294901760, %v3081_v31 }
 0x488   :  { %19938 = vmatprep.subr.bf16.mxu0 %v19937_v47 }
 0x489   :  { %v22532_v19 = vpack.c.bf16 %v3106_v44, %v3103_v30  ;;  %v3204_v32 = vsub.f32 %v3081_v31, %v3106_v44 }
 0x48b   :  { %19940 = vmatpush3.bf16.msra.mxu0 %v19937_v47  ;;  %19950 = vmatprep.subr.bf16.mxu1 %v22532_v19  ;;  %v3109_v47 = vand.u32 4294901760, %v3082_v29  ;;  %v3205_v10 = vand.u32 4294901760, %v3204_v32  ;;  %v22557_v5 = vpack.c.bf16 %v3204_v32, %v3197_v35 }
 0x48c   :  { %19942 = vmatprep.subr.bf16.mxu0 %v22511_v45  ;;  %19952 = vmatpush3.bf16.msra.mxu1 %v22532_v19 }
 0x48d   :  { %v3206_v41 = vsub.f32 %v3204_v32, %v3205_v10  ;;  %v3211_v12 = vsub.f32 %v3082_v29, %v3109_v47  ;;  %v3233_v29 = vand.u32 4294901760, %v3232_v22 }
 0x48e   :  { %18064 = vmatmul.mubr.f32.vlgmr.msra.gmra.mrb[4].mxu0 %v2629_v60 }
 0x48f   :  { %19944 = vmatpush3.bf16.msra.mxu0 %v22511_v45  ;;  %18074 = vmatprep.mubr.f32.mxu0 %v2619_v56  ;;  %v3112_v45 = vand.u32 4294901760, %v3083_v43  ;;  %v3207_v63 = vand.u32 4294901760, %v3206_v41  ;;  %v3212_v31 = vand.u32 4294901760, %v3211_v12 }
 0x490   :  { %19946 = vmatprep.subr.bf16.mxu0 %v22515_v0 }
 0x491   :  { %v22536_v53 = vpack.c.bf16 %v3112_v45, %v3109_v47  ;;  %v3218_v50 = vsub.f32 %v3083_v43, %v3112_v45  ;;  %v22548_v44 = vpack.c.bf16 %v3207_v63, %v3200_v2  ;;  %v3234_v45 = vsub.f32 %v3232_v22, %v3233_v29 }
 0x492   :  { %v3240_v2 = vand.u32 4294901760, %v3239_v27 }
 0x493   :  { %19948 = vmatpush3.bf16.msra.mxu0 %v22515_v0  ;;  %v3084_v0 = vld [vmem:[#allocation20 + $0x20] sm:$0xff]  ;;  %19954 = vmatprep.subr.bf16.mxu1 %v22536_v53  ;;  %v3219_v30 = vand.u32 4294901760, %v3218_v50  ;;  %v3235_v59 = vand.u32 4294901760, %v3234_v45 }
 0x494   :  { %v3115_v3 = vand.u32 4294901760, %v3084_v0  ;;  %19956 = vmatpush3.bf16.msra.mxu1 %v22536_v53 }
 0x495   :  { %v3220_v57 = vsub.f32 %v3218_v50, %v3219_v30 }
 0x496   :  { %18075 = vmatmul.mubr.f32.vlgmr.msra.gmra.mrb[4].mxu0 %v2629_v60  ;;  %v22540_v18 = vpack.c.bf16 %v3118_v11, %v3115_v3  ;;  %v3087_v60 = vld [vmem:[#allocation20 + $0x38] sm:$0xff]  ;;  %v3225_v61 = vsub.f32 %v3084_v0, %v3115_v3  ;;  %v3241_v0 = vsub.f32 %v3239_v27, %v3240_v2 }
 0x497   :  { %18193 = vmatprep.mubr.f32.mxu0 %v22340_v48  ;;  %v3124_v56 = vand.u32 4294901760, %v3087_v60  ;;  %v3213_v48 = vsub.f32 %v3211_v12, %v3212_v31  ;;  %v3221_v43 = vand.u32 4294901760, %v3220_v57  ;;  %v22559_v57 = vpack.c.bf16 %v3218_v50, %v3211_v12 }
 0x498   :  { %19958 = vmatprep.subr.bf16.mxu1 %v22540_v18  ;;  %v3226_v13 = vand.u32 4294901760, %v3225_v61  ;;  %v3242_v3 = vand.u32 4294901760, %v3241_v0  ;;  %v22561_v52 = vpack.c.bf16 %v3232_v22, %v3225_v61 }
 0x499   :  { %19960 = vmatpush3.bf16.msra.mxu1 %v22540_v18  ;;  %v22544_v26 = vpack.c.bf16 %v3124_v56, %v3121_v40  ;;  %v3214_v36 = vand.u32 4294901760, %v3213_v48  ;;  %v3246_v41 = vsub.f32 %v3087_v60, %v3124_v56  ;;  %v22565_v60 = vpack.c.bf16 %v3205_v10, %v3198_v6  ;;  %v3687_v56 = vld [vmem:[#allocation15 + $0x4] sm:$0xf] }
 0x49a   :  { %v3227_v47 = vsub.f32 %v3225_v61, %v3226_v13  ;;  %v22567_v40 = vpack.c.bf16 %v3219_v30, %v3212_v31 }
 0x49b   :  { %19962 = vmatprep.subr.bf16.mxu1 %v22544_v26  ;;  %v22551_v9 = vpack.c.bf16 %v3221_v43, %v3214_v36  ;;  %v3247_v63 = vand.u32 4294901760, %v3246_v41  ;;  %v22563_v36 = vpack.c.bf16 %v3246_v41, %v3239_v27  ;;  %v3689_v43 = vsel %vm292_vm0, %v3687_v56, 0 }
 0x49c   :  { %v3228_v7 = vand.u32 4294901760, %v3227_v47  ;;  %v3692_v47 = vand.u32 4294901760, %v3689_v43 }
 0x49d   :  { %19964 = vmatpush3.bf16.msra.mxu1 %v22544_v26  ;;  %v3248_v55 = vsub.f32 %v3246_v41, %v3247_v63 }
 0x49e   :  { %19966 = vmatprep.subr.bf16.mxu1 %v22548_v44  ;;  %v22553_v8 = vpack.c.bf16 %v3235_v59, %v3228_v7  ;;  %v22569_v59 = vpack.c.bf16 %v3233_v29, %v3226_v13  ;;  %v22571_v7 = vpack.c.bf16 %v3247_v63, %v3240_v2  ;;  %18191 = vmatprep.subr.mxu0 %v3692_v47  ;;  %v16681_v13 = vld [vmem:[#allocation18] ss:$0 sm:$0xff] }
 0x49f   :  { %v3249_v11 = vand.u32 4294901760, %v3248_v55  ;;  %v3799_v35 = vsub.f32 %v3689_v43, %v3692_v47  ;;  %18192 = vmatpush3.msra.mxu0 %v3692_v47 }
 0x4a0   :  { %18194 = vmatmul.mubr.f32.vlgmr.msra.gmra.mrb[6].mxu0 %v22342_v49 }
 0x4a1   :  { %v22555_v48 = vpack.c.bf16 %v3249_v11, %v3242_v3  ;;  %v3800_v61 = vand.u32 4294901760, %v3799_v35  ;;  %18196 = vmatprep.mubr.f32.mxu0 %v22344_v51 }
 0x4a3   :  { %v3801_v22 = vsub.f32 %v3799_v35, %v3800_v61 }
 0x4a4   :  { %18197 = vmatmul.mubr.f32.gmra.mrb[8].mxu0 %v22348_v54 }
 0x4a5   :  { %v3802_v32 = vand.u32 4294901760, %v3801_v22  ;;  %18201 = vmatprep.mubr.f32.mxu0 %v22279_v15 }
 0x4a7   :  { %18199 = vmatprep.subr.mxu0 %v3802_v32 }
 0x4a8   :  { %18200 = vmatpush3.msra.mxu0 %v3802_v32  ;;  %v23518_v32 = vld [vmem:[#allocation46_spill] sm:$0xff] }
 0x4a9   :  { %18202 = vmatmul.mubr.f32.vlgmr.msra.gmra.mrb[6].mxu0 %v22281_v16  ;;  %18207 = vmatprep.subr.mxu0 %v3799_v35 }
 0x4aa   :  { %18204 = vmatprep.mubr.f32.mxu0 %v22283_v17  ;;  %18208 = vmatpush3.msra.mxu0 %v3799_v35 }
 0x4ab   :  { %18215 = vmatprep.subr.mxu0 %v3692_v47 }
 0x4ad   :  { %18205 = vmatmul.mubr.f32.gmra.mrb[8].mxu0 %v22289_v20 }
 0x4ae   :  { %18209 = vmatprep.mubr.f32.mxu0 %v22295_v23 }
 0x4b1   :  { %18210 = vmatmul.mubr.f32.vlgmr.msra.gmra.mrb[6].mxu0 %v22298_v24 }
 0x4b2   :  { %18212 = vmatprep.mubr.f32.mxu0 %v22301_v25  ;;  %18216 = vmatpush3.msra.mxu0 %v3692_v47 }
 0x4b3   :  { %18223 = vmatprep.subr.mxu0 %v3800_v61 }
 0x4b5   :  { %18213 = vmatmul.mubr.f32.gmra.mrb[8].mxu0 %v22307_v28 }
 0x4b6   :  { %18217 = vmatprep.mubr.f32.mxu0 %v22316_v33 }
 0x4b9   :  { %18218 = vmatmul.mubr.f32.vlgmr.msra.gmra.mrb[6].mxu0 %v22319_v34 }
 0x4ba   :  { %18220 = vmatprep.mubr.f32.mxu0 %v22324_v37  ;;  %18224 = vmatpush3.msra.mxu0 %v3800_v61 }
 0x4bb   :  { %18231 = vmatprep.subr.mxu0 %v3692_v47 }
 0x4bd   :  { %18221 = vmatmul.mubr.f32.gmra.mrb[8].mxu0 %v22327_v38 }
 0x4be   :  { %18225 = vmatprep.mubr.f32.mxu0 %v22279_v15 }
 0x4c1   :  { %18226 = vmatmul.mubr.f32.vlgmr.msra.gmra.mrb[6].mxu0 %v22281_v16 }
 0x4c2   :  { %18228 = vmatprep.mubr.f32.mxu0 %v22283_v17  ;;  %18232 = vmatpush3.msra.mxu0 %v3692_v47 }
 0x4c5   :  { %18229 = vmatmul.mubr.f32.gmra.mrb[8].mxu0 %v22289_v20 }
 0x4c6   :  { %18233 = vmatprep.mubr.f32.mxu0 %v22279_v15 }
 0x4c9   :  { %18234 = vmatmul.mubr.f32.vlgmr.msra.gmra.mrb[6].mxu0 %v22281_v16 }
 0x4ca   :  { %18236 = vmatprep.mubr.f32.mxu0 %v22283_v17 }
 0x4cd   :  { %18237 = vmatmul.mubr.f32.gmra.mrb[8].mxu0 %v22289_v20 }
 0x4ce   :  { %18243 = vmatprep.mubr.f32.mxu0 %v22400_v62 }
 0x569   :  { %v18076_v6 = vpop.f32.mrb[4].mxu0 }
 0x56a   :  { %v21039_v10 = vadd.f32 %v18076_v6, %v16681_v13  ;;  %v3068_v12 = vpop.f32.mrb[5].mxu0  ;;  %v23520_v6 = vld [vmem:[#allocation44_spill] sm:$0xff] }
 0x56b   :  { %v21040_v50 = vadd.f32 %v16681_v13, %v3068_v12  ;;  %v23519_v13 = vld [vmem:[#allocation48_spill] sm:$0xff] }
 0x56c   :  { %v3079_v31 = vmax.f32 %v21039_v10, 0.0  ;;  %v23521_v10 = vld [vmem:[#allocation47_spill] sm:$0xff] }
 0x56d   :  { %v3078_v30 = vmax.f32 %v21040_v50, 0.0  ;;  %v23522_v50 = vld [vmem:[#allocation49_spill] sm:$0xff] }
 0x56e   :  { %v3100_v29 = vsel %vm3095_vm4, %v3079_v31, 0  ;;  %v23523_v31 = vld [vmem:[#allocation51_spill] sm:$0xff] }
 0x56f   :  { %v22591_v45 = vand.u32 4294901760, %v3100_v29  ;;  %v3097_v27 = vsel %vm3095_vm4, %v3078_v30, 0  ;;  %v23524_v30 = vld [vmem:[#allocation45_spill] sm:$0xff] }
 0x570   :  { %v3175_v41 = vand.u32 4294901760, %v3097_v27 }
 0x571   :  { %v3186_v2 = vsub.f32 %v3100_v29, %v22591_v45  ;;  %v23525_v29 = vld [vmem:[#allocation50_spill] sm:$0xff] }
 0x572   :  { %v3176_v63 = vsub.f32 %v3097_v27, %v3175_v41  ;;  %v23527_v27 = vld [vmem:[#allocation53_spill] sm:$0xff] }
 0x573   :  { %v3187_v0 = vand.u32 4294901760, %v3186_v2 }
 0x574   :  { %v3177_v55 = vand.u32 4294901760, %v3176_v63 }
 0x575   :  { %v3188_v3 = vsub.f32 %v3186_v2, %v3187_v0 }
 0x576   :  { %v3178_v11 = vsub.f32 %v3176_v63, %v3177_v55 }
 0x577   :  { %v3189_v43 = vand.u32 4294901760, %v3188_v3 }
 0x578   :  { %v3179_v56 = vand.u32 4294901760, %v3178_v11 }
 0x57a   :  { %18093 = vmatprep.mubr.f32.mxu1 %v3179_v56 }
 0x57b   :  { %18094 = vmatmul.mubr.f32.vlgmr.msra.gmra.mrb[6].mxu1 %v3189_v43 }
 0x57c   :  { %19968 = vmatpush3.bf16.msra.mxu1 %v22548_v44  ;;  %18112 = vmatprep.mubr.f32.mxu1 %v3175_v41 }
 0x57d   :  { %19970 = vmatprep.subr.bf16.mxu1 %v22551_v9 }
 0x580   :  { %19972 = vmatpush3.bf16.msra.mxu1 %v22551_v9 }
 0x581   :  { %19974 = vmatprep.subr.bf16.mxu1 %v22553_v8 }
 0x584   :  { %19976 = vmatpush3.bf16.msra.mxu1 %v22553_v8 }
 0x585   :  { %19978 = vmatprep.subr.bf16.mxu1 %v22555_v48 }
 0x588   :  { %19980 = vmatpush3.bf16.msra.mxu1 %v22555_v48 }
 0x589   :  { %19982 = vmatprep.subr.bf16.mxu1 %v22557_v5 }
 0x58b   :  { %18113 = vmatmul.mubr.f32.vlgmr.msra.gmra.mrb[6].mxu1 %v22591_v45 }
 0x58c   :  { %19984 = vmatpush3.bf16.msra.mxu1 %v22557_v5  ;;  %18131 = vmatprep.mubr.f32.mxu1 %v3176_v63  ;;  %v16682_v5 = vld [vmem:[#allocation21] ss:$0 sm:$0xff] }
 0x58d   :  { %19986 = vmatprep.subr.bf16.mxu1 %v22559_v57 }
 0x590   :  { %19988 = vmatpush3.bf16.msra.mxu1 %v22559_v57 }
 0x591   :  { %19990 = vmatprep.subr.bf16.mxu1 %v22561_v52 }
 0x594   :  { %19992 = vmatpush3.bf16.msra.mxu1 %v22561_v52 }
 0x595   :  { %19994 = vmatprep.subr.bf16.mxu1 %v22563_v36 }
 0x598   :  { %19996 = vmatpush3.bf16.msra.mxu1 %v22563_v36 }
 0x599   :  { %19998 = vmatprep.subr.bf16.mxu1 %v22532_v19 }
 0x59b   :  { %18132 = vmatmul.mubr.f32.vlgmr.msra.gmra.mrb[6].mxu1 %v3186_v2 }
 0x59c   :  { %20000 = vmatpush3.bf16.msra.mxu1 %v22532_v19  ;;  %18150 = vmatprep.mubr.f32.mxu1 %v3177_v55 }
 0x59d   :  { %20002 = vmatprep.subr.bf16.mxu1 %v22536_v53 }
 0x5a0   :  { %20004 = vmatpush3.bf16.msra.mxu1 %v22536_v53 }
 0x5a1   :  { %20006 = vmatprep.subr.bf16.mxu1 %v22540_v18 }
 0x5a4   :  { %20008 = vmatpush3.bf16.msra.mxu1 %v22540_v18 }
 0x5a5   :  { %20010 = vmatprep.subr.bf16.mxu1 %v22544_v26 }
 0x5a8   :  { %20012 = vmatpush3.bf16.msra.mxu1 %v22544_v26 }
 0x5a9   :  { %20014 = vmatprep.subr.bf16.mxu1 %v22565_v60 }
 0x5ab   :  { %18151 = vmatmul.mubr.f32.vlgmr.msra.gmra.mrb[6].mxu1 %v3187_v0 }
 0x5ac   :  { %20016 = vmatpush3.bf16.msra.mxu1 %v22565_v60  ;;  %18169 = vmatprep.mubr.f32.mxu1 %v3175_v41 }
 0x5ad   :  { %20018 = vmatprep.subr.bf16.mxu1 %v22567_v40 }
 0x5b0   :  { %20020 = vmatpush3.bf16.msra.mxu1 %v22567_v40 }
 0x5b1   :  { %20022 = vmatprep.subr.bf16.mxu1 %v22569_v59 }
 0x5b4   :  { %20024 = vmatpush3.bf16.msra.mxu1 %v22569_v59 }
 0x5b5   :  { %20026 = vmatprep.subr.bf16.mxu1 %v22571_v7 }
 0x5b8   :  { %20028 = vmatpush3.bf16.msra.mxu1 %v22571_v7 }
 0x5b9   :  { %20030 = vmatprep.subr.bf16.mxu1 %v22532_v19 }
 0x5bb   :  { %18170 = vmatmul.mubr.f32.vlgmr.msra.gmra.mrb[6].mxu1 %v22591_v45 }
 0x5bc   :  { %20032 = vmatpush3.bf16.msra.mxu1 %v22532_v19  ;;  %18188 = vmatprep.mubr.f32.mxu1 %v3175_v41 }
 0x5bd   :  { %20034 = vmatprep.subr.bf16.mxu1 %v22536_v53 }
 0x5c0   :  { %20036 = vmatpush3.bf16.msra.mxu1 %v22536_v53 }
 0x5c1   :  { %20038 = vmatprep.subr.bf16.mxu1 %v22540_v18 }
 0x5c4   :  { %20040 = vmatpush3.bf16.msra.mxu1 %v22540_v18 }
 0x5c5   :  { %20042 = vmatprep.subr.bf16.mxu1 %v22544_v26 }
 0x5c8   :  { %20044 = vmatpush3.bf16.msra.mxu1 %v22544_v26 }
 0x5cb   :  { %18189 = vmatmul.mubr.f32.vlgmr.msra.gmra.mrb[6].mxu1 %v22591_v45  ;;  %v23526_v45 = vld [vmem:[#allocation52_spill] sm:$0xff] }
 0x5cc   :  { %18307 = vmatprep.mubr.f32.mxu1 %v22485_v1 }
 0x69e   :  { %v18190_v8 = vpop.f32.mrb[6].mxu1 }
 0x69f   :  { %v21041_v9 = vadd.f32 %v18190_v8, %v16682_v5  ;;  %v3672_v19 = vpop.f32.mrb[7].mxu1 }
 0x6a0   :  { %v21042_v44 = vadd.f32 %v16682_v5, %v3672_v19 }
 0x6a1   :  { %v3683_v48 = vmax.f32 %v21041_v9, 0.0 }
 0x6a2   :  { %v3682_v57 = vmax.f32 %v21042_v44, 0.0 }
 0x6a3   :  { %v22647_v53 = vadd.f32 %v22424_v14, %v3683_v48 }
 0x6a4   :  { %v22650_v18 = vadd.f32 %v22429_v21, %v3682_v57 }
 0x6a5   :  { %v4270_v52 = vand.u32 4294901760, %v22647_v53 }
 0x6a6   :  { %v4267_v26 = vand.u32 4294901760, %v22650_v18 }
 0x6a7   :  { %v4382_v36 = vsub.f32 %v22647_v53, %v4270_v52 }
 0x6a8   :  { %v20045_v60 = vpack.c.bf16 %v4270_v52, %v4267_v26  ;;  %v4375_v40 = vsub.f32 %v22650_v18, %v4267_v26 }
 0x6a9   :  { %v4383_v59 = vand.u32 4294901760, %v4382_v36 }
 0x6aa   :  { %20046 = vmatprep.subr.bf16.mxu0 %v20045_v60  ;;  %v4376_v7 = vand.u32 4294901760, %v4375_v40  ;;  %v20053_v22 = vpack.c.bf16 %v4382_v36, %v4375_v40 }
 0x6ab   :  { %20048 = vmatpush3.bf16.msra.mxu0 %v20045_v60  ;;  %v4384_v47 = vsub.f32 %v4382_v36, %v4383_v59 }
 0x6ac   :  { %v4377_v35 = vsub.f32 %v4375_v40, %v4376_v7  ;;  %v20061_v12 = vpack.c.bf16 %v4383_v59, %v4376_v7 }
 0x6ad   :  { %v4385_v14 = vand.u32 4294901760, %v4384_v47 }
 0x6ae   :  { %18244 = vmatmul.mubr.f32.vlgmr.msra.gmra.mrb[6].mxu0 %v22442_v39  ;;  %v4378_v21 = vand.u32 4294901760, %v4377_v35 }
 0x6af   :  { %18246 = vmatprep.mubr.f32.mxu0 %v22446_v42 }
 0x6b0   :  { %v20049_v61 = vpack.c.bf16 %v4385_v14, %v4378_v21 }
 0x6b2   :  { %18247 = vmatmul.mubr.f32.gmra.mrb[8].mxu0 %v22449_v46  ;;  %20050 = vmatprep.subr.bf16.mxu0 %v20049_v61 }
 0x6b3   :  { %20052 = vmatpush3.bf16.msra.mxu0 %v20049_v61  ;;  %18253 = vmatprep.mubr.f32.mxu0 %v22390_v58 }
 0x6b4   :  { %20054 = vmatprep.subr.bf16.mxu0 %v20053_v22 }
 0x6b6   :  { %18254 = vmatmul.mubr.f32.vlgmr.msra.gmra.mrb[6].mxu0 %v22405_v4 }
 0x6b7   :  { %20056 = vmatpush3.bf16.msra.mxu0 %v20053_v22  ;;  %18256 = vmatprep.mubr.f32.mxu0 %v23518_v32 }
 0x6b8   :  { %20058 = vmatprep.subr.bf16.mxu0 %v20045_v60 }
 0x6ba   :  { %18257 = vmatmul.mubr.f32.gmra.mrb[8].mxu0 %v23519_v13 }
 0x6bb   :  { %18263 = vmatprep.mubr.f32.mxu0 %v23520_v6 }
 0x6be   :  { %18264 = vmatmul.mubr.f32.vlgmr.msra.gmra.mrb[6].mxu0 %v23521_v10 }
 0x6bf   :  { %20060 = vmatpush3.bf16.msra.mxu0 %v20045_v60  ;;  %18266 = vmatprep.mubr.f32.mxu0 %v23522_v50 }
 0x6c0   :  { %20062 = vmatprep.subr.bf16.mxu0 %v20061_v12 }
 0x6c2   :  { %18267 = vmatmul.mubr.f32.gmra.mrb[8].mxu0 %v23523_v31 }
 0x6c3   :  { %18273 = vmatprep.mubr.f32.mxu0 %v23524_v30 }
 0x6c6   :  { %18274 = vmatmul.mubr.f32.vlgmr.msra.gmra.mrb[6].mxu0 %v23525_v29 }
 0x6c7   :  { %20064 = vmatpush3.bf16.msra.mxu0 %v20061_v12  ;;  %18276 = vmatprep.mubr.f32.mxu0 %v23526_v45 }
 0x6c8   :  { %20066 = vmatprep.subr.bf16.mxu0 %v20045_v60 }
 0x6ca   :  { %18277 = vmatmul.mubr.f32.gmra.mrb[8].mxu0 %v23527_v27 }
 0x6cb   :  { %18283 = vmatprep.mubr.f32.mxu0 %v22390_v58 }
 0x6ce   :  { %18284 = vmatmul.mubr.f32.vlgmr.msra.gmra.mrb[6].mxu0 %v22405_v4 }
 0x6cf   :  { %20068 = vmatpush3.bf16.msra.mxu0 %v20045_v60  ;;  %18286 = vmatprep.mubr.f32.mxu0 %v23518_v32 }
 0x6d2   :  { %18287 = vmatmul.mubr.f32.gmra.mrb[8].mxu0 %v23519_v13 }
 0x6d3   :  { %18293 = vmatprep.mubr.f32.mxu0 %v22390_v58 }
 0x6d6   :  { %18294 = vmatmul.mubr.f32.vlgmr.msra.gmra.mrb[6].mxu0 %v22405_v4 }
 0x6d7   :  { %18296 = vmatprep.mubr.f32.mxu0 %v23518_v32 }
 0x6da   :  { %18297 = vmatmul.mubr.f32.gmra.mrb[8].mxu0 %v23519_v13 }
 0x7a9   :  { %v18295_v41 = vpop.f32.mrb[6].mxu0 }
 0x7aa   :  { %v4855_v2 = vmax.f32 %v18295_v41, 0.0  ;;  %v4832_v63 = vpop.f32.mrb[7].mxu0 }
 0x7ab   :  { %v4854_v0 = vmax.f32 %v4832_v63, 0.0 }
 0x7ac   :  { %v4862_v55 = vand.u32 4294901760, %v4855_v2 }
 0x7ad   :  { %v4859_v3 = vand.u32 4294901760, %v4854_v0  ;;  %v18298_v11 = vpop.f32.mrb[8].mxu0 }
 0x7ae   :  { %v4956_v56 = vsub.f32 %v4855_v2, %v4862_v55  ;;  %v4857_v43 = vmax.f32 %v18298_v11, 0.0  ;;  %v4844_v5 = vpop.f32.mrb[9].mxu0  ;;  %v23529_v11 = vld [vmem:[#allocation54_spill] sm:$0xff] }
 0x7af   :  { %v20069_v8 = vpack.c.bf16 %v4862_v55, %v4859_v3  ;;  %v4949_v9 = vsub.f32 %v4854_v0, %v4859_v3  ;;  %v4856_v19 = vmax.f32 %v4844_v5, 0.0  ;;  %v23528_v55 = vld [vmem:[#allocation60_spill] sm:$0xff]  ;;  %v23531_v5 = vld [vmem:[#allocation55_spill] sm:$0xff] }
 0x7b0   :  { %v4957_v44 = vand.u32 4294901760, %v4956_v56  ;;  %v4868_v48 = vand.u32 4294901760, %v4857_v43 }
 0x7b1   :  { %v4950_v57 = vand.u32 4294901760, %v4949_v9  ;;  %v4865_v52 = vand.u32 4294901760, %v4856_v19  ;;  %20070 = vmatprep.subr.bf16.mxu1 %v20069_v8  ;;  %v20085_v26 = vpack.c.bf16 %v4956_v56, %v4949_v9 }
 0x7b2   :  { %v4970_v36 = vsub.f32 %v4857_v43, %v4868_v48  ;;  %20072 = vmatpush3.bf16.msra.mxu1 %v20069_v8  ;;  %v4958_v60 = vsub.f32 %v4956_v56, %v4957_v44  ;;  %v23530_v43 = vld [vmem:[#allocation57_spill] sm:$0xff] }
 0x7b3   :  { %v20073_v40 = vpack.c.bf16 %v4868_v48, %v4865_v52  ;;  %v4963_v59 = vsub.f32 %v4856_v19, %v4865_v52  ;;  %v4951_v7 = vsub.f32 %v4949_v9, %v4950_v57  ;;  %v20101_v47 = vpack.c.bf16 %v4957_v44, %v4950_v57  ;;  %v23532_v9 = vld [vmem:[#allocation58_spill] sm:$0xff]  ;;  %v23533_v19 = vld [vmem:[#allocation56_spill] sm:$0xff]  ;;  %v23534_v44 = vld [vmem:[#allocation59_spill] sm:$0xff] }
 0x7b4   :  { %v4971_v35 = vand.u32 4294901760, %v4970_v36  ;;  %v4959_v14 = vand.u32 4294901760, %v4958_v60  ;;  %v5394_v48 = vld [vmem:[#allocation17 + $0x20] sm:$0xff]  ;;  %v5395_v57 = vld [vmem:[#allocation17 + $0x28] sm:$0xff] }
 0x7b5   :  { %v4964_v21 = vand.u32 4294901760, %v4963_v59  ;;  %20074 = vmatprep.subr.bf16.mxu1 %v20073_v40  ;;  %v4952_v61 = vand.u32 4294901760, %v4951_v7  ;;  %v20089_v22 = vpack.c.bf16 %v4970_v36, %v4963_v59  ;;  %v5413_v52 = vand.u32 4294901760, %v5394_v48  ;;  %v5396_v7 = vld [vmem:[#allocation17 + $0x30] sm:$0xff] }
 0x7b6   :  { %20076 = vmatpush3.bf16.msra.mxu1 %v20073_v40  ;;  %v4972_v12 = vsub.f32 %v4970_v36, %v4971_v35 }
 0x7b7   :  { %v20077_v41 = vpack.c.bf16 %v4959_v14, %v4952_v61  ;;  %v4965_v2 = vsub.f32 %v4963_v59, %v4964_v21  ;;  %v20105_v63 = vpack.c.bf16 %v4971_v35, %v4964_v21  ;;  %v5503_v60 = vsub.f32 %v5394_v48, %v5413_v52 }
 0x7b8   :  { %v4973_v0 = vand.u32 4294901760, %v4972_v12  ;;  %v5419_v35 = vand.u32 4294901760, %v5396_v7 }
 0x7b9   :  { %18308 = vmatmul.mubr.f32.vlgmr.msra.gmra.mrb[8].mxu1 %v23528_v55  ;;  %20078 = vmatprep.subr.bf16.mxu1 %v20077_v41  ;;  %v4966_v3 = vand.u32 4294901760, %v4965_v2  ;;  %v5504_v14 = vand.u32 4294901760, %v5503_v60 }
 0x7ba   :  { %20080 = vmatpush3.bf16.msra.mxu1 %v20077_v41  ;;  %18318 = vmatprep.mubr.f32.mxu1 %v23529_v11  ;;  %v5517_v12 = vsub.f32 %v5396_v7, %v5419_v35 }
 0x7bb   :  { %v20081_v56 = vpack.c.bf16 %v4973_v0, %v4966_v3  ;;  %v5505_v61 = vsub.f32 %v5503_v60, %v5504_v14 }
 0x7bc   :  { %v5518_v0 = vand.u32 4294901760, %v5517_v12 }
 0x7bd   :  { %20082 = vmatprep.subr.bf16.mxu1 %v20081_v56  ;;  %v5506_v2 = vand.u32 4294901760, %v5505_v61 }
 0x7be   :  { %20084 = vmatpush3.bf16.msra.mxu1 %v20081_v56  ;;  %v5519_v48 = vsub.f32 %v5517_v12, %v5518_v0 }
 0x7bf   :  { %20086 = vmatprep.subr.bf16.mxu1 %v20085_v26 }
 0x7c1   :  { %18319 = vmatmul.mubr.f32.vlgmr.msra.gmra.mrb[8].mxu1 %v23530_v43 }
 0x7c2   :  { %20088 = vmatpush3.bf16.msra.mxu1 %v20085_v26  ;;  %18329 = vmatprep.mubr.f32.mxu1 %v23531_v5  ;;  %v5416_v26 = vand.u32 4294901760, %v5395_v57 }
 0x7c3   :  { %20090 = vmatprep.subr.bf16.mxu1 %v20089_v22 }
 0x7c4   :  { %v22690_v36 = vpack.c.bf16 %v5416_v26, %v5413_v52  ;;  %v5510_v59 = vsub.f32 %v5395_v57, %v5416_v26  ;;  %v5520_v52 = vand.u32 4294901760, %v5519_v48 }
 0x7c6   :  { %20092 = vmatpush3.bf16.msra.mxu1 %v20089_v22  ;;  %20118 = vmatprep.subr.bf16.mxu0 %v22690_v36  ;;  %v5511_v21 = vand.u32 4294901760, %v5510_v59 }
 0x7c7   :  { %20094 = vmatprep.subr.bf16.mxu1 %v20069_v8  ;;  %20120 = vmatpush3.bf16.msra.mxu0 %v22690_v36 }
 0x7c8   :  { %v5512_v22 = vsub.f32 %v5510_v59, %v5511_v21  ;;  %v20149_v5 = vpack.c.bf16 %v5511_v21, %v5504_v14 }
 0x7c9   :  { %18330 = vmatmul.mubr.f32.vlgmr.msra.gmra.mrb[8].mxu1 %v23532_v9 }
 0x7ca   :  { %20096 = vmatpush3.bf16.msra.mxu1 %v20069_v8  ;;  %18340 = vmatprep.mubr.f32.mxu1 %v23533_v19  ;;  %v20133_v19 = vpack.c.bf16 %v5510_v59, %v5503_v60 }
 0x7cb   :  { %20098 = vmatprep.subr.bf16.mxu1 %v20073_v40 }
 0x7ce   :  { %20100 = vmatpush3.bf16.msra.mxu1 %v20073_v40 }
 0x7cf   :  { %20102 = vmatprep.subr.bf16.mxu1 %v20101_v47 }
 0x7d1   :  { %18341 = vmatmul.mubr.f32.vlgmr.msra.gmra.mrb[8].mxu1 %v23534_v44 }
 0x7d2   :  { %20104 = vmatpush3.bf16.msra.mxu1 %v20101_v47  ;;  %18351 = vmatprep.mubr.f32.mxu1 %v23529_v11  ;;  %v5397_v47 = vld [vmem:[#allocation17 + $0x38] sm:$0xff] }
 0x7d3   :  { %20106 = vmatprep.subr.bf16.mxu1 %v20105_v63 }
 0x7d6   :  { %20108 = vmatpush3.bf16.msra.mxu1 %v20105_v63  ;;  %v5513_v63 = vand.u32 4294901760, %v5512_v22 }
 0x7d7   :  { %20110 = vmatprep.subr.bf16.mxu1 %v20069_v8 }
 0x7d8   :  { %v20125_v56 = vpack.c.bf16 %v5513_v63, %v5506_v2 }
 0x7d9   :  { %18352 = vmatmul.mubr.f32.vlgmr.msra.gmra.mrb[8].mxu1 %v23530_v43 }
 0x7da   :  { %20112 = vmatpush3.bf16.msra.mxu1 %v20069_v8  ;;  %18362 = vmatprep.mubr.f32.mxu1 %v23529_v11  ;;  %v5422_v8 = vand.u32 4294901760, %v5397_v47 }
 0x7db   :  { %20114 = vmatprep.subr.bf16.mxu1 %v20073_v40 }
 0x7dc   :  { %v5524_v41 = vsub.f32 %v5397_v47, %v5422_v8  ;;  %v5388_v47 = vstv %s5387_s7 }
 0x7dd   :  { %v5389_v61 = vmul.f32 %v5388_v47, %v22650_v18 }
 0x7de   :  { %20116 = vmatpush3.bf16.msra.mxu1 %v20073_v40  ;;  %v22694_v40 = vpack.c.bf16 %v5422_v8, %v5419_v35  ;;  %v5525_v3 = vand.u32 4294901760, %v5524_v41  ;;  %v20137_v9 = vpack.c.bf16 %v5524_v41, %v5517_v12  ;;  %v5390_v35 = vmul.f32 %v5388_v47, %v22647_v53 }
 0x7e0   :  { %20122 = vmatprep.subr.bf16.mxu0 %v22694_v40  ;;  %v5526_v57 = vsub.f32 %v5524_v41, %v5525_v3  ;;  %v20153_v7 = vpack.c.bf16 %v5525_v3, %v5518_v0 }
 0x7e1   :  { %18363 = vmatmul.mubr.f32.vlgmr.msra.gmra.mrb[8].mxu1 %v23530_v43  ;;  %20124 = vmatpush3.bf16.msra.mxu0 %v22694_v40 }
 0x7e2   :  { %20126 = vmatprep.subr.bf16.mxu0 %v20125_v56  ;;  %v5527_v26 = vand.u32 4294901760, %v5526_v57 }
 0x7e4   :  { %v20129_v44 = vpack.c.bf16 %v5527_v26, %v5520_v52  ;;  %v5945_v26 = vld [vmem:[#allocation20 + $0x50] sm:$0xff] }
 0x7e5   :  { %v5972_v47 = vand.u32 4294901760, %v5945_v26 }
 0x8b4   :  { %v18364_v8 = vpop.f32.mrb[8].mxu1 }
 0x8b5   :  { %v5392_v22 = vadd.f32 %v18364_v8, %v5390_v35  ;;  %v5376_v2 = vpop.f32.mrb[9].mxu1  ;;  %v5948_v8 = vld [vmem:[#allocation20 + $0x68] sm:$0xff] }
 0x8b6   :  { %v5391_v63 = vadd.f32 %v5389_v61, %v5376_v2 }
 0x8b7   :  { %v5410_v43 = vsel %vm1991_vm3, %v5392_v22, 0  ;;  %v5981_v22 = vand.u32 4294901760, %v5948_v8 }
 0x8b8   :  { %v5491_v48 = vand.u32 4294901760, %v5410_v43  ;;  %v5407_v57 = vsel %vm1991_vm3, %v5391_v63, 0 }
 0x8b9   :  { %v5481_v60 = vand.u32 4294901760, %v5407_v57  ;;  %v6095_v45 = vsub.f32 %v5948_v8, %v5981_v22 }
 0x8ba   :  { %v5492_v59 = vsub.f32 %v5410_v43, %v5491_v48  ;;  %v23535_v43 = vld [vmem:[#allocation43_spill] sm:$0xff] }
 0x8bb   :  { %v5482_v14 = vsub.f32 %v5407_v57, %v5481_v60  ;;  %v5949_v57 = vld [vmem:[#allocation20 + $0x70] sm:$0xff] }
 0x8bc   :  { %v5493_v21 = vand.u32 4294901760, %v5492_v59 }
 0x8bd   :  { %v5483_v12 = vand.u32 4294901760, %v5482_v14 }
 0x8be   :  { %v5494_v41 = vsub.f32 %v5492_v59, %v5493_v21 }
 0x8bf   :  { %v5484_v0 = vsub.f32 %v5482_v14, %v5483_v12 }
 0x8c0   :  { %v5495_v52 = vand.u32 4294901760, %v5494_v41 }
 0x8c1   :  { %v5485_v3 = vand.u32 4294901760, %v5484_v0 }
 0x8c3   :  { %18373 = vmatprep.mubr.f32.mxu0 %v5485_v3 }
 0x8c4   :  { %18374 = vmatmul.mubr.f32.vlgmr.msra.gmra.mrb[10].mxu0 %v5495_v52  ;;  %v6074_v52 = vsub.f32 %v5945_v26, %v5972_v47  ;;  %v6096_v26 = vand.u32 4294901760, %v6095_v45 }
 0x8c5   :  { %20128 = vmatpush3.bf16.msra.mxu0 %v20125_v56  ;;  %18384 = vmatprep.mubr.f32.mxu0 %v5481_v60 }
 0x8c6   :  { %20130 = vmatprep.subr.bf16.mxu0 %v20129_v44 }
 0x8c9   :  { %20132 = vmatpush3.bf16.msra.mxu0 %v20129_v44 }
 0x8ca   :  { %20134 = vmatprep.subr.bf16.mxu0 %v20133_v19 }
 0x8cc   :  { %18385 = vmatmul.mubr.f32.vlgmr.msra.gmra.mrb[10].mxu0 %v5491_v48 }
 0x8cd   :  { %20136 = vmatpush3.bf16.msra.mxu0 %v20133_v19  ;;  %18395 = vmatprep.mubr.f32.mxu0 %v5482_v14  ;;  %v5944_v19 = vld [vmem:[#allocation20 + $0x48] sm:$0xff] }
 0x8ce   :  { %20138 = vmatprep.subr.bf16.mxu0 %v20137_v9 }
 0x8d1   :  { %20140 = vmatpush3.bf16.msra.mxu0 %v20137_v9  ;;  %v5943_v9 = vld [vmem:[#allocation20 + $0x40] sm:$0xff] }
 0x8d2   :  { %20142 = vmatprep.subr.bf16.mxu0 %v22690_v36  ;;  %v5966_v44 = vand.u32 4294901760, %v5943_v9 }
 0x8d4   :  { %18396 = vmatmul.mubr.f32.vlgmr.msra.gmra.mrb[10].mxu0 %v5492_v59  ;;  %v6060_v63 = vsub.f32 %v5943_v9, %v5966_v44  ;;  %v5984_v59 = vand.u32 4294901760, %v5949_v57 }
 0x8d5   :  { %20144 = vmatpush3.bf16.msra.mxu0 %v22690_v36  ;;  %18406 = vmatprep.mubr.f32.mxu0 %v5483_v12 }
 0x8d6   :  { %20146 = vmatprep.subr.bf16.mxu0 %v22694_v40 }
 0x8d9   :  { %20148 = vmatpush3.bf16.msra.mxu0 %v22694_v40 }
 0x8da   :  { %20150 = vmatprep.subr.bf16.mxu0 %v20149_v5 }
 0x8dc   :  { %18407 = vmatmul.mubr.f32.vlgmr.msra.gmra.mrb[10].mxu0 %v5493_v21  ;;  %v6061_v21 = vand.u32 4294901760, %v6060_v63 }
 0x8dd   :  { %20152 = vmatpush3.bf16.msra.mxu0 %v20149_v5  ;;  %18417 = vmatprep.mubr.f32.mxu0 %v5481_v60  ;;  %v5969_v5 = vand.u32 4294901760, %v5944_v19 }
 0x8de   :  { %20154 = vmatprep.subr.bf16.mxu0 %v20153_v7  ;;  %v6062_v0 = vsub.f32 %v6060_v63, %v6061_v21 }
 0x8df   :  { %v22711_v56 = vpack.c.bf16 %v5969_v5, %v5966_v44  ;;  %v6075_v44 = vand.u32 4294901760, %v6074_v52 }
 0x8e0   :  { %v6063_v9 = vand.u32 4294901760, %v6062_v0  ;;  %v6102_v0 = vsub.f32 %v5949_v57, %v5984_v59 }
 0x8e1   :  { %20156 = vmatpush3.bf16.msra.mxu0 %v20153_v7  ;;  %v5946_v7 = vld [vmem:[#allocation20 + $0x58] sm:$0xff]  ;;  %20166 = vmatprep.subr.bf16.mxu1 %v22711_v56  ;;  %v6076_v55 = vsub.f32 %v6074_v52, %v6075_v44 }
 0x8e2   :  { %20158 = vmatprep.subr.bf16.mxu0 %v22690_v36  ;;  %20168 = vmatpush3.bf16.msra.mxu1 %v22711_v56 }
 0x8e3   :  { %v6077_v30 = vand.u32 4294901760, %v6076_v55 }
 0x8e4   :  { %18418 = vmatmul.mubr.f32.vlgmr.msra.gmra.mrb[10].mxu0 %v5491_v48 }
 0x8e5   :  { %20160 = vmatpush3.bf16.msra.mxu0 %v22690_v36  ;;  %18428 = vmatprep.mubr.f32.mxu0 %v5481_v60  ;;  %v5975_v36 = vand.u32 4294901760, %v5946_v7  ;;  %v5950_v60 = vld [vmem:[#allocation20 + $0x78] sm:$0xff] }
 0x8e6   :  { %20162 = vmatprep.subr.bf16.mxu0 %v22694_v40  ;;  %v5987_v14 = vand.u32 4294901760, %v5950_v60 }
 0x8e7   :  { %v22715_v35 = vpack.c.bf16 %v5975_v36, %v5972_v47 }
 0x8e8   :  { %v22723_v41 = vpack.c.bf16 %v5987_v14, %v5984_v59 }
 0x8e9   :  { %20164 = vmatpush3.bf16.msra.mxu0 %v22694_v40  ;;  %v5947_v40 = vld [vmem:[#allocation20 + $0x60] sm:$0xff]  ;;  %20170 = vmatprep.subr.bf16.mxu1 %v22715_v35 }
 0x8ea   :  { %v5978_v61 = vand.u32 4294901760, %v5947_v40  ;;  %20172 = vmatpush3.bf16.msra.mxu1 %v22715_v35 }
 0x8ec   :  { %18429 = vmatmul.mubr.f32.vlgmr.msra.gmra.mrb[10].mxu0 %v5491_v48  ;;  %v22719_v2 = vpack.c.bf16 %v5981_v22, %v5978_v61  ;;  %v6067_v48 = vsub.f32 %v5944_v19, %v5969_v5  ;;  %v6088_v27 = vsub.f32 %v5947_v40, %v5978_v61 }
 0x8ed   :  { %18547 = vmatprep.mubr.f32.mxu0 %v23535_v43  ;;  %v6081_v43 = vsub.f32 %v5946_v7, %v5975_v36  ;;  %v6097_v36 = vsub.f32 %v6095_v45, %v6096_v26 }
 0x8ee   :  { %20174 = vmatprep.subr.bf16.mxu1 %v22719_v2  ;;  %v6068_v12 = vand.u32 4294901760, %v6067_v48  ;;  %v6089_v31 = vand.u32 4294901760, %v6088_v27  ;;  %v22736_v32 = vpack.c.bf16 %v6067_v48, %v6060_v63  ;;  %v22740_v57 = vpack.c.bf16 %v6095_v45, %v6088_v27 }
 0x8ef   :  { %20176 = vmatpush3.bf16.msra.mxu1 %v22719_v2  ;;  %v6082_v5 = vand.u32 4294901760, %v6081_v43  ;;  %v6098_v6 = vand.u32 4294901760, %v6097_v36 }
 0x8f0   :  { %v6069_v3 = vsub.f32 %v6067_v48, %v6068_v12  ;;  %20178 = vmatprep.subr.bf16.mxu1 %v22723_v41  ;;  %v6090_v47 = vsub.f32 %v6088_v27, %v6089_v31 }
 0x8f1   :  { %v6083_v29 = vsub.f32 %v6081_v43, %v6082_v5  ;;  %v22746_v59 = vpack.c.bf16 %v6082_v5, %v6075_v44 }
 0x8f2   :  { %v6070_v19 = vand.u32 4294901760, %v6069_v3  ;;  %v6109_v3 = vsub.f32 %v5950_v60, %v5987_v14  ;;  %v6091_v10 = vand.u32 4294901760, %v6090_v47  ;;  %v22744_v60 = vpack.c.bf16 %v6068_v12, %v6061_v21  ;;  %v6550_v14 = vld [vmem:[#allocation15 + $0x8] sm:$0xf] }
 0x8f3   :  { %20180 = vmatpush3.bf16.msra.mxu1 %v22723_v41  ;;  %v6084_v7 = vand.u32 4294901760, %v6083_v29  ;;  %v22738_v29 = vpack.c.bf16 %v6081_v43, %v6074_v52 }
 0x8f4   :  { %v22727_v11 = vpack.c.bf16 %v6070_v19, %v6063_v9  ;;  %v6103_v9 = vand.u32 4294901760, %v6102_v0  ;;  %v6110_v19 = vand.u32 4294901760, %v6109_v3  ;;  %v22732_v13 = vpack.c.bf16 %v6098_v6, %v6091_v10 }
 0x8f5   :  { %v22730_v50 = vpack.c.bf16 %v6084_v7, %v6077_v30  ;;  %v22742_v30 = vpack.c.bf16 %v6109_v3, %v6102_v0  ;;  %v22748_v6 = vpack.c.bf16 %v6096_v26, %v6089_v31  ;;  %v6552_v7 = vsel %vm292_vm0, %v6550_v14, 0  ;;  %v16684_v31 = vld [vmem:[#allocation18 + $0x1] ss:$0 sm:$0xff] }
 0x8f6   :  { %20182 = vmatprep.subr.bf16.mxu1 %v22727_v11  ;;  %v6104_v40 = vsub.f32 %v6102_v0, %v6103_v9  ;;  %v6111_v8 = vsub.f32 %v6109_v3, %v6110_v19  ;;  %v22750_v10 = vpack.c.bf16 %v6110_v19, %v6103_v9  ;;  %v6555_v47 = vand.u32 4294901760, %v6552_v7 }
 0x8f8   :  { %v6105_v61 = vand.u32 4294901760, %v6104_v40  ;;  %v6112_v22 = vand.u32 4294901760, %v6111_v8  ;;  %18545 = vmatprep.subr.mxu0 %v6555_v47  ;;  %v6662_v63 = vsub.f32 %v6552_v7, %v6555_v47 }
 0x8f9   :  { %18546 = vmatpush3.msra.mxu0 %v6555_v47 }
 0x8fa   :  { %v22734_v55 = vpack.c.bf16 %v6112_v22, %v6105_v61  ;;  %18548 = vmatmul.mubr.f32.vlgmr.msra.gmra.mrb[12].mxu0 %v22342_v49  ;;  %v6663_v45 = vand.u32 4294901760, %v6662_v63 }
 0x8fb   :  { %18550 = vmatprep.mubr.f32.mxu0 %v22344_v51 }
 0x8fc   :  { %v6664_v27 = vsub.f32 %v6662_v63, %v6663_v45 }
 0x8fe   :  { %18551 = vmatmul.mubr.f32.gmra.mrb[14].mxu0 %v22348_v54  ;;  %v6665_v43 = vand.u32 4294901760, %v6664_v27 }
 0x8ff   :  { %18555 = vmatprep.mubr.f32.mxu0 %v22279_v15 }
 0x900   :  { %18553 = vmatprep.subr.mxu0 %v6665_v43 }
 0x901   :  { %18554 = vmatpush3.msra.mxu0 %v6665_v43  ;;  %v23536_v43 = vld [vmem:[#allocation46_spill] sm:$0xff] }
 0x902   :  { %18556 = vmatmul.mubr.f32.vlgmr.msra.gmra.mrb[12].mxu0 %v22281_v16  ;;  %18561 = vmatprep.subr.mxu0 %v6662_v63 }
 0x903   :  { %18558 = vmatprep.mubr.f32.mxu0 %v22283_v17  ;;  %18562 = vmatpush3.msra.mxu0 %v6662_v63 }
 0x904   :  { %18569 = vmatprep.subr.mxu0 %v6555_v47 }
 0x906   :  { %18559 = vmatmul.mubr.f32.gmra.mrb[14].mxu0 %v22289_v20 }
 0x907   :  { %18563 = vmatprep.mubr.f32.mxu0 %v22295_v23 }
 0x90a   :  { %18564 = vmatmul.mubr.f32.vlgmr.msra.gmra.mrb[12].mxu0 %v22298_v24 }
 0x90b   :  { %18566 = vmatprep.mubr.f32.mxu0 %v22301_v25  ;;  %18570 = vmatpush3.msra.mxu0 %v6555_v47 }
 0x90c   :  { %18577 = vmatprep.subr.mxu0 %v6663_v45 }
 0x90e   :  { %18567 = vmatmul.mubr.f32.gmra.mrb[14].mxu0 %v22307_v28 }
 0x90f   :  { %18571 = vmatprep.mubr.f32.mxu0 %v22316_v33 }
 0x912   :  { %18572 = vmatmul.mubr.f32.vlgmr.msra.gmra.mrb[12].mxu0 %v22319_v34 }
 0x913   :  { %18574 = vmatprep.mubr.f32.mxu0 %v22324_v37  ;;  %18578 = vmatpush3.msra.mxu0 %v6663_v45 }
 0x914   :  { %18585 = vmatprep.subr.mxu0 %v6555_v47 }
 0x916   :  { %18575 = vmatmul.mubr.f32.gmra.mrb[14].mxu0 %v22327_v38 }
 0x917   :  { %18579 = vmatprep.mubr.f32.mxu0 %v22279_v15 }
 0x91a   :  { %18580 = vmatmul.mubr.f32.vlgmr.msra.gmra.mrb[12].mxu0 %v22281_v16 }
 0x91b   :  { %18582 = vmatprep.mubr.f32.mxu0 %v22283_v17  ;;  %18586 = vmatpush3.msra.mxu0 %v6555_v47 }
 0x91e   :  { %18583 = vmatmul.mubr.f32.gmra.mrb[14].mxu0 %v22289_v20 }
 0x91f   :  { %18587 = vmatprep.mubr.f32.mxu0 %v22279_v15 }
 0x922   :  { %18588 = vmatmul.mubr.f32.vlgmr.msra.gmra.mrb[12].mxu0 %v22281_v16 }
 0x923   :  { %18590 = vmatprep.mubr.f32.mxu0 %v22283_v17 }
 0x926   :  { %18591 = vmatmul.mubr.f32.gmra.mrb[14].mxu0 %v22289_v20 }
 0x927   :  { %18597 = vmatprep.mubr.f32.mxu0 %v22400_v62 }
 0x9bf   :  { %v18430_v48 = vpop.f32.mrb[10].mxu0 }
 0x9c0   :  { %v21043_v21 = vadd.f32 %v18430_v48, %v16684_v31  ;;  %v5930_v12 = vpop.f32.mrb[11].mxu0  ;;  %v23538_v48 = vld [vmem:[#allocation44_spill] sm:$0xff] }
 0x9c1   :  { %v21044_v52 = vadd.f32 %v16684_v31, %v5930_v12  ;;  %v23537_v31 = vld [vmem:[#allocation48_spill] sm:$0xff] }
 0x9c2   :  { %v5941_v44 = vmax.f32 %v21043_v21, 0.0  ;;  %v23539_v21 = vld [vmem:[#allocation47_spill] sm:$0xff] }
 0x9c3   :  { %v5940_v5 = vmax.f32 %v21044_v52, 0.0  ;;  %v23540_v52 = vld [vmem:[#allocation49_spill] sm:$0xff] }
 0x9c4   :  { %v5963_v26 = vsel %vm3095_vm4, %v5941_v44, 0  ;;  %v23541_v44 = vld [vmem:[#allocation51_spill] sm:$0xff] }
 0x9c5   :  { %v22770_v36 = vand.u32 4294901760, %v5963_v26  ;;  %v5960_v0 = vsel %vm3095_vm4, %v5940_v5, 0  ;;  %v23542_v5 = vld [vmem:[#allocation45_spill] sm:$0xff] }
 0x9c6   :  { %v6038_v3 = vand.u32 4294901760, %v5960_v0 }
 0x9c7   :  { %v6049_v9 = vsub.f32 %v5963_v26, %v22770_v36  ;;  %v23543_v26 = vld [vmem:[#allocation50_spill] sm:$0xff] }
 0x9c8   :  { %v6039_v19 = vsub.f32 %v5960_v0, %v6038_v3  ;;  %v23545_v0 = vld [vmem:[#allocation53_spill] sm:$0xff] }
 0x9c9   :  { %v6050_v40 = vand.u32 4294901760, %v6049_v9 }
 0x9ca   :  { %v6040_v8 = vand.u32 4294901760, %v6039_v19 }
 0x9cb   :  { %v6051_v61 = vsub.f32 %v6049_v9, %v6050_v40 }
 0x9cc   :  { %v6041_v22 = vsub.f32 %v6039_v19, %v6040_v8 }
 0x9cd   :  { %v6052_v7 = vand.u32 4294901760, %v6051_v61 }
 0x9ce   :  { %v6042_v14 = vand.u32 4294901760, %v6041_v22 }
 0x9d0   :  { %18447 = vmatprep.mubr.f32.mxu1 %v6042_v14 }
 0x9d1   :  { %18448 = vmatmul.mubr.f32.vlgmr.msra.gmra.mrb[10].mxu1 %v6052_v7 }
 0x9d2   :  { %20184 = vmatpush3.bf16.msra.mxu1 %v22727_v11  ;;  %18466 = vmatprep.mubr.f32.mxu1 %v6038_v3 }
 0x9d3   :  { %20186 = vmatprep.subr.bf16.mxu1 %v22730_v50 }
 0x9d6   :  { %20188 = vmatpush3.bf16.msra.mxu1 %v22730_v50 }
 0x9d7   :  { %20190 = vmatprep.subr.bf16.mxu1 %v22732_v13 }
 0x9da   :  { %20192 = vmatpush3.bf16.msra.mxu1 %v22732_v13 }
 0x9db   :  { %20194 = vmatprep.subr.bf16.mxu1 %v22734_v55 }
 0x9de   :  { %20196 = vmatpush3.bf16.msra.mxu1 %v22734_v55 }
 0x9df   :  { %20198 = vmatprep.subr.bf16.mxu1 %v22736_v32 }
 0x9e1   :  { %18467 = vmatmul.mubr.f32.vlgmr.msra.gmra.mrb[10].mxu1 %v22770_v36 }
 0x9e2   :  { %20200 = vmatpush3.bf16.msra.mxu1 %v22736_v32  ;;  %18485 = vmatprep.mubr.f32.mxu1 %v6039_v19  ;;  %v16685_v32 = vld [vmem:[#allocation21 + $0x1] ss:$0 sm:$0xff] }
 0x9e3   :  { %20202 = vmatprep.subr.bf16.mxu1 %v22738_v29 }
 0x9e6   :  { %20204 = vmatpush3.bf16.msra.mxu1 %v22738_v29 }
 0x9e7   :  { %20206 = vmatprep.subr.bf16.mxu1 %v22740_v57 }
 0x9ea   :  { %20208 = vmatpush3.bf16.msra.mxu1 %v22740_v57 }
 0x9eb   :  { %20210 = vmatprep.subr.bf16.mxu1 %v22742_v30 }
 0x9ee   :  { %20212 = vmatpush3.bf16.msra.mxu1 %v22742_v30 }
 0x9ef   :  { %20214 = vmatprep.subr.bf16.mxu1 %v22711_v56 }
 0x9f1   :  { %18486 = vmatmul.mubr.f32.vlgmr.msra.gmra.mrb[10].mxu1 %v6049_v9 }
 0x9f2   :  { %20216 = vmatpush3.bf16.msra.mxu1 %v22711_v56  ;;  %18504 = vmatprep.mubr.f32.mxu1 %v6040_v8 }
 0x9f3   :  { %20218 = vmatprep.subr.bf16.mxu1 %v22715_v35 }
 0x9f6   :  { %20220 = vmatpush3.bf16.msra.mxu1 %v22715_v35 }
 0x9f7   :  { %20222 = vmatprep.subr.bf16.mxu1 %v22719_v2 }
 0x9fa   :  { %20224 = vmatpush3.bf16.msra.mxu1 %v22719_v2 }
 0x9fb   :  { %20226 = vmatprep.subr.bf16.mxu1 %v22723_v41 }
 0x9fe   :  { %20228 = vmatpush3.bf16.msra.mxu1 %v22723_v41 }
 0x9ff   :  { %20230 = vmatprep.subr.bf16.mxu1 %v22744_v60 }
 0xa01   :  { %18505 = vmatmul.mubr.f32.vlgmr.msra.gmra.mrb[10].mxu1 %v6050_v40 }
 0xa02   :  { %20232 = vmatpush3.bf16.msra.mxu1 %v22744_v60  ;;  %18523 = vmatprep.mubr.f32.mxu1 %v6038_v3 }
 0xa03   :  { %20234 = vmatprep.subr.bf16.mxu1 %v22746_v59 }
 0xa06   :  { %20236 = vmatpush3.bf16.msra.mxu1 %v22746_v59 }
 0xa07   :  { %20238 = vmatprep.subr.bf16.mxu1 %v22748_v6 }
 0xa0a   :  { %20240 = vmatpush3.bf16.msra.mxu1 %v22748_v6 }
 0xa0b   :  { %20242 = vmatprep.subr.bf16.mxu1 %v22750_v10 }
 0xa0e   :  { %20244 = vmatpush3.bf16.msra.mxu1 %v22750_v10 }
 0xa0f   :  { %20246 = vmatprep.subr.bf16.mxu1 %v22711_v56 }
 0xa11   :  { %18524 = vmatmul.mubr.f32.vlgmr.msra.gmra.mrb[10].mxu1 %v22770_v36 }
 0xa12   :  { %20248 = vmatpush3.bf16.msra.mxu1 %v22711_v56  ;;  %18542 = vmatprep.mubr.f32.mxu1 %v6038_v3 }
 0xa13   :  { %20250 = vmatprep.subr.bf16.mxu1 %v22715_v35 }
 0xa16   :  { %20252 = vmatpush3.bf16.msra.mxu1 %v22715_v35 }
 0xa17   :  { %20254 = vmatprep.subr.bf16.mxu1 %v22719_v2 }
 0xa1a   :  { %20256 = vmatpush3.bf16.msra.mxu1 %v22719_v2 }
 0xa1b   :  { %20258 = vmatprep.subr.bf16.mxu1 %v22723_v41 }
 0xa1e   :  { %20260 = vmatpush3.bf16.msra.mxu1 %v22723_v41 }
 0xa21   :  { %18543 = vmatmul.mubr.f32.vlgmr.msra.gmra.mrb[10].mxu1 %v22770_v36  ;;  %v23544_v36 = vld [vmem:[#allocation52_spill] sm:$0xff] }
 0xa22   :  { %18661 = vmatprep.mubr.f32.mxu1 %v22485_v1 }
 0xaf4   :  { %v18544_v13 = vpop.f32.mrb[10].mxu1 }
 0xaf5   :  { %v21045_v50 = vadd.f32 %v18544_v13, %v16685_v32  ;;  %v6535_v11 = vpop.f32.mrb[11].mxu1 }
 0xaf6   :  { %v21046_v56 = vadd.f32 %v16685_v32, %v6535_v11 }
 0xaf7   :  { %v6546_v55 = vmax.f32 %v21045_v50, 0.0 }
 0xaf8   :  { %v6545_v29 = vmax.f32 %v21046_v56, 0.0 }
 0xaf9   :  { %v22826_v35 = vadd.f32 %v6546_v55, %v22647_v53 }
 0xafa   :  { %v22829_v2 = vadd.f32 %v6545_v29, %v22650_v18 }
 0xafb   :  { %v7133_v57 = vand.u32 4294901760, %v22826_v35 }
 0xafc   :  { %v7130_v41 = vand.u32 4294901760, %v22829_v2 }
 0xafd   :  { %v7245_v30 = vsub.f32 %v22826_v35, %v7133_v57 }
 0xafe   :  { %v20261_v60 = vpack.c.bf16 %v7133_v57, %v7130_v41  ;;  %v7238_v59 = vsub.f32 %v22829_v2, %v7130_v41 }
 0xaff   :  { %v7246_v6 = vand.u32 4294901760, %v7245_v30 }
 0xb00   :  { %20262 = vmatprep.subr.bf16.mxu0 %v20261_v60  ;;  %v7239_v10 = vand.u32 4294901760, %v7238_v59  ;;  %v20269_v27 = vpack.c.bf16 %v7245_v30, %v7238_v59 }
 0xb01   :  { %20264 = vmatpush3.bf16.msra.mxu0 %v20261_v60  ;;  %v7247_v47 = vsub.f32 %v7245_v30, %v7246_v6 }
 0xb02   :  { %v7240_v63 = vsub.f32 %v7238_v59, %v7239_v10  ;;  %v20277_v12 = vpack.c.bf16 %v7246_v6, %v7239_v10 }
 0xb03   :  { %v7248_v53 = vand.u32 4294901760, %v7247_v47 }
 0xb04   :  { %18598 = vmatmul.mubr.f32.vlgmr.msra.gmra.mrb[12].mxu0 %v22442_v39  ;;  %v7241_v18 = vand.u32 4294901760, %v7240_v63 }
 0xb05   :  { %18600 = vmatprep.mubr.f32.mxu0 %v22446_v42 }
 0xb06   :  { %v20265_v45 = vpack.c.bf16 %v7248_v53, %v7241_v18 }
 0xb08   :  { %18601 = vmatmul.mubr.f32.gmra.mrb[14].mxu0 %v22449_v46  ;;  %20266 = vmatprep.subr.bf16.mxu0 %v20265_v45 }
 0xb09   :  { %20268 = vmatpush3.bf16.msra.mxu0 %v20265_v45  ;;  %18607 = vmatprep.mubr.f32.mxu0 %v22390_v58 }
 0xb0a   :  { %20270 = vmatprep.subr.bf16.mxu0 %v20269_v27 }
 0xb0c   :  { %18608 = vmatmul.mubr.f32.vlgmr.msra.gmra.mrb[12].mxu0 %v22405_v4 }
 0xb0d   :  { %20272 = vmatpush3.bf16.msra.mxu0 %v20269_v27  ;;  %18610 = vmatprep.mubr.f32.mxu0 %v23536_v43 }
 0xb0e   :  { %20274 = vmatprep.subr.bf16.mxu0 %v20261_v60 }
 0xb10   :  { %18611 = vmatmul.mubr.f32.gmra.mrb[14].mxu0 %v23537_v31 }
 0xb11   :  { %18617 = vmatprep.mubr.f32.mxu0 %v23538_v48 }
 0xb14   :  { %18618 = vmatmul.mubr.f32.vlgmr.msra.gmra.mrb[12].mxu0 %v23539_v21 }
 0xb15   :  { %20276 = vmatpush3.bf16.msra.mxu0 %v20261_v60  ;;  %18620 = vmatprep.mubr.f32.mxu0 %v23540_v52 }
 0xb16   :  { %20278 = vmatprep.subr.bf16.mxu0 %v20277_v12 }
 0xb18   :  { %18621 = vmatmul.mubr.f32.gmra.mrb[14].mxu0 %v23541_v44 }
 0xb19   :  { %18627 = vmatprep.mubr.f32.mxu0 %v23542_v5 }
 0xb1c   :  { %18628 = vmatmul.mubr.f32.vlgmr.msra.gmra.mrb[12].mxu0 %v23543_v26 }
 0xb1d   :  { %20280 = vmatpush3.bf16.msra.mxu0 %v20277_v12  ;;  %18630 = vmatprep.mubr.f32.mxu0 %v23544_v36 }
 0xb1e   :  { %20282 = vmatprep.subr.bf16.mxu0 %v20261_v60 }
 0xb20   :  { %18631 = vmatmul.mubr.f32.gmra.mrb[14].mxu0 %v23545_v0 }
 0xb21   :  { %18637 = vmatprep.mubr.f32.mxu0 %v22390_v58 }
 0xb24   :  { %18638 = vmatmul.mubr.f32.vlgmr.msra.gmra.mrb[12].mxu0 %v22405_v4 }
 0xb25   :  { %20284 = vmatpush3.bf16.msra.mxu0 %v20261_v60  ;;  %18640 = vmatprep.mubr.f32.mxu0 %v23536_v43 }
 0xb28   :  { %18641 = vmatmul.mubr.f32.gmra.mrb[14].mxu0 %v23537_v31 }
 0xb29   :  { %18647 = vmatprep.mubr.f32.mxu0 %v22390_v58 }
 0xb2c   :  { %18648 = vmatmul.mubr.f32.vlgmr.msra.gmra.mrb[12].mxu0 %v22405_v4 }
 0xb2d   :  { %18650 = vmatprep.mubr.f32.mxu0 %v23536_v43 }
 0xb30   :  { %18651 = vmatmul.mubr.f32.gmra.mrb[14].mxu0 %v23537_v31 }
 0xbff   :  { %v18649_v3 = vpop.f32.mrb[12].mxu0 }
 0xc00   :  { %v7718_v9 = vmax.f32 %v18649_v3, 0.0  ;;  %v7695_v19 = vpop.f32.mrb[13].mxu0 }
 0xc01   :  { %v7717_v40 = vmax.f32 %v7695_v19, 0.0 }
 0xc02   :  { %v7725_v8 = vand.u32 4294901760, %v7718_v9 }
 0xc03   :  { %v7722_v61 = vand.u32 4294901760, %v7717_v40  ;;  %v18652_v22 = vpop.f32.mrb[14].mxu0 }
 0xc04   :  { %v7819_v14 = vsub.f32 %v7718_v9, %v7725_v8  ;;  %v7720_v7 = vmax.f32 %v18652_v22, 0.0  ;;  %v7707_v32 = vpop.f32.mrb[15].mxu0  ;;  %v23547_v22 = vld [vmem:[#allocation54_spill] sm:$0xff] }
 0xc05   :  { %v20285_v13 = vpack.c.bf16 %v7725_v8, %v7722_v61  ;;  %v7812_v50 = vsub.f32 %v7717_v40, %v7722_v61  ;;  %v7719_v11 = vmax.f32 %v7707_v32, 0.0  ;;  %v23546_v8 = vld [vmem:[#allocation60_spill] sm:$0xff]  ;;  %v23549_v32 = vld [vmem:[#allocation55_spill] sm:$0xff] }
 0xc06   :  { %v7820_v56 = vand.u32 4294901760, %v7819_v14  ;;  %v7731_v55 = vand.u32 4294901760, %v7720_v7 }
 0xc07   :  { %v7813_v29 = vand.u32 4294901760, %v7812_v50  ;;  %v7728_v57 = vand.u32 4294901760, %v7719_v11  ;;  %20286 = vmatprep.subr.bf16.mxu1 %v20285_v13  ;;  %v20301_v41 = vpack.c.bf16 %v7819_v14, %v7812_v50 }
 0xc08   :  { %v7833_v30 = vsub.f32 %v7720_v7, %v7731_v55  ;;  %20288 = vmatpush3.bf16.msra.mxu1 %v20285_v13  ;;  %v7821_v60 = vsub.f32 %v7819_v14, %v7820_v56  ;;  %v23548_v7 = vld [vmem:[#allocation57_spill] sm:$0xff] }
 0xc09   :  { %v20289_v59 = vpack.c.bf16 %v7731_v55, %v7728_v57  ;;  %v7826_v6 = vsub.f32 %v7719_v11, %v7728_v57  ;;  %v7814_v10 = vsub.f32 %v7812_v50, %v7813_v29  ;;  %v20317_v47 = vpack.c.bf16 %v7820_v56, %v7813_v29  ;;  %v23550_v50 = vld [vmem:[#allocation58_spill] sm:$0xff]  ;;  %v23551_v11 = vld [vmem:[#allocation56_spill] sm:$0xff]  ;;  %v23552_v56 = vld [vmem:[#allocation59_spill] sm:$0xff] }
 0xc0a   :  { %v7834_v63 = vand.u32 4294901760, %v7833_v30  ;;  %v7822_v53 = vand.u32 4294901760, %v7821_v60  ;;  %v8257_v55 = vld [vmem:[#allocation17 + $0x40] sm:$0xff]  ;;  %v8258_v29 = vld [vmem:[#allocation17 + $0x48] sm:$0xff] }
 0xc0b   :  { %v7827_v18 = vand.u32 4294901760, %v7826_v6  ;;  %20290 = vmatprep.subr.bf16.mxu1 %v20289_v59  ;;  %v7815_v45 = vand.u32 4294901760, %v7814_v10  ;;  %v20305_v27 = vpack.c.bf16 %v7833_v30, %v7826_v6  ;;  %v8276_v57 = vand.u32 4294901760, %v8257_v55  ;;  %v8259_v10 = vld [vmem:[#allocation17 + $0x50] sm:$0xff] }
 0xc0c   :  { %20292 = vmatpush3.bf16.msra.mxu1 %v20289_v59  ;;  %v7835_v12 = vsub.f32 %v7833_v30, %v7834_v63 }
 0xc0d   :  { %v20293_v3 = vpack.c.bf16 %v7822_v53, %v7815_v45  ;;  %v7828_v9 = vsub.f32 %v7826_v6, %v7827_v18  ;;  %v20321_v19 = vpack.c.bf16 %v7834_v63, %v7827_v18  ;;  %v8366_v60 = vsub.f32 %v8257_v55, %v8276_v57 }
 0xc0e   :  { %v7836_v40 = vand.u32 4294901760, %v7835_v12  ;;  %v8282_v63 = vand.u32 4294901760, %v8259_v10 }
 0xc0f   :  { %18662 = vmatmul.mubr.f32.vlgmr.msra.gmra.mrb[12].mxu1 %v23546_v8  ;;  %20294 = vmatprep.subr.bf16.mxu1 %v20293_v3  ;;  %v7829_v61 = vand.u32 4294901760, %v7828_v9  ;;  %v8367_v53 = vand.u32 4294901760, %v8366_v60 }
 0xc10   :  { %20296 = vmatpush3.bf16.msra.mxu1 %v20293_v3  ;;  %18672 = vmatprep.mubr.f32.mxu1 %v23547_v22  ;;  %v8380_v12 = vsub.f32 %v8259_v10, %v8282_v63 }
 0xc11   :  { %v20297_v14 = vpack.c.bf16 %v7836_v40, %v7829_v61  ;;  %v8368_v45 = vsub.f32 %v8366_v60, %v8367_v53 }
 0xc12   :  { %v8381_v40 = vand.u32 4294901760, %v8380_v12 }
 0xc13   :  { %20298 = vmatprep.subr.bf16.mxu1 %v20297_v14  ;;  %v8369_v9 = vand.u32 4294901760, %v8368_v45 }
 0xc14   :  { %20300 = vmatpush3.bf16.msra.mxu1 %v20297_v14  ;;  %v8382_v55 = vsub.f32 %v8380_v12, %v8381_v40 }
 0xc15   :  { %20302 = vmatprep.subr.bf16.mxu1 %v20301_v41 }
 0xc17   :  { %18673 = vmatmul.mubr.f32.vlgmr.msra.gmra.mrb[12].mxu1 %v23548_v7 }
 0xc18   :  { %20304 = vmatpush3.bf16.msra.mxu1 %v20301_v41  ;;  %18683 = vmatprep.mubr.f32.mxu1 %v23549_v32  ;;  %v8279_v41 = vand.u32 4294901760, %v8258_v29 }
 0xc19   :  { %20306 = vmatprep.subr.bf16.mxu1 %v20305_v27 }
 0xc1a   :  { %v22869_v30 = vpack.c.bf16 %v8279_v41, %v8276_v57  ;;  %v8373_v6 = vsub.f32 %v8258_v29, %v8279_v41  ;;  %v8383_v57 = vand.u32 4294901760, %v8382_v55 }
 0xc1c   :  { %20308 = vmatpush3.bf16.msra.mxu1 %v20305_v27  ;;  %20334 = vmatprep.subr.bf16.mxu0 %v22869_v30  ;;  %v8374_v18 = vand.u32 4294901760, %v8373_v6 }
 0xc1d   :  { %20310 = vmatprep.subr.bf16.mxu1 %v20285_v13  ;;  %20336 = vmatpush3.bf16.msra.mxu0 %v22869_v30 }
 0xc1e   :  { %v8375_v27 = vsub.f32 %v8373_v6, %v8374_v18  ;;  %v20365_v32 = vpack.c.bf16 %v8374_v18, %v8367_v53 }
 0xc1f   :  { %18684 = vmatmul.mubr.f32.vlgmr.msra.gmra.mrb[12].mxu1 %v23550_v50 }
 0xc20   :  { %20312 = vmatpush3.bf16.msra.mxu1 %v20285_v13  ;;  %18694 = vmatprep.mubr.f32.mxu1 %v23551_v11  ;;  %v20349_v11 = vpack.c.bf16 %v8373_v6, %v8366_v60 }
 0xc21   :  { %20314 = vmatprep.subr.bf16.mxu1 %v20289_v59 }
 0xc24   :  { %20316 = vmatpush3.bf16.msra.mxu1 %v20289_v59 }
 0xc25   :  { %20318 = vmatprep.subr.bf16.mxu1 %v20317_v47 }
 0xc27   :  { %18695 = vmatmul.mubr.f32.vlgmr.msra.gmra.mrb[12].mxu1 %v23552_v56 }
 0xc28   :  { %20320 = vmatpush3.bf16.msra.mxu1 %v20317_v47  ;;  %18705 = vmatprep.mubr.f32.mxu1 %v23547_v22  ;;  %v8260_v47 = vld [vmem:[#allocation17 + $0x58] sm:$0xff] }
 0xc29   :  { %20322 = vmatprep.subr.bf16.mxu1 %v20321_v19 }
 0xc2c   :  { %20324 = vmatpush3.bf16.msra.mxu1 %v20321_v19  ;;  %v8376_v19 = vand.u32 4294901760, %v8375_v27 }
 0xc2d   :  { %20326 = vmatprep.subr.bf16.mxu1 %v20285_v13 }
 0xc2e   :  { %v20341_v14 = vpack.c.bf16 %v8376_v19, %v8369_v9 }
 0xc2f   :  { %18706 = vmatmul.mubr.f32.vlgmr.msra.gmra.mrb[12].mxu1 %v23548_v7 }
 0xc30   :  { %20328 = vmatpush3.bf16.msra.mxu1 %v20285_v13  ;;  %18716 = vmatprep.mubr.f32.mxu1 %v23547_v22  ;;  %v8285_v13 = vand.u32 4294901760, %v8260_v47 }
 0xc31   :  { %20330 = vmatprep.subr.bf16.mxu1 %v20289_v59 }
 0xc32   :  { %v8387_v3 = vsub.f32 %v8260_v47, %v8285_v13  ;;  %v8251_v47 = vstv %s8250_s12 }
 0xc33   :  { %v8252_v45 = vmul.f32 %v8251_v47, %v22829_v2 }
 0xc34   :  { %20332 = vmatpush3.bf16.msra.mxu1 %v20289_v59  ;;  %v22873_v59 = vpack.c.bf16 %v8285_v13, %v8282_v63  ;;  %v8388_v61 = vand.u32 4294901760, %v8387_v3  ;;  %v20353_v50 = vpack.c.bf16 %v8387_v3, %v8380_v12  ;;  %v8253_v63 = vmul.f32 %v8251_v47, %v22826_v35 }
 0xc36   :  { %20338 = vmatprep.subr.bf16.mxu0 %v22873_v59  ;;  %v8389_v29 = vsub.f32 %v8387_v3, %v8388_v61  ;;  %v20369_v10 = vpack.c.bf16 %v8388_v61, %v8381_v40 }
 0xc37   :  { %18717 = vmatmul.mubr.f32.vlgmr.msra.gmra.mrb[12].mxu1 %v23548_v7  ;;  %20340 = vmatpush3.bf16.msra.mxu0 %v22873_v59 }
 0xc38   :  { %20342 = vmatprep.subr.bf16.mxu0 %v20341_v14  ;;  %v8390_v41 = vand.u32 4294901760, %v8389_v29 }
 0xc3a   :  { %v20345_v56 = vpack.c.bf16 %v8390_v41, %v8383_v57  ;;  %v8808_v41 = vld [vmem:[#allocation20 + $0x90] sm:$0xff] }
 0xc3b   :  { %v8835_v47 = vand.u32 4294901760, %v8808_v41 }
 0xd0a   :  { %v18718_v13 = vpop.f32.mrb[12].mxu1 }
 0xd0b   :  { %v8255_v27 = vadd.f32 %v18718_v13, %v8253_v63  ;;  %v8239_v9 = vpop.f32.mrb[13].mxu1  ;;  %v8811_v13 = vld [vmem:[#allocation20 + $0xa8] sm:$0xff] }
 0xd0c   :  { %v8254_v19 = vadd.f32 %v8252_v45, %v8239_v9 }
 0xd0d   :  { %v8273_v7 = vsel %vm1991_vm3, %v8255_v27, 0  ;;  %v8844_v27 = vand.u32 4294901760, %v8811_v13 }
 0xd0e   :  { %v8354_v55 = vand.u32 4294901760, %v8273_v7  ;;  %v8270_v29 = vsel %vm1991_vm3, %v8254_v19, 0 }
 0xd0f   :  { %v8344_v60 = vand.u32 4294901760, %v8270_v29  ;;  %v8958_v36 = vsub.f32 %v8811_v13, %v8844_v27 }
 0xd10   :  { %v8355_v6 = vsub.f32 %v8273_v7, %v8354_v55  ;;  %v23553_v7 = vld [vmem:[#allocation43_spill] sm:$0xff] }
 0xd11   :  { %v8345_v53 = vsub.f32 %v8270_v29, %v8344_v60  ;;  %v8812_v29 = vld [vmem:[#allocation20 + $0xb0] sm:$0xff] }
 0xd12   :  { %v8356_v18 = vand.u32 4294901760, %v8355_v6 }
 0xd13   :  { %v8346_v12 = vand.u32 4294901760, %v8345_v53 }
 0xd14   :  { %v8357_v3 = vsub.f32 %v8355_v6, %v8356_v18 }
 0xd15   :  { %v8347_v40 = vsub.f32 %v8345_v53, %v8346_v12 }
 0xd16   :  { %v8358_v57 = vand.u32 4294901760, %v8357_v3 }
 0xd17   :  { %v8348_v61 = vand.u32 4294901760, %v8347_v40 }
 0xd19   :  { %18727 = vmatprep.mubr.f32.mxu0 %v8348_v61 }
 0xd1a   :  { %18728 = vmatmul.mubr.f32.vlgmr.msra.gmra.mrb[16].mxu0 %v8358_v57  ;;  %v8937_v57 = vsub.f32 %v8808_v41, %v8835_v47  ;;  %v8959_v41 = vand.u32 4294901760, %v8958_v36 }
 0xd1b   :  { %20344 = vmatpush3.bf16.msra.mxu0 %v20341_v14  ;;  %18738 = vmatprep.mubr.f32.mxu0 %v8344_v60 }
 0xd1c   :  { %20346 = vmatprep.subr.bf16.mxu0 %v20345_v56 }
 0xd1f   :  { %20348 = vmatpush3.bf16.msra.mxu0 %v20345_v56 }
 0xd20   :  { %20350 = vmatprep.subr.bf16.mxu0 %v20349_v11 }
 0xd22   :  { %18739 = vmatmul.mubr.f32.vlgmr.msra.gmra.mrb[16].mxu0 %v8354_v55 }
 0xd23   :  { %20352 = vmatpush3.bf16.msra.mxu0 %v20349_v11  ;;  %18749 = vmatprep.mubr.f32.mxu0 %v8345_v53  ;;  %v8807_v11 = vld [vmem:[#allocation20 + $0x88] sm:$0xff] }
 0xd24   :  { %20354 = vmatprep.subr.bf16.mxu0 %v20353_v50 }
 0xd27   :  { %20356 = vmatpush3.bf16.msra.mxu0 %v20353_v50  ;;  %v8806_v50 = vld [vmem:[#allocation20 + $0x80] sm:$0xff] }
 0xd28   :  { %20358 = vmatprep.subr.bf16.mxu0 %v22869_v30  ;;  %v8829_v56 = vand.u32 4294901760, %v8806_v50 }
 0xd2a   :  { %18750 = vmatmul.mubr.f32.vlgmr.msra.gmra.mrb[16].mxu0 %v8355_v6  ;;  %v8923_v19 = vsub.f32 %v8806_v50, %v8829_v56  ;;  %v8847_v6 = vand.u32 4294901760, %v8812_v29 }
 0xd2b   :  { %20360 = vmatpush3.bf16.msra.mxu0 %v22869_v30  ;;  %18760 = vmatprep.mubr.f32.mxu0 %v8346_v12 }
 0xd2c   :  { %20362 = vmatprep.subr.bf16.mxu0 %v22873_v59 }
 0xd2f   :  { %20364 = vmatpush3.bf16.msra.mxu0 %v22873_v59 }
 0xd30   :  { %20366 = vmatprep.subr.bf16.mxu0 %v20365_v32 }
 0xd32   :  { %18761 = vmatmul.mubr.f32.vlgmr.msra.gmra.mrb[16].mxu0 %v8356_v18  ;;  %v8924_v18 = vand.u32 4294901760, %v8923_v19 }
 0xd33   :  { %20368 = vmatpush3.bf16.msra.mxu0 %v20365_v32  ;;  %18771 = vmatprep.mubr.f32.mxu0 %v8344_v60  ;;  %v8832_v32 = vand.u32 4294901760, %v8807_v11 }
 0xd34   :  { %20370 = vmatprep.subr.bf16.mxu0 %v20369_v10  ;;  %v8925_v40 = vsub.f32 %v8923_v19, %v8924_v18 }
 0xd35   :  { %v22890_v14 = vpack.c.bf16 %v8832_v32, %v8829_v56  ;;  %v8938_v56 = vand.u32 4294901760, %v8937_v57 }
 0xd36   :  { %v8926_v50 = vand.u32 4294901760, %v8925_v40  ;;  %v8965_v40 = vsub.f32 %v8812_v29, %v8847_v6 }
 0xd37   :  { %20372 = vmatpush3.bf16.msra.mxu0 %v20369_v10  ;;  %v8809_v10 = vld [vmem:[#allocation20 + $0x98] sm:$0xff]  ;;  %20382 = vmatprep.subr.bf16.mxu1 %v22890_v14  ;;  %v8939_v8 = vsub.f32 %v8937_v57, %v8938_v56 }
 0xd38   :  { %20374 = vmatprep.subr.bf16.mxu0 %v22869_v30  ;;  %20384 = vmatpush3.bf16.msra.mxu1 %v22890_v14 }
 0xd39   :  { %v8940_v5 = vand.u32 4294901760, %v8939_v8 }
 0xd3a   :  { %18772 = vmatmul.mubr.f32.vlgmr.msra.gmra.mrb[16].mxu0 %v8354_v55 }
 0xd3b   :  { %20376 = vmatpush3.bf16.msra.mxu0 %v22869_v30  ;;  %18782 = vmatprep.mubr.f32.mxu0 %v8344_v60  ;;  %v8838_v30 = vand.u32 4294901760, %v8809_v10  ;;  %v8813_v60 = vld [vmem:[#allocation20 + $0xb8] sm:$0xff] }
 0xd3c   :  { %20378 = vmatprep.subr.bf16.mxu0 %v22873_v59  ;;  %v8850_v53 = vand.u32 4294901760, %v8813_v60 }
 0xd3d   :  { %v22894_v63 = vpack.c.bf16 %v8838_v30, %v8835_v47 }
 0xd3e   :  { %v22902_v3 = vpack.c.bf16 %v8850_v53, %v8847_v6 }
 0xd3f   :  { %20380 = vmatpush3.bf16.msra.mxu0 %v22873_v59  ;;  %v8810_v59 = vld [vmem:[#allocation20 + $0xa0] sm:$0xff]  ;;  %20386 = vmatprep.subr.bf16.mxu1 %v22894_v63 }
 0xd40   :  { %v8841_v45 = vand.u32 4294901760, %v8810_v59  ;;  %20388 = vmatpush3.bf16.msra.mxu1 %v22894_v63 }
 0xd42   :  { %18783 = vmatmul.mubr.f32.vlgmr.msra.gmra.mrb[16].mxu0 %v8354_v55  ;;  %v22898_v9 = vpack.c.bf16 %v8844_v27, %v8841_v45  ;;  %v8930_v55 = vsub.f32 %v8807_v11, %v8832_v32  ;;  %v8951_v0 = vsub.f32 %v8810_v59, %v8841_v45 }
 0xd43   :  { %18901 = vmatprep.mubr.f32.mxu0 %v23553_v7  ;;  %v8944_v7 = vsub.f32 %v8809_v10, %v8838_v30  ;;  %v8960_v30 = vsub.f32 %v8958_v36, %v8959_v41 }
 0xd44   :  { %20390 = vmatprep.subr.bf16.mxu1 %v22898_v9  ;;  %v8931_v12 = vand.u32 4294901760, %v8930_v55  ;;  %v8952_v44 = vand.u32 4294901760, %v8951_v0  ;;  %v22915_v43 = vpack.c.bf16 %v8930_v55, %v8923_v19  ;;  %v22919_v29 = vpack.c.bf16 %v8958_v36, %v8951_v0 }
 0xd45   :  { %20392 = vmatpush3.bf16.msra.mxu1 %v22898_v9  ;;  %v8945_v32 = vand.u32 4294901760, %v8944_v7  ;;  %v8961_v48 = vand.u32 4294901760, %v8960_v30 }
 0xd46   :  { %v8932_v61 = vsub.f32 %v8930_v55, %v8931_v12  ;;  %20394 = vmatprep.subr.bf16.mxu1 %v22902_v3  ;;  %v8953_v47 = vsub.f32 %v8951_v0, %v8952_v44 }
 0xd47   :  { %v8946_v26 = vsub.f32 %v8944_v7, %v8945_v32  ;;  %v22925_v6 = vpack.c.bf16 %v8945_v32, %v8938_v56 }
 0xd48   :  { %v8933_v11 = vand.u32 4294901760, %v8932_v61  ;;  %v8972_v61 = vsub.f32 %v8813_v60, %v8850_v53  ;;  %v8954_v21 = vand.u32 4294901760, %v8953_v47  ;;  %v22923_v60 = vpack.c.bf16 %v8931_v12, %v8924_v18  ;;  %v9413_v53 = vld [vmem:[#allocation15 + $0xc] sm:$0xf] }
 0xd49   :  { %20396 = vmatpush3.bf16.msra.mxu1 %v22902_v3  ;;  %v8947_v10 = vand.u32 4294901760, %v8946_v26  ;;  %v22917_v26 = vpack.c.bf16 %v8944_v7, %v8937_v57 }
 0xd4a   :  { %v22906_v22 = vpack.c.bf16 %v8933_v11, %v8926_v50  ;;  %v8966_v50 = vand.u32 4294901760, %v8965_v40  ;;  %v8973_v11 = vand.u32 4294901760, %v8972_v61  ;;  %v22911_v31 = vpack.c.bf16 %v8961_v48, %v8954_v21 }
 0xd4b   :  { %v22909_v52 = vpack.c.bf16 %v8947_v10, %v8940_v5  ;;  %v22921_v5 = vpack.c.bf16 %v8972_v61, %v8965_v40  ;;  %v22927_v48 = vpack.c.bf16 %v8959_v41, %v8952_v44  ;;  %v9415_v10 = vsel %vm292_vm0, %v9413_v53, 0  ;;  %v16687_v44 = vld [vmem:[#allocation18 + $0x2] ss:$0 sm:$0xff] }
 0xd4c   :  { %20398 = vmatprep.subr.bf16.mxu1 %v22906_v22  ;;  %v8967_v59 = vsub.f32 %v8965_v40, %v8966_v50  ;;  %v8974_v13 = vsub.f32 %v8972_v61, %v8973_v11  ;;  %v22929_v21 = vpack.c.bf16 %v8973_v11, %v8966_v50  ;;  %v9418_v47 = vand.u32 4294901760, %v9415_v10 }
 0xd4e   :  { %v8968_v45 = vand.u32 4294901760, %v8967_v59  ;;  %v8975_v27 = vand.u32 4294901760, %v8974_v13  ;;  %18899 = vmatprep.subr.mxu0 %v9418_v47  ;;  %v9525_v19 = vsub.f32 %v9415_v10, %v9418_v47 }
 0xd4f   :  { %18900 = vmatpush3.msra.mxu0 %v9418_v47 }
 0xd50   :  { %v22913_v8 = vpack.c.bf16 %v8975_v27, %v8968_v45  ;;  %18902 = vmatmul.mubr.f32.vlgmr.msra.gmra.mrb[18].mxu0 %v22342_v49  ;;  %v9526_v36 = vand.u32 4294901760, %v9525_v19 }
 0xd51   :  { %18904 = vmatprep.mubr.f32.mxu0 %v22344_v51 }
 0xd52   :  { %v9527_v0 = vsub.f32 %v9525_v19, %v9526_v36 }
 0xd54   :  { %18905 = vmatmul.mubr.f32.gmra.mrb[20].mxu0 %v22348_v54  ;;  %v9528_v7 = vand.u32 4294901760, %v9527_v0 }
 0xd55   :  { %18909 = vmatprep.mubr.f32.mxu0 %v22279_v15 }
 0xd56   :  { %18907 = vmatprep.subr.mxu0 %v9528_v7 }
 0xd57   :  { %18908 = vmatpush3.msra.mxu0 %v9528_v7  ;;  %v23554_v7 = vld [vmem:[#allocation46_spill] sm:$0xff] }
 0xd58   :  { %18910 = vmatmul.mubr.f32.vlgmr.msra.gmra.mrb[18].mxu0 %v22281_v16  ;;  %18915 = vmatprep.subr.mxu0 %v9525_v19 }
 0xd59   :  { %18912 = vmatprep.mubr.f32.mxu0 %v22283_v17  ;;  %18916 = vmatpush3.msra.mxu0 %v9525_v19 }
 0xd5a   :  { %18923 = vmatprep.subr.mxu0 %v9418_v47 }
 0xd5c   :  { %18913 = vmatmul.mubr.f32.gmra.mrb[20].mxu0 %v22289_v20 }
 0xd5d   :  { %18917 = vmatprep.mubr.f32.mxu0 %v22295_v23 }
 0xd60   :  { %18918 = vmatmul.mubr.f32.vlgmr.msra.gmra.mrb[18].mxu0 %v22298_v24 }
 0xd61   :  { %18920 = vmatprep.mubr.f32.mxu0 %v22301_v25  ;;  %18924 = vmatpush3.msra.mxu0 %v9418_v47 }
 0xd62   :  { %18931 = vmatprep.subr.mxu0 %v9526_v36 }
 0xd64   :  { %18921 = vmatmul.mubr.f32.gmra.mrb[20].mxu0 %v22307_v28 }
 0xd65   :  { %18925 = vmatprep.mubr.f32.mxu0 %v22316_v33 }
 0xd68   :  { %18926 = vmatmul.mubr.f32.vlgmr.msra.gmra.mrb[18].mxu0 %v22319_v34 }
 0xd69   :  { %18928 = vmatprep.mubr.f32.mxu0 %v22324_v37  ;;  %18932 = vmatpush3.msra.mxu0 %v9526_v36 }
 0xd6a   :  { %18939 = vmatprep.subr.mxu0 %v9418_v47 }
 0xd6c   :  { %18929 = vmatmul.mubr.f32.gmra.mrb[20].mxu0 %v22327_v38 }
 0xd6d   :  { %18933 = vmatprep.mubr.f32.mxu0 %v22279_v15 }
 0xd70   :  { %18934 = vmatmul.mubr.f32.vlgmr.msra.gmra.mrb[18].mxu0 %v22281_v16 }
 0xd71   :  { %18936 = vmatprep.mubr.f32.mxu0 %v22283_v17  ;;  %18940 = vmatpush3.msra.mxu0 %v9418_v47 }
 0xd74   :  { %18937 = vmatmul.mubr.f32.gmra.mrb[20].mxu0 %v22289_v20 }
 0xd75   :  { %18941 = vmatprep.mubr.f32.mxu0 %v22279_v15 }
 0xd78   :  { %18942 = vmatmul.mubr.f32.vlgmr.msra.gmra.mrb[18].mxu0 %v22281_v16 }
 0xd79   :  { %18944 = vmatprep.mubr.f32.mxu0 %v22283_v17 }
 0xd7c   :  { %18945 = vmatmul.mubr.f32.gmra.mrb[20].mxu0 %v22289_v20 }
 0xd7d   :  { %18951 = vmatprep.mubr.f32.mxu0 %v22400_v62 }
 0xe15   :  { %v18784_v55 = vpop.f32.mrb[16].mxu0 }
 0xe16   :  { %v21047_v18 = vadd.f32 %v18784_v55, %v16687_v44  ;;  %v8793_v12 = vpop.f32.mrb[17].mxu0  ;;  %v23556_v55 = vld [vmem:[#allocation44_spill] sm:$0xff] }
 0xe17   :  { %v21048_v57 = vadd.f32 %v16687_v44, %v8793_v12  ;;  %v23555_v44 = vld [vmem:[#allocation48_spill] sm:$0xff] }
 0xe18   :  { %v8804_v56 = vmax.f32 %v21047_v18, 0.0  ;;  %v23557_v18 = vld [vmem:[#allocation47_spill] sm:$0xff] }
 0xe19   :  { %v8803_v32 = vmax.f32 %v21048_v57, 0.0  ;;  %v23558_v57 = vld [vmem:[#allocation49_spill] sm:$0xff] }
 0xe1a   :  { %v8826_v41 = vsel %vm3095_vm4, %v8804_v56, 0  ;;  %v23559_v56 = vld [vmem:[#allocation51_spill] sm:$0xff] }
 0xe1b   :  { %v22949_v30 = vand.u32 4294901760, %v8826_v41  ;;  %v8823_v40 = vsel %vm3095_vm4, %v8803_v32, 0  ;;  %v23560_v32 = vld [vmem:[#allocation45_spill] sm:$0xff] }
 0xe1c   :  { %v8901_v61 = vand.u32 4294901760, %v8823_v40 }
 0xe1d   :  { %v8912_v50 = vsub.f32 %v8826_v41, %v22949_v30  ;;  %v23561_v41 = vld [vmem:[#allocation50_spill] sm:$0xff] }
 0xe1e   :  { %v8902_v11 = vsub.f32 %v8823_v40, %v8901_v61  ;;  %v23563_v40 = vld [vmem:[#allocation53_spill] sm:$0xff] }
 0xe1f   :  { %v8913_v59 = vand.u32 4294901760, %v8912_v50 }
 0xe20   :  { %v8903_v13 = vand.u32 4294901760, %v8902_v11 }
 0xe21   :  { %v8914_v45 = vsub.f32 %v8912_v50, %v8913_v59 }
 0xe22   :  { %v8904_v27 = vsub.f32 %v8902_v11, %v8903_v13 }
 0xe23   :  { %v8915_v10 = vand.u32 4294901760, %v8914_v45 }
 0xe24   :  { %v8905_v53 = vand.u32 4294901760, %v8904_v27 }
 0xe26   :  { %18801 = vmatprep.mubr.f32.mxu1 %v8905_v53 }
 0xe27   :  { %18802 = vmatmul.mubr.f32.vlgmr.msra.gmra.mrb[14].mxu1 %v8915_v10 }
 0xe28   :  { %20400 = vmatpush3.bf16.msra.mxu1 %v22906_v22  ;;  %18820 = vmatprep.mubr.f32.mxu1 %v8901_v61 }
 0xe29   :  { %20402 = vmatprep.subr.bf16.mxu1 %v22909_v52 }
 0xe2c   :  { %20404 = vmatpush3.bf16.msra.mxu1 %v22909_v52 }
 0xe2d   :  { %20406 = vmatprep.subr.bf16.mxu1 %v22911_v31 }
 0xe30   :  { %20408 = vmatpush3.bf16.msra.mxu1 %v22911_v31 }
 0xe31   :  { %20410 = vmatprep.subr.bf16.mxu1 %v22913_v8 }
 0xe34   :  { %20412 = vmatpush3.bf16.msra.mxu1 %v22913_v8 }
 0xe35   :  { %20414 = vmatprep.subr.bf16.mxu1 %v22915_v43 }
 0xe37   :  { %18821 = vmatmul.mubr.f32.vlgmr.msra.gmra.mrb[14].mxu1 %v22949_v30 }
 0xe38   :  { %20416 = vmatpush3.bf16.msra.mxu1 %v22915_v43  ;;  %18839 = vmatprep.mubr.f32.mxu1 %v8902_v11  ;;  %v16688_v43 = vld [vmem:[#allocation21 + $0x2] ss:$0 sm:$0xff] }
 0xe39   :  { %20418 = vmatprep.subr.bf16.mxu1 %v22917_v26 }
 0xe3c   :  { %20420 = vmatpush3.bf16.msra.mxu1 %v22917_v26 }
 0xe3d   :  { %20422 = vmatprep.subr.bf16.mxu1 %v22919_v29 }
 0xe40   :  { %20424 = vmatpush3.bf16.msra.mxu1 %v22919_v29 }
 0xe41   :  { %20426 = vmatprep.subr.bf16.mxu1 %v22921_v5 }
 0xe44   :  { %20428 = vmatpush3.bf16.msra.mxu1 %v22921_v5 }
 0xe45   :  { %20430 = vmatprep.subr.bf16.mxu1 %v22890_v14 }
 0xe47   :  { %18840 = vmatmul.mubr.f32.vlgmr.msra.gmra.mrb[14].mxu1 %v8912_v50 }
 0xe48   :  { %20432 = vmatpush3.bf16.msra.mxu1 %v22890_v14  ;;  %18858 = vmatprep.mubr.f32.mxu1 %v8903_v13 }
 0xe49   :  { %20434 = vmatprep.subr.bf16.mxu1 %v22894_v63 }
 0xe4c   :  { %20436 = vmatpush3.bf16.msra.mxu1 %v22894_v63 }
 0xe4d   :  { %20438 = vmatprep.subr.bf16.mxu1 %v22898_v9 }
 0xe50   :  { %20440 = vmatpush3.bf16.msra.mxu1 %v22898_v9 }
 0xe51   :  { %20442 = vmatprep.subr.bf16.mxu1 %v22902_v3 }
 0xe54   :  { %20444 = vmatpush3.bf16.msra.mxu1 %v22902_v3 }
 0xe55   :  { %20446 = vmatprep.subr.bf16.mxu1 %v22923_v60 }
 0xe57   :  { %18859 = vmatmul.mubr.f32.vlgmr.msra.gmra.mrb[14].mxu1 %v8913_v59 }
 0xe58   :  { %20448 = vmatpush3.bf16.msra.mxu1 %v22923_v60  ;;  %18877 = vmatprep.mubr.f32.mxu1 %v8901_v61 }
 0xe59   :  { %20450 = vmatprep.subr.bf16.mxu1 %v22925_v6 }
 0xe5c   :  { %20452 = vmatpush3.bf16.msra.mxu1 %v22925_v6 }
 0xe5d   :  { %20454 = vmatprep.subr.bf16.mxu1 %v22927_v48 }
 0xe60   :  { %20456 = vmatpush3.bf16.msra.mxu1 %v22927_v48 }
 0xe61   :  { %20458 = vmatprep.subr.bf16.mxu1 %v22929_v21 }
 0xe64   :  { %20460 = vmatpush3.bf16.msra.mxu1 %v22929_v21 }
 0xe65   :  { %20462 = vmatprep.subr.bf16.mxu1 %v22890_v14 }
 0xe67   :  { %18878 = vmatmul.mubr.f32.vlgmr.msra.gmra.mrb[14].mxu1 %v22949_v30 }
 0xe68   :  { %20464 = vmatpush3.bf16.msra.mxu1 %v22890_v14  ;;  %18896 = vmatprep.mubr.f32.mxu1 %v8901_v61 }
 0xe69   :  { %20466 = vmatprep.subr.bf16.mxu1 %v22894_v63 }
 0xe6c   :  { %20468 = vmatpush3.bf16.msra.mxu1 %v22894_v63 }
 0xe6d   :  { %20470 = vmatprep.subr.bf16.mxu1 %v22898_v9 }
 0xe70   :  { %20472 = vmatpush3.bf16.msra.mxu1 %v22898_v9 }
 0xe71   :  { %20474 = vmatprep.subr.bf16.mxu1 %v22902_v3 }
 0xe74   :  { %20476 = vmatpush3.bf16.msra.mxu1 %v22902_v3 }
 0xe77   :  { %18897 = vmatmul.mubr.f32.vlgmr.msra.gmra.mrb[14].mxu1 %v22949_v30  ;;  %v23562_v30 = vld [vmem:[#allocation52_spill] sm:$0xff] }
 0xe78   :  { %19015 = vmatprep.mubr.f32.mxu1 %v22485_v1 }
 0xf4a   :  { %v18898_v31 = vpop.f32.mrb[14].mxu1 }
 0xf4b   :  { %v21049_v52 = vadd.f32 %v18898_v31, %v16688_v43  ;;  %v9398_v22 = vpop.f32.mrb[15].mxu1 }
 0xf4c   :  { %v21050_v14 = vadd.f32 %v16688_v43, %v9398_v22 }
 0xf4d   :  { %v9409_v8 = vmax.f32 %v21049_v52, 0.0 }
 0xf4e   :  { %v9408_v26 = vmax.f32 %v21050_v14, 0.0 }
 0xf4f   :  { %v23005_v63 = vadd.f32 %v9409_v8, %v22826_v35 }
 0xf50   :  { %v23008_v9 = vadd.f32 %v9408_v26, %v22829_v2 }
 0xf51   :  { %v9996_v29 = vand.u32 4294901760, %v23005_v63 }
 0xf52   :  { %v9993_v3 = vand.u32 4294901760, %v23008_v9 }
 0xf53   :  { %v10108_v5 = vsub.f32 %v23005_v63, %v9996_v29 }
 0xf54   :  { %v20477_v60 = vpack.c.bf16 %v9996_v29, %v9993_v3  ;;  %v10101_v6 = vsub.f32 %v23008_v9, %v9993_v3 }
 0xf55   :  { %v10109_v48 = vand.u32 4294901760, %v10108_v5 }
 0xf56   :  { %20478 = vmatprep.subr.bf16.mxu0 %v20477_v60  ;;  %v10102_v21 = vand.u32 4294901760, %v10101_v6  ;;  %v20485_v0 = vpack.c.bf16 %v10108_v5, %v10101_v6 }
 0xf57   :  { %20480 = vmatpush3.bf16.msra.mxu0 %v20477_v60  ;;  %v10110_v47 = vsub.f32 %v10108_v5, %v10109_v48 }
 0xf58   :  { %v10103_v19 = vsub.f32 %v10101_v6, %v10102_v21  ;;  %v20493_v12 = vpack.c.bf16 %v10109_v48, %v10102_v21 }
 0xf59   :  { %v10111_v35 = vand.u32 4294901760, %v10110_v47 }
 0xf5a   :  { %18952 = vmatmul.mubr.f32.vlgmr.msra.gmra.mrb[18].mxu0 %v22442_v39  ;;  %v10104_v2 = vand.u32 4294901760, %v10103_v19 }
 0xf5b   :  { %18954 = vmatprep.mubr.f32.mxu0 %v22446_v42 }
 0xf5c   :  { %v20481_v36 = vpack.c.bf16 %v10111_v35, %v10104_v2 }
 0xf5e   :  { %18955 = vmatmul.mubr.f32.gmra.mrb[20].mxu0 %v22449_v46  ;;  %20482 = vmatprep.subr.bf16.mxu0 %v20481_v36 }
 0xf5f   :  { %20484 = vmatpush3.bf16.msra.mxu0 %v20481_v36  ;;  %18961 = vmatprep.mubr.f32.mxu0 %v22390_v58 }
 0xf60   :  { %20486 = vmatprep.subr.bf16.mxu0 %v20485_v0 }
 0xf62   :  { %18962 = vmatmul.mubr.f32.vlgmr.msra.gmra.mrb[18].mxu0 %v22405_v4 }
 0xf63   :  { %20488 = vmatpush3.bf16.msra.mxu0 %v20485_v0  ;;  %18964 = vmatprep.mubr.f32.mxu0 %v23554_v7 }
 0xf64   :  { %20490 = vmatprep.subr.bf16.mxu0 %v20477_v60 }
 0xf66   :  { %18965 = vmatmul.mubr.f32.gmra.mrb[20].mxu0 %v23555_v44 }
 0xf67   :  { %18971 = vmatprep.mubr.f32.mxu0 %v23556_v55 }
 0xf6a   :  { %18972 = vmatmul.mubr.f32.vlgmr.msra.gmra.mrb[18].mxu0 %v23557_v18 }
 0xf6b   :  { %20492 = vmatpush3.bf16.msra.mxu0 %v20477_v60  ;;  %18974 = vmatprep.mubr.f32.mxu0 %v23558_v57 }
 0xf6c   :  { %20494 = vmatprep.subr.bf16.mxu0 %v20493_v12 }
 0xf6e   :  { %18975 = vmatmul.mubr.f32.gmra.mrb[20].mxu0 %v23559_v56 }
 0xf6f   :  { %18981 = vmatprep.mubr.f32.mxu0 %v23560_v32 }
 0xf72   :  { %18982 = vmatmul.mubr.f32.vlgmr.msra.gmra.mrb[18].mxu0 %v23561_v41 }
 0xf73   :  { %20496 = vmatpush3.bf16.msra.mxu0 %v20493_v12  ;;  %18984 = vmatprep.mubr.f32.mxu0 %v23562_v30 }
 0xf74   :  { %20498 = vmatprep.subr.bf16.mxu0 %v20477_v60 }
 0xf76   :  { %18985 = vmatmul.mubr.f32.gmra.mrb[20].mxu0 %v23563_v40 }
 0xf77   :  { %18991 = vmatprep.mubr.f32.mxu0 %v22390_v58 }
 0xf7a   :  { %18992 = vmatmul.mubr.f32.vlgmr.msra.gmra.mrb[18].mxu0 %v22405_v4 }
 0xf7b   :  { %20500 = vmatpush3.bf16.msra.mxu0 %v20477_v60  ;;  %18994 = vmatprep.mubr.f32.mxu0 %v23554_v7 }
 0xf7e   :  { %18995 = vmatmul.mubr.f32.gmra.mrb[20].mxu0 %v23555_v44 }
 0xf7f   :  { %19001 = vmatprep.mubr.f32.mxu0 %v22390_v58 }
 0xf82   :  { %19002 = vmatmul.mubr.f32.vlgmr.msra.gmra.mrb[18].mxu0 %v22405_v4 }
 0xf83   :  { %19004 = vmatprep.mubr.f32.mxu0 %v23554_v7 }
 0xf86   :  { %19005 = vmatmul.mubr.f32.gmra.mrb[20].mxu0 %v23555_v44 }
0x1055   :  { %v19003_v61 = vpop.f32.mrb[18].mxu0 }
0x1056   :  { %v10581_v50 = vmax.f32 %v19003_v61, 0.0  ;;  %v10558_v11 = vpop.f32.mrb[19].mxu0 }
0x1057   :  { %v10580_v59 = vmax.f32 %v10558_v11, 0.0 }
0x1058   :  { %v10588_v13 = vand.u32 4294901760, %v10581_v50 }
0x1059   :  { %v10585_v45 = vand.u32 4294901760, %v10580_v59  ;;  %v19006_v27 = vpop.f32.mrb[20].mxu0 }
0x105a   :  { %v10682_v53 = vsub.f32 %v10581_v50, %v10588_v13  ;;  %v10583_v10 = vmax.f32 %v19006_v27, 0.0  ;;  %v10570_v43 = vpop.f32.mrb[21].mxu0  ;;  %v23565_v27 = vld [vmem:[#allocation54_spill] sm:$0xff] }
0x105b   :  { %v20501_v31 = vpack.c.bf16 %v10588_v13, %v10585_v45  ;;  %v10675_v52 = vsub.f32 %v10580_v59, %v10585_v45  ;;  %v10582_v22 = vmax.f32 %v10570_v43, 0.0  ;;  %v23564_v13 = vld [vmem:[#allocation60_spill] sm:$0xff]  ;;  %v23567_v43 = vld [vmem:[#allocation55_spill] sm:$0xff] }
0x105c   :  { %v10683_v14 = vand.u32 4294901760, %v10682_v53  ;;  %v10594_v8 = vand.u32 4294901760, %v10583_v10 }
0x105d   :  { %v10676_v26 = vand.u32 4294901760, %v10675_v52  ;;  %v10591_v29 = vand.u32 4294901760, %v10582_v22  ;;  %20502 = vmatprep.subr.bf16.mxu1 %v20501_v31  ;;  %v20517_v3 = vpack.c.bf16 %v10682_v53, %v10675_v52 }
0x105e   :  { %v10696_v5 = vsub.f32 %v10583_v10, %v10594_v8  ;;  %20504 = vmatpush3.bf16.msra.mxu1 %v20501_v31  ;;  %v10684_v60 = vsub.f32 %v10682_v53, %v10683_v14  ;;  %v23566_v10 = vld [vmem:[#allocation57_spill] sm:$0xff] }
0x105f   :  { %v20505_v6 = vpack.c.bf16 %v10594_v8, %v10591_v29  ;;  %v10689_v48 = vsub.f32 %v10582_v22, %v10591_v29  ;;  %v10677_v21 = vsub.f32 %v10675_v52, %v10676_v26  ;;  %v20533_v47 = vpack.c.bf16 %v10683_v14, %v10676_v26  ;;  %v23568_v52 = vld [vmem:[#allocation58_spill] sm:$0xff]  ;;  %v23569_v22 = vld [vmem:[#allocation56_spill] sm:$0xff]  ;;  %v23570_v14 = vld [vmem:[#allocation59_spill] sm:$0xff] }
0x1060   :  { %v10697_v19 = vand.u32 4294901760, %v10696_v5  ;;  %v10685_v35 = vand.u32 4294901760, %v10684_v60  ;;  %v11120_v8 = vld [vmem:[#allocation17 + $0x60] sm:$0xff]  ;;  %v11121_v26 = vld [vmem:[#allocation17 + $0x68] sm:$0xff] }
0x1061   :  { %v10690_v2 = vand.u32 4294901760, %v10689_v48  ;;  %20506 = vmatprep.subr.bf16.mxu1 %v20505_v6  ;;  %v10678_v36 = vand.u32 4294901760, %v10677_v21  ;;  %v20521_v0 = vpack.c.bf16 %v10696_v5, %v10689_v48  ;;  %v11139_v29 = vand.u32 4294901760, %v11120_v8  ;;  %v11122_v21 = vld [vmem:[#allocation17 + $0x70] sm:$0xff] }
0x1062   :  { %20508 = vmatpush3.bf16.msra.mxu1 %v20505_v6  ;;  %v10698_v12 = vsub.f32 %v10696_v5, %v10697_v19 }
0x1063   :  { %v20509_v61 = vpack.c.bf16 %v10685_v35, %v10678_v36  ;;  %v10691_v50 = vsub.f32 %v10689_v48, %v10690_v2  ;;  %v20537_v11 = vpack.c.bf16 %v10697_v19, %v10690_v2  ;;  %v11229_v60 = vsub.f32 %v11120_v8, %v11139_v29 }
0x1064   :  { %v10699_v59 = vand.u32 4294901760, %v10698_v12  ;;  %v11145_v19 = vand.u32 4294901760, %v11122_v21 }
0x1065   :  { %19016 = vmatmul.mubr.f32.vlgmr.msra.gmra.mrb[16].mxu1 %v23564_v13  ;;  %20510 = vmatprep.subr.bf16.mxu1 %v20509_v61  ;;  %v10692_v45 = vand.u32 4294901760, %v10691_v50  ;;  %v11230_v35 = vand.u32 4294901760, %v11229_v60 }
0x1066   :  { %20512 = vmatpush3.bf16.msra.mxu1 %v20509_v61  ;;  %19026 = vmatprep.mubr.f32.mxu1 %v23565_v27  ;;  %v11243_v12 = vsub.f32 %v11122_v21, %v11145_v19 }
0x1067   :  { %v20513_v53 = vpack.c.bf16 %v10699_v59, %v10692_v45  ;;  %v11231_v36 = vsub.f32 %v11229_v60, %v11230_v35 }
0x1068   :  { %v11244_v59 = vand.u32 4294901760, %v11243_v12 }
0x1069   :  { %20514 = vmatprep.subr.bf16.mxu1 %v20513_v53  ;;  %v11232_v50 = vand.u32 4294901760, %v11231_v36 }
0x106a   :  { %20516 = vmatpush3.bf16.msra.mxu1 %v20513_v53  ;;  %v11245_v8 = vsub.f32 %v11243_v12, %v11244_v59 }
0x106b   :  { %20518 = vmatprep.subr.bf16.mxu1 %v20517_v3 }
0x106d   :  { %19027 = vmatmul.mubr.f32.vlgmr.msra.gmra.mrb[16].mxu1 %v23566_v10 }
0x106e   :  { %20520 = vmatpush3.bf16.msra.mxu1 %v20517_v3  ;;  %19037 = vmatprep.mubr.f32.mxu1 %v23567_v43  ;;  %v11142_v3 = vand.u32 4294901760, %v11121_v26 }
0x106f   :  { %20522 = vmatprep.subr.bf16.mxu1 %v20521_v0 }
0x1070   :  { %v23048_v5 = vpack.c.bf16 %v11142_v3, %v11139_v29  ;;  %v11236_v48 = vsub.f32 %v11121_v26, %v11142_v3  ;;  %v11246_v29 = vand.u32 4294901760, %v11245_v8 }
0x1072   :  { %20524 = vmatpush3.bf16.msra.mxu1 %v20521_v0  ;;  %20550 = vmatprep.subr.bf16.mxu0 %v23048_v5  ;;  %v11237_v2 = vand.u32 4294901760, %v11236_v48 }
0x1073   :  { %20526 = vmatprep.subr.bf16.mxu1 %v20501_v31  ;;  %20552 = vmatpush3.bf16.msra.mxu0 %v23048_v5 }
0x1074   :  { %v11238_v0 = vsub.f32 %v11236_v48, %v11237_v2  ;;  %v20581_v43 = vpack.c.bf16 %v11237_v2, %v11230_v35 }
0x1075   :  { %19038 = vmatmul.mubr.f32.vlgmr.msra.gmra.mrb[16].mxu1 %v23568_v52 }
0x1076   :  { %20528 = vmatpush3.bf16.msra.mxu1 %v20501_v31  ;;  %19048 = vmatprep.mubr.f32.mxu1 %v23569_v22  ;;  %v20565_v22 = vpack.c.bf16 %v11236_v48, %v11229_v60 }
0x1077   :  { %20530 = vmatprep.subr.bf16.mxu1 %v20505_v6 }
0x107a   :  { %20532 = vmatpush3.bf16.msra.mxu1 %v20505_v6 }
0x107b   :  { %20534 = vmatprep.subr.bf16.mxu1 %v20533_v47 }
0x107d   :  { %19049 = vmatmul.mubr.f32.vlgmr.msra.gmra.mrb[16].mxu1 %v23570_v14 }
0x107e   :  { %20536 = vmatpush3.bf16.msra.mxu1 %v20533_v47  ;;  %19059 = vmatprep.mubr.f32.mxu1 %v23565_v27  ;;  %v11123_v47 = vld [vmem:[#allocation17 + $0x78] sm:$0xff] }
0x107f   :  { %20538 = vmatprep.subr.bf16.mxu1 %v20537_v11 }
0x1082   :  { %20540 = vmatpush3.bf16.msra.mxu1 %v20537_v11  ;;  %v11239_v11 = vand.u32 4294901760, %v11238_v0 }
0x1083   :  { %20542 = vmatprep.subr.bf16.mxu1 %v20501_v31 }
0x1084   :  { %v20557_v53 = vpack.c.bf16 %v11239_v11, %v11232_v50 }
0x1085   :  { %19060 = vmatmul.mubr.f32.vlgmr.msra.gmra.mrb[16].mxu1 %v23566_v10 }
0x1086   :  { %20544 = vmatpush3.bf16.msra.mxu1 %v20501_v31  ;;  %19070 = vmatprep.mubr.f32.mxu1 %v23565_v27  ;;  %v11148_v31 = vand.u32 4294901760, %v11123_v47 }
0x1087   :  { %20546 = vmatprep.subr.bf16.mxu1 %v20505_v6 }
0x1088   :  { %v11250_v61 = vsub.f32 %v11123_v47, %v11148_v31  ;;  %v11114_v47 = vstv %s11113_s4 }
0x1089   :  { %v11115_v36 = vmul.f32 %v11114_v47, %v23008_v9 }
0x108a   :  { %20548 = vmatpush3.bf16.msra.mxu1 %v20505_v6  ;;  %v23052_v6 = vpack.c.bf16 %v11148_v31, %v11145_v19  ;;  %v11251_v45 = vand.u32 4294901760, %v11250_v61  ;;  %v20569_v52 = vpack.c.bf16 %v11250_v61, %v11243_v12  ;;  %v11116_v19 = vmul.f32 %v11114_v47, %v23005_v63 }
0x108c   :  { %20554 = vmatprep.subr.bf16.mxu0 %v23052_v6  ;;  %v11252_v26 = vsub.f32 %v11250_v61, %v11251_v45  ;;  %v20585_v21 = vpack.c.bf16 %v11251_v45, %v11244_v59 }
0x108d   :  { %19071 = vmatmul.mubr.f32.vlgmr.msra.gmra.mrb[16].mxu1 %v23566_v10  ;;  %20556 = vmatpush3.bf16.msra.mxu0 %v23052_v6 }
0x108e   :  { %20558 = vmatprep.subr.bf16.mxu0 %v20557_v53  ;;  %v11253_v3 = vand.u32 4294901760, %v11252_v26 }
0x1090   :  { %v20561_v14 = vpack.c.bf16 %v11253_v3, %v11246_v29  ;;  %v11671_v3 = vld [vmem:[#allocation20 + $0xd0] sm:$0xff] }
0x1091   :  { %v11698_v47 = vand.u32 4294901760, %v11671_v3 }
0x1160   :  { %v19072_v31 = vpop.f32.mrb[16].mxu1 }
0x1161   :  { %v11118_v0 = vadd.f32 %v19072_v31, %v11116_v19  ;;  %v11102_v50 = vpop.f32.mrb[17].mxu1  ;;  %v11674_v31 = vld [vmem:[#allocation20 + $0xe8] sm:$0xff] }
0x1162   :  { %v11117_v11 = vadd.f32 %v11115_v36, %v11102_v50 }
0x1163   :  { %v11136_v10 = vsel %vm1991_vm3, %v11118_v0, 0  ;;  %v11707_v0 = vand.u32 4294901760, %v11674_v31 }
0x1164   :  { %v11217_v8 = vand.u32 4294901760, %v11136_v10  ;;  %v11133_v26 = vsel %vm1991_vm3, %v11117_v11, 0 }
0x1165   :  { %v11207_v60 = vand.u32 4294901760, %v11133_v26  ;;  %v11821_v30 = vsub.f32 %v11674_v31, %v11707_v0 }
0x1166   :  { %v11218_v48 = vsub.f32 %v11136_v10, %v11217_v8  ;;  %v23571_v10 = vld [vmem:[#allocation43_spill] sm:$0xff] }
0x1167   :  { %v11208_v35 = vsub.f32 %v11133_v26, %v11207_v60  ;;  %v11675_v26 = vld [vmem:[#allocation20 + $0xf0] sm:$0xff] }
0x1168   :  { %v11219_v2 = vand.u32 4294901760, %v11218_v48 }
0x1169   :  { %v11209_v12 = vand.u32 4294901760, %v11208_v35 }
0x116a   :  { %v11220_v61 = vsub.f32 %v11218_v48, %v11219_v2 }
0x116b   :  { %v11210_v59 = vsub.f32 %v11208_v35, %v11209_v12 }
0x116c   :  { %v11221_v29 = vand.u32 4294901760, %v11220_v61 }
0x116d   :  { %v11211_v45 = vand.u32 4294901760, %v11210_v59 }
0x116f   :  { %19081 = vmatprep.mubr.f32.mxu0 %v11211_v45 }
0x1170   :  { %19082 = vmatmul.mubr.f32.vlgmr.msra.gmra.mrb[22].mxu0 %v11221_v29  ;;  %v11800_v29 = vsub.f32 %v11671_v3, %v11698_v47  ;;  %v11822_v3 = vand.u32 4294901760, %v11821_v30 }
0x1171   :  { %20560 = vmatpush3.bf16.msra.mxu0 %v20557_v53  ;;  %19092 = vmatprep.mubr.f32.mxu0 %v11207_v60 }
0x1172   :  { %20562 = vmatprep.subr.bf16.mxu0 %v20561_v14 }
0x1175   :  { %20564 = vmatpush3.bf16.msra.mxu0 %v20561_v14 }
0x1176   :  { %20566 = vmatprep.subr.bf16.mxu0 %v20565_v22 }
0x1178   :  { %19093 = vmatmul.mubr.f32.vlgmr.msra.gmra.mrb[22].mxu0 %v11217_v8 }
0x1179   :  { %20568 = vmatpush3.bf16.msra.mxu0 %v20565_v22  ;;  %19103 = vmatprep.mubr.f32.mxu0 %v11208_v35  ;;  %v11670_v22 = vld [vmem:[#allocation20 + $0xc8] sm:$0xff] }
0x117a   :  { %20570 = vmatprep.subr.bf16.mxu0 %v20569_v52 }
0x117d   :  { %20572 = vmatpush3.bf16.msra.mxu0 %v20569_v52  ;;  %v11669_v52 = vld [vmem:[#allocation20 + $0xc0] sm:$0xff] }
0x117e   :  { %20574 = vmatprep.subr.bf16.mxu0 %v23048_v5  ;;  %v11692_v14 = vand.u32 4294901760, %v11669_v52 }
0x1180   :  { %19104 = vmatmul.mubr.f32.vlgmr.msra.gmra.mrb[22].mxu0 %v11218_v48  ;;  %v11786_v11 = vsub.f32 %v11669_v52, %v11692_v14  ;;  %v11710_v48 = vand.u32 4294901760, %v11675_v26 }
0x1181   :  { %20576 = vmatpush3.bf16.msra.mxu0 %v23048_v5  ;;  %19114 = vmatprep.mubr.f32.mxu0 %v11209_v12 }
0x1182   :  { %20578 = vmatprep.subr.bf16.mxu0 %v23052_v6 }
0x1185   :  { %20580 = vmatpush3.bf16.msra.mxu0 %v23052_v6 }
0x1186   :  { %20582 = vmatprep.subr.bf16.mxu0 %v20581_v43 }
0x1188   :  { %19115 = vmatmul.mubr.f32.vlgmr.msra.gmra.mrb[22].mxu0 %v11219_v2  ;;  %v11787_v2 = vand.u32 4294901760, %v11786_v11 }
0x1189   :  { %20584 = vmatpush3.bf16.msra.mxu0 %v20581_v43  ;;  %19125 = vmatprep.mubr.f32.mxu0 %v11207_v60  ;;  %v11695_v43 = vand.u32 4294901760, %v11670_v22 }
0x118a   :  { %20586 = vmatprep.subr.bf16.mxu0 %v20585_v21  ;;  %v11788_v59 = vsub.f32 %v11786_v11, %v11787_v2 }
0x118b   :  { %v23069_v53 = vpack.c.bf16 %v11695_v43, %v11692_v14  ;;  %v11801_v14 = vand.u32 4294901760, %v11800_v29 }
0x118c   :  { %v11789_v52 = vand.u32 4294901760, %v11788_v59  ;;  %v11828_v59 = vsub.f32 %v11675_v26, %v11710_v48 }
0x118d   :  { %20588 = vmatpush3.bf16.msra.mxu0 %v20585_v21  ;;  %v11672_v21 = vld [vmem:[#allocation20 + $0xd8] sm:$0xff]  ;;  %20598 = vmatprep.subr.bf16.mxu1 %v23069_v53  ;;  %v11802_v13 = vsub.f32 %v11800_v29, %v11801_v14 }
0x118e   :  { %20590 = vmatprep.subr.bf16.mxu0 %v23048_v5  ;;  %20600 = vmatpush3.bf16.msra.mxu1 %v23069_v53 }
0x118f   :  { %v11803_v32 = vand.u32 4294901760, %v11802_v13 }
0x1190   :  { %19126 = vmatmul.mubr.f32.vlgmr.msra.gmra.mrb[22].mxu0 %v11217_v8 }
0x1191   :  { %20592 = vmatpush3.bf16.msra.mxu0 %v23048_v5  ;;  %19136 = vmatprep.mubr.f32.mxu0 %v11207_v60  ;;  %v11701_v5 = vand.u32 4294901760, %v11672_v21  ;;  %v11676_v60 = vld [vmem:[#allocation20 + $0xf8] sm:$0xff] }
0x1192   :  { %20594 = vmatprep.subr.bf16.mxu0 %v23052_v6  ;;  %v11713_v35 = vand.u32 4294901760, %v11676_v60 }
0x1193   :  { %v23073_v19 = vpack.c.bf16 %v11701_v5, %v11698_v47 }
0x1194   :  { %v23081_v61 = vpack.c.bf16 %v11713_v35, %v11710_v48 }
0x1195   :  { %20596 = vmatpush3.bf16.msra.mxu0 %v23052_v6  ;;  %v11673_v6 = vld [vmem:[#allocation20 + $0xe0] sm:$0xff]  ;;  %20602 = vmatprep.subr.bf16.mxu1 %v23073_v19 }
0x1196   :  { %v11704_v36 = vand.u32 4294901760, %v11673_v6  ;;  %20604 = vmatpush3.bf16.msra.mxu1 %v23073_v19 }
0x1198   :  { %19137 = vmatmul.mubr.f32.vlgmr.msra.gmra.mrb[22].mxu0 %v11217_v8  ;;  %v23077_v50 = vpack.c.bf16 %v11707_v0, %v11704_v36  ;;  %v11793_v8 = vsub.f32 %v11670_v22, %v11695_v43  ;;  %v11814_v40 = vsub.f32 %v11673_v6, %v11704_v36 }
0x1199   :  { %19255 = vmatprep.mubr.f32.mxu0 %v23571_v10  ;;  %v11807_v10 = vsub.f32 %v11672_v21, %v11701_v5  ;;  %v11823_v5 = vsub.f32 %v11821_v30, %v11822_v3 }
0x119a   :  { %20606 = vmatprep.subr.bf16.mxu1 %v23077_v50  ;;  %v11794_v12 = vand.u32 4294901760, %v11793_v8  ;;  %v11815_v56 = vand.u32 4294901760, %v11814_v40  ;;  %v23094_v7 = vpack.c.bf16 %v11793_v8, %v11786_v11  ;;  %v23098_v26 = vpack.c.bf16 %v11821_v30, %v11814_v40 }
0x119b   :  { %20608 = vmatpush3.bf16.msra.mxu1 %v23077_v50  ;;  %v11808_v43 = vand.u32 4294901760, %v11807_v10  ;;  %v11824_v55 = vand.u32 4294901760, %v11823_v5 }
0x119c   :  { %v11795_v45 = vsub.f32 %v11793_v8, %v11794_v12  ;;  %20610 = vmatprep.subr.bf16.mxu1 %v23081_v61  ;;  %v11816_v47 = vsub.f32 %v11814_v40, %v11815_v56 }
0x119d   :  { %v11809_v41 = vsub.f32 %v11807_v10, %v11808_v43  ;;  %v23104_v48 = vpack.c.bf16 %v11808_v43, %v11801_v14 }
0x119e   :  { %v11796_v22 = vand.u32 4294901760, %v11795_v45  ;;  %v11835_v45 = vsub.f32 %v11676_v60, %v11713_v35  ;;  %v11817_v18 = vand.u32 4294901760, %v11816_v47  ;;  %v23102_v60 = vpack.c.bf16 %v11794_v12, %v11787_v2  ;;  %v12276_v35 = vld [vmem:[#allocation15 + $0x10] sm:$0xf] }
0x119f   :  { %20612 = vmatpush3.bf16.msra.mxu1 %v23081_v61  ;;  %v11810_v21 = vand.u32 4294901760, %v11809_v41  ;;  %v23096_v41 = vpack.c.bf16 %v11807_v10, %v11800_v29 }
0x11a0   :  { %v23085_v27 = vpack.c.bf16 %v11796_v22, %v11789_v52  ;;  %v11829_v52 = vand.u32 4294901760, %v11828_v59  ;;  %v11836_v22 = vand.u32 4294901760, %v11835_v45  ;;  %v23090_v44 = vpack.c.bf16 %v11824_v55, %v11817_v18 }
0x11a1   :  { %v23088_v57 = vpack.c.bf16 %v11810_v21, %v11803_v32  ;;  %v23100_v32 = vpack.c.bf16 %v11835_v45, %v11828_v59  ;;  %v23106_v55 = vpack.c.bf16 %v11822_v3, %v11815_v56  ;;  %v12278_v21 = vsel %vm292_vm0, %v12276_v35, 0 }
0x11a2   :  { %20614 = vmatprep.subr.bf16.mxu1 %v23085_v27  ;;  %v11830_v6 = vsub.f32 %v11828_v59, %v11829_v52  ;;  %v11837_v31 = vsub.f32 %v11835_v45, %v11836_v22  ;;  %v23108_v18 = vpack.c.bf16 %v11836_v22, %v11829_v52  ;;  %v12281_v47 = vand.u32 4294901760, %v12278_v21 }
0x11a4   :  { %v11831_v36 = vand.u32 4294901760, %v11830_v6  ;;  %v11838_v0 = vand.u32 4294901760, %v11837_v31  ;;  %19253 = vmatprep.subr.mxu0 %v12281_v47  ;;  %v12388_v11 = vsub.f32 %v12278_v21, %v12281_v47  ;;  %v23572_v31 = vld [vmem:[#allocation46_spill] sm:$0xff] }
0x11a5   :  { %19254 = vmatpush3.msra.mxu0 %v12281_v47 }
0x11a6   :  { %v23092_v13 = vpack.c.bf16 %v11838_v0, %v11831_v36  ;;  %19256 = vmatmul.mubr.f32.vlgmr.msra.gmra.mrb[24].mxu0 %v22342_v49  ;;  %v12389_v30 = vand.u32 4294901760, %v12388_v11  ;;  %v16690_v49 = vld [vmem:[#allocation18 + $0x3] ss:$0 sm:$0xff]  ;;  %v23573_v36 = vld [vmem:[#allocation48_spill] sm:$0xff] }
0x11a7   :  { %19258 = vmatprep.mubr.f32.mxu0 %v22344_v51 }
0x11a8   :  { %v12390_v40 = vsub.f32 %v12388_v11, %v12389_v30 }
0x11aa   :  { %19259 = vmatmul.mubr.f32.gmra.mrb[26].mxu0 %v22348_v54  ;;  %v12391_v8 = vand.u32 4294901760, %v12390_v40 }
0x11ab   :  { %19263 = vmatprep.mubr.f32.mxu0 %v22279_v15 }
0x11ac   :  { %19261 = vmatprep.subr.mxu0 %v12391_v8 }
0x11ad   :  { %19262 = vmatpush3.msra.mxu0 %v12391_v8 }
0x11ae   :  { %19264 = vmatmul.mubr.f32.vlgmr.msra.gmra.mrb[24].mxu0 %v22281_v16  ;;  %19269 = vmatprep.subr.mxu0 %v12388_v11 }
0x11af   :  { %19266 = vmatprep.mubr.f32.mxu0 %v22283_v17  ;;  %19270 = vmatpush3.msra.mxu0 %v12388_v11 }
0x11b0   :  { %19277 = vmatprep.subr.mxu0 %v12281_v47 }
0x11b2   :  { %19267 = vmatmul.mubr.f32.gmra.mrb[26].mxu0 %v22289_v20 }
0x11b3   :  { %19271 = vmatprep.mubr.f32.mxu0 %v22295_v23 }
0x11b6   :  { %19272 = vmatmul.mubr.f32.vlgmr.msra.gmra.mrb[24].mxu0 %v22298_v24 }
0x11b7   :  { %19274 = vmatprep.mubr.f32.mxu0 %v22301_v25  ;;  %19278 = vmatpush3.msra.mxu0 %v12281_v47 }
0x11b8   :  { %19285 = vmatprep.subr.mxu0 %v12389_v30 }
0x11ba   :  { %19275 = vmatmul.mubr.f32.gmra.mrb[26].mxu0 %v22307_v28 }
0x11bb   :  { %19279 = vmatprep.mubr.f32.mxu0 %v22316_v33 }
0x11be   :  { %19280 = vmatmul.mubr.f32.vlgmr.msra.gmra.mrb[24].mxu0 %v22319_v34 }
0x11bf   :  { %19282 = vmatprep.mubr.f32.mxu0 %v22324_v37  ;;  %19286 = vmatpush3.msra.mxu0 %v12389_v30 }
0x11c0   :  { %19293 = vmatprep.subr.mxu0 %v12281_v47 }
0x11c2   :  { %19283 = vmatmul.mubr.f32.gmra.mrb[26].mxu0 %v22327_v38 }
0x11c3   :  { %19287 = vmatprep.mubr.f32.mxu0 %v22279_v15 }
0x11c6   :  { %19288 = vmatmul.mubr.f32.vlgmr.msra.gmra.mrb[24].mxu0 %v22281_v16 }
0x11c7   :  { %19290 = vmatprep.mubr.f32.mxu0 %v22283_v17  ;;  %19294 = vmatpush3.msra.mxu0 %v12281_v47 }
0x11ca   :  { %19291 = vmatmul.mubr.f32.gmra.mrb[26].mxu0 %v22289_v20 }
0x11cb   :  { %19295 = vmatprep.mubr.f32.mxu0 %v22279_v15  ;;  %v16691_v15 = vld [vmem:[#allocation21 + $0x3] ss:$0 sm:$0xff] }
0x11ce   :  { %19296 = vmatmul.mubr.f32.vlgmr.msra.gmra.mrb[24].mxu0 %v22281_v16 }
0x11cf   :  { %19298 = vmatprep.mubr.f32.mxu0 %v22283_v17 }
0x11d2   :  { %19299 = vmatmul.mubr.f32.gmra.mrb[26].mxu0 %v22289_v20 }
0x11d3   :  { %19305 = vmatprep.mubr.f32.mxu0 %v22400_v62 }
0x126b   :  { %v19138_v51 = vpop.f32.mrb[22].mxu0 }
0x126c   :  { %v21051_v54 = vadd.f32 %v19138_v51, %v16690_v49  ;;  %v11656_v56 = vpop.f32.mrb[23].mxu0 }
0x126d   :  { %v21052_v23 = vadd.f32 %v16690_v49, %v11656_v56 }
0x126e   :  { %v11667_v24 = vmax.f32 %v21051_v54, 0.0 }
0x126f   :  { %v11666_v2 = vmax.f32 %v21052_v23, 0.0 }
0x1270   :  { %v11689_v25 = vsel %vm3095_vm4, %v11667_v24, 0 }
0x1271   :  { %v23128_v28 = vand.u32 4294901760, %v11689_v25  ;;  %v11686_v33 = vsel %vm3095_vm4, %v11666_v2, 0 }
0x1272   :  { %v11764_v34 = vand.u32 4294901760, %v11686_v33 }
0x1273   :  { %v11775_v12 = vsub.f32 %v11689_v25, %v23128_v28 }
0x1274   :  { %v11765_v37 = vsub.f32 %v11686_v33, %v11764_v34 }
0x1275   :  { %v11776_v29 = vand.u32 4294901760, %v11775_v12 }
0x1276   :  { %v11766_v10 = vand.u32 4294901760, %v11765_v37 }
0x1277   :  { %v11777_v38 = vsub.f32 %v11775_v12, %v11776_v29 }
0x1278   :  { %v11767_v14 = vsub.f32 %v11765_v37, %v11766_v10 }
0x1279   :  { %v11778_v3 = vand.u32 4294901760, %v11777_v38 }
0x127a   :  { %v11768_v43 = vand.u32 4294901760, %v11767_v14 }
0x127c   :  { %19155 = vmatprep.mubr.f32.mxu1 %v11768_v43 }
0x127d   :  { %19156 = vmatmul.mubr.f32.vlgmr.msra.gmra.mrb[18].mxu1 %v11778_v3 }
0x127e   :  { %20616 = vmatpush3.bf16.msra.mxu1 %v23085_v27  ;;  %19174 = vmatprep.mubr.f32.mxu1 %v11764_v34 }
0x127f   :  { %20618 = vmatprep.subr.bf16.mxu1 %v23088_v57 }
0x1282   :  { %20620 = vmatpush3.bf16.msra.mxu1 %v23088_v57 }
0x1283   :  { %20622 = vmatprep.subr.bf16.mxu1 %v23090_v44 }
0x1286   :  { %20624 = vmatpush3.bf16.msra.mxu1 %v23090_v44 }
0x1287   :  { %20626 = vmatprep.subr.bf16.mxu1 %v23092_v13 }
0x128a   :  { %20628 = vmatpush3.bf16.msra.mxu1 %v23092_v13  ;;  %v23577_v13 = vld [vmem:[#allocation51_spill] sm:$0xff] }
0x128b   :  { %20630 = vmatprep.subr.bf16.mxu1 %v23094_v7 }
0x128d   :  { %19175 = vmatmul.mubr.f32.vlgmr.msra.gmra.mrb[18].mxu1 %v23128_v28 }
0x128e   :  { %20632 = vmatpush3.bf16.msra.mxu1 %v23094_v7  ;;  %19193 = vmatprep.mubr.f32.mxu1 %v11765_v37 }
0x128f   :  { %20634 = vmatprep.subr.bf16.mxu1 %v23096_v41 }
0x1292   :  { %20636 = vmatpush3.bf16.msra.mxu1 %v23096_v41  ;;  %v23578_v41 = vld [vmem:[#allocation45_spill] sm:$0xff] }
0x1293   :  { %20638 = vmatprep.subr.bf16.mxu1 %v23098_v26 }
0x1296   :  { %20640 = vmatpush3.bf16.msra.mxu1 %v23098_v26  ;;  %v23579_v26 = vld [vmem:[#allocation50_spill] sm:$0xff] }
0x1297   :  { %20642 = vmatprep.subr.bf16.mxu1 %v23100_v32 }
0x129a   :  { %20644 = vmatpush3.bf16.msra.mxu1 %v23100_v32  ;;  %v23580_v32 = vld [vmem:[#allocation52_spill] sm:$0xff] }
0x129b   :  { %20646 = vmatprep.subr.bf16.mxu1 %v23069_v53 }
0x129d   :  { %19194 = vmatmul.mubr.f32.vlgmr.msra.gmra.mrb[18].mxu1 %v11775_v12 }
0x129e   :  { %20648 = vmatpush3.bf16.msra.mxu1 %v23069_v53  ;;  %19212 = vmatprep.mubr.f32.mxu1 %v11766_v10 }
0x129f   :  { %20650 = vmatprep.subr.bf16.mxu1 %v23073_v19 }
0x12a2   :  { %20652 = vmatpush3.bf16.msra.mxu1 %v23073_v19 }
0x12a3   :  { %20654 = vmatprep.subr.bf16.mxu1 %v23077_v50 }
0x12a6   :  { %20656 = vmatpush3.bf16.msra.mxu1 %v23077_v50 }
0x12a7   :  { %20658 = vmatprep.subr.bf16.mxu1 %v23081_v61 }
0x12aa   :  { %20660 = vmatpush3.bf16.msra.mxu1 %v23081_v61 }
0x12ab   :  { %20662 = vmatprep.subr.bf16.mxu1 %v23102_v60 }
0x12ad   :  { %19213 = vmatmul.mubr.f32.vlgmr.msra.gmra.mrb[18].mxu1 %v11776_v29 }
0x12ae   :  { %20664 = vmatpush3.bf16.msra.mxu1 %v23102_v60  ;;  %19231 = vmatprep.mubr.f32.mxu1 %v11764_v34  ;;  %v23581_v60 = vld [vmem:[#allocation53_spill] sm:$0xff] }
0x12af   :  { %20666 = vmatprep.subr.bf16.mxu1 %v23104_v48 }
0x12b2   :  { %20668 = vmatpush3.bf16.msra.mxu1 %v23104_v48 }
0x12b3   :  { %20670 = vmatprep.subr.bf16.mxu1 %v23106_v55 }
0x12b6   :  { %20672 = vmatpush3.bf16.msra.mxu1 %v23106_v55 }
0x12b7   :  { %20674 = vmatprep.subr.bf16.mxu1 %v23108_v18 }
0x12ba   :  { %20676 = vmatpush3.bf16.msra.mxu1 %v23108_v18 }
0x12bb   :  { %20678 = vmatprep.subr.bf16.mxu1 %v23069_v53 }
0x12bd   :  { %19232 = vmatmul.mubr.f32.vlgmr.msra.gmra.mrb[18].mxu1 %v23128_v28 }
0x12be   :  { %20680 = vmatpush3.bf16.msra.mxu1 %v23069_v53  ;;  %19250 = vmatprep.mubr.f32.mxu1 %v11764_v34 }
0x12bf   :  { %20682 = vmatprep.subr.bf16.mxu1 %v23073_v19 }
0x12c2   :  { %20684 = vmatpush3.bf16.msra.mxu1 %v23073_v19 }
0x12c3   :  { %20686 = vmatprep.subr.bf16.mxu1 %v23077_v50 }
0x12c6   :  { %20688 = vmatpush3.bf16.msra.mxu1 %v23077_v50 }
0x12c7   :  { %20690 = vmatprep.subr.bf16.mxu1 %v23081_v61 }
0x12ca   :  { %20692 = vmatpush3.bf16.msra.mxu1 %v23081_v61 }
0x12cd   :  { %19251 = vmatmul.mubr.f32.vlgmr.msra.gmra.mrb[18].mxu1 %v23128_v28 }
0x12ce   :  { %19369 = vmatprep.mubr.f32.mxu1 %v22485_v1 }
0x13a0   :  { %v19252_v16 = vpop.f32.mrb[18].mxu1 }
0x13a1   :  { %v21053_v17 = vadd.f32 %v19252_v16, %v16691_v15  ;;  %v12261_v20 = vpop.f32.mrb[19].mxu1 }
0x13a2   :  { %v21054_v62 = vadd.f32 %v16691_v15, %v12261_v20  ;;  %v23582_v20 = vld [vmem:[#allocation60_spill] sm:$0xff] }
0x13a3   :  { %v12272_v7 = vmax.f32 %v21053_v17, 0.0 }
0x13a4   :  { %v12271_v44 = vmax.f32 %v21054_v62, 0.0 }
0x13a5   :  { %v23184_v57 = vadd.f32 %v12272_v7, %v23005_v63  ;;  %v23583_v7 = vld [vmem:[#allocation54_spill] sm:$0xff] }
0x13a6   :  { %v23187_v27 = vadd.f32 %v12271_v44, %v23008_v9 }
0x13a7   :  { %v12859_v53 = vand.u32 4294901760, %v23184_v57 }
0x13a8   :  { %v12856_v19 = vand.u32 4294901760, %v23187_v27 }
0x13a9   :  { %v12971_v50 = vsub.f32 %v23184_v57, %v12859_v53 }
0x13aa   :  { %v20693_v1 = vpack.c.bf16 %v12859_v53, %v12856_v19  ;;  %v12964_v61 = vsub.f32 %v23187_v27, %v12856_v19  ;;  %v23584_v53 = vld [vmem:[#allocation57_spill] sm:$0xff]  ;;  %v23585_v19 = vld [vmem:[#allocation55_spill] sm:$0xff] }
0x13ab   :  { %v12972_v5 = vand.u32 4294901760, %v12971_v50 }
0x13ac   :  { %20694 = vmatprep.subr.bf16.mxu0 %v20693_v1  ;;  %v12965_v59 = vand.u32 4294901760, %v12964_v61  ;;  %v20701_v6 = vpack.c.bf16 %v12971_v50, %v12964_v61 }
0x13ad   :  { %20696 = vmatpush3.bf16.msra.mxu0 %v20693_v1  ;;  %v12973_v45 = vsub.f32 %v12971_v50, %v12972_v5  ;;  %v23586_v50 = vld [vmem:[#allocation58_spill] sm:$0xff] }
0x13ae   :  { %v12966_v52 = vsub.f32 %v12964_v61, %v12965_v59  ;;  %v20709_v0 = vpack.c.bf16 %v12972_v5, %v12965_v59  ;;  %v23588_v61 = vld [vmem:[#allocation59_spill] sm:$0xff]  ;;  %v13983_v5 = vld [vmem:[#allocation17 + $0x80] sm:$0xff]  ;;  %v13984_v59 = vld [vmem:[#allocation17 + $0x88] sm:$0xff] }
0x13af   :  { %v12974_v63 = vand.u32 4294901760, %v12973_v45  ;;  %v14002_v45 = vand.u32 4294901760, %v13983_v5 }
0x13b0   :  { %19306 = vmatmul.mubr.f32.vlgmr.msra.gmra.mrb[24].mxu0 %v22442_v39  ;;  %v12967_v9 = vand.u32 4294901760, %v12966_v52  ;;  %v23574_v39 = vld [vmem:[#allocation44_spill] sm:$0xff]  ;;  %v14005_v52 = vand.u32 4294901760, %v13984_v59 }
0x13b1   :  { %19308 = vmatprep.mubr.f32.mxu0 %v22446_v42  ;;  %v23575_v42 = vld [vmem:[#allocation47_spill] sm:$0xff] }
0x13b2   :  { %v20697_v22 = vpack.c.bf16 %v12974_v63, %v12967_v9  ;;  %v23227_v63 = vpack.c.bf16 %v14005_v52, %v14002_v45  ;;  %v14092_v9 = vsub.f32 %v13983_v5, %v14002_v45  ;;  %v14537_v5 = vld [vmem:[#allocation20 + $0x128] sm:$0xff] }
0x13b3   :  { %v14570_v45 = vand.u32 4294901760, %v14537_v5 }
0x13b4   :  { %19309 = vmatmul.mubr.f32.gmra.mrb[26].mxu0 %v22449_v46  ;;  %20698 = vmatprep.subr.bf16.mxu0 %v20697_v22  ;;  %v23576_v46 = vld [vmem:[#allocation49_spill] sm:$0xff] }
0x13b5   :  { %20700 = vmatpush3.bf16.msra.mxu0 %v20697_v22  ;;  %19315 = vmatprep.mubr.f32.mxu0 %v22390_v58  ;;  %v14099_v22 = vsub.f32 %v13984_v59, %v14005_v52 }
0x13b6   :  { %20702 = vmatprep.subr.bf16.mxu0 %v20701_v6 }
0x13b8   :  { %19316 = vmatmul.mubr.f32.vlgmr.msra.gmra.mrb[24].mxu0 %v22405_v4 }
0x13b9   :  { %20704 = vmatpush3.bf16.msra.mxu0 %v20701_v6  ;;  %19318 = vmatprep.mubr.f32.mxu0 %v23572_v31  ;;  %v13985_v6 = vld [vmem:[#allocation17 + $0x90] sm:$0xff] }
0x13ba   :  { %20706 = vmatprep.subr.bf16.mxu0 %v20693_v1 }
0x13bc   :  { %19319 = vmatmul.mubr.f32.gmra.mrb[26].mxu0 %v23573_v36 }
0x13bd   :  { %19325 = vmatprep.mubr.f32.mxu0 %v23574_v39 }
0x13c0   :  { %19326 = vmatmul.mubr.f32.vlgmr.msra.gmra.mrb[24].mxu0 %v23575_v42  ;;  %v14093_v42 = vand.u32 4294901760, %v14092_v9 }
0x13c1   :  { %20708 = vmatpush3.bf16.msra.mxu0 %v20693_v1  ;;  %19328 = vmatprep.mubr.f32.mxu0 %v23576_v46 }
0x13c2   :  { %20710 = vmatprep.subr.bf16.mxu0 %v20709_v0 }
0x13c4   :  { %19329 = vmatmul.mubr.f32.gmra.mrb[26].mxu0 %v23577_v13  ;;  %v14094_v13 = vsub.f32 %v14092_v9, %v14093_v42 }
0x13c5   :  { %19335 = vmatprep.mubr.f32.mxu0 %v23578_v41 }
0x13c8   :  { %19336 = vmatmul.mubr.f32.vlgmr.msra.gmra.mrb[24].mxu0 %v23579_v26 }
0x13c9   :  { %20712 = vmatpush3.bf16.msra.mxu0 %v20709_v0  ;;  %19338 = vmatprep.mubr.f32.mxu0 %v23580_v32  ;;  %v14100_v0 = vand.u32 4294901760, %v14099_v22 }
0x13ca   :  { %20714 = vmatprep.subr.bf16.mxu0 %v20693_v1 }
0x13cb   :  { %v14101_v41 = vsub.f32 %v14099_v22, %v14100_v0 }
0x13cc   :  { %19339 = vmatmul.mubr.f32.gmra.mrb[26].mxu0 %v23581_v60  ;;  %v14095_v60 = vand.u32 4294901760, %v14094_v13 }
0x13cd   :  { %19345 = vmatprep.mubr.f32.mxu0 %v22390_v58 }
0x13d0   :  { %19346 = vmatmul.mubr.f32.vlgmr.msra.gmra.mrb[24].mxu0 %v22405_v4 }
0x13d1   :  { %20716 = vmatpush3.bf16.msra.mxu0 %v20693_v1  ;;  %19348 = vmatprep.mubr.f32.mxu0 %v23572_v31  ;;  %v23587_v1 = vld [vmem:[#allocation56_spill] sm:$0xff] }
0x13d2   :  { %20766 = vmatprep.subr.bf16.mxu0 %v23227_v63 }
0x13d4   :  { %19349 = vmatmul.mubr.f32.gmra.mrb[26].mxu0 %v23573_v36 }
0x13d5   :  { %19355 = vmatprep.mubr.f32.mxu0 %v22390_v58 }
0x13d8   :  { %19356 = vmatmul.mubr.f32.vlgmr.msra.gmra.mrb[24].mxu0 %v22405_v4 }
0x13d9   :  { %19358 = vmatprep.mubr.f32.mxu0 %v23572_v31  ;;  %v13986_v31 = vld [vmem:[#allocation17 + $0x98] sm:$0xff]  ;;  %20768 = vmatpush3.bf16.msra.mxu0 %v23227_v63 }
0x13da   :  { %v14011_v39 = vand.u32 4294901760, %v13986_v31 }
0x13dc   :  { %19359 = vmatmul.mubr.f32.gmra.mrb[26].mxu0 %v23573_v36  ;;  %v14008_v36 = vand.u32 4294901760, %v13985_v6  ;;  %v14113_v32 = vsub.f32 %v13986_v31, %v14011_v39 }
0x13de   :  { %v23231_v46 = vpack.c.bf16 %v14011_v39, %v14008_v36  ;;  %v14106_v26 = vsub.f32 %v13985_v6, %v14008_v36  ;;  %v14539_v6 = vld [vmem:[#allocation20 + $0x138] sm:$0xff] }
0x13df   :  { %v14576_v36 = vand.u32 4294901760, %v14539_v6 }
0x13e0   :  { %20770 = vmatprep.subr.bf16.mxu0 %v23231_v46 }
0x13e1   :  { %20772 = vmatpush3.bf16.msra.mxu0 %v23231_v46 }
0x14ab   :  { %v19357_v48 = vpop.f32.mrb[24].mxu0 }
0x14ac   :  { %v13444_v55 = vmax.f32 %v19357_v48, 0.0  ;;  %v13421_v18 = vpop.f32.mrb[25].mxu0  ;;  %v14102_v48 = vand.u32 4294901760, %v14101_v41 }
0x14ad   :  { %v13443_v35 = vmax.f32 %v13421_v18, 0.0  ;;  %v14114_v18 = vand.u32 4294901760, %v14113_v32 }
0x14ae   :  { %v13451_v21 = vand.u32 4294901760, %v13444_v55 }
0x14af   :  { %v13448_v47 = vand.u32 4294901760, %v13443_v35  ;;  %v19360_v11 = vpop.f32.mrb[26].mxu0 }
0x14b0   :  { %v13545_v30 = vsub.f32 %v13444_v55, %v13451_v21  ;;  %v13446_v40 = vmax.f32 %v19360_v11, 0.0  ;;  %v13433_v8 = vpop.f32.mrb[27].mxu0  ;;  %v14107_v55 = vand.u32 4294901760, %v14106_v26 }
0x14b1   :  { %v20717_v49 = vpack.c.bf16 %v13451_v21, %v13448_v47  ;;  %v13538_v51 = vsub.f32 %v13443_v35, %v13448_v47  ;;  %v13445_v54 = vmax.f32 %v13433_v8, 0.0  ;;  %v20773_v35 = vpack.c.bf16 %v14102_v48, %v14095_v60 }
0x14b2   :  { %v13546_v58 = vand.u32 4294901760, %v13545_v30  ;;  %v13457_v56 = vand.u32 4294901760, %v13446_v40  ;;  %v14108_v21 = vsub.f32 %v14106_v26, %v14107_v55  ;;  %v14115_v47 = vsub.f32 %v14113_v32, %v14114_v18 }
0x14b3   :  { %v13539_v4 = vand.u32 4294901760, %v13538_v51  ;;  %v13454_v23 = vand.u32 4294901760, %v13445_v54  ;;  %20718 = vmatprep.subr.bf16.mxu1 %v20717_v49  ;;  %v20733_v24 = vpack.c.bf16 %v13545_v30, %v13538_v51  ;;  %20774 = vmatprep.subr.bf16.mxu0 %v20773_v35  ;;  %v20781_v8 = vpack.c.bf16 %v14099_v22, %v14092_v9  ;;  %v14538_v22 = vld [vmem:[#allocation20 + $0x130] sm:$0xff] }
0x14b4   :  { %v13559_v2 = vsub.f32 %v13446_v40, %v13457_v56  ;;  %20720 = vmatpush3.bf16.msra.mxu1 %v20717_v49  ;;  %v13547_v25 = vsub.f32 %v13545_v30, %v13546_v58  ;;  %v14109_v11 = vand.u32 4294901760, %v14108_v21  ;;  %v14116_v30 = vand.u32 4294901760, %v14115_v47 }
0x14b5   :  { %v20721_v28 = vpack.c.bf16 %v13457_v56, %v13454_v23  ;;  %v13552_v33 = vsub.f32 %v13445_v54, %v13454_v23  ;;  %v13540_v34 = vsub.f32 %v13538_v51, %v13539_v4  ;;  %v20749_v12 = vpack.c.bf16 %v13546_v58, %v13539_v4 }
0x14b6   :  { %v13560_v37 = vand.u32 4294901760, %v13559_v2  ;;  %v13548_v29 = vand.u32 4294901760, %v13547_v25  ;;  %v20777_v40 = vpack.c.bf16 %v14116_v30, %v14109_v11  ;;  %v20797_v51 = vpack.c.bf16 %v14100_v0, %v14093_v42 }
0x14b7   :  { %v13553_v10 = vand.u32 4294901760, %v13552_v33  ;;  %20722 = vmatprep.subr.bf16.mxu1 %v20721_v28  ;;  %v13541_v38 = vand.u32 4294901760, %v13540_v34  ;;  %v20737_v14 = vpack.c.bf16 %v13559_v2, %v13552_v33  ;;  %v20801_v54 = vpack.c.bf16 %v14114_v18, %v14107_v55 }
0x14b8   :  { %20724 = vmatpush3.bf16.msra.mxu1 %v20721_v28  ;;  %v13561_v43 = vsub.f32 %v13559_v2, %v13560_v37  ;;  %v13977_v58 = vstv %s13976_s26  ;;  %v14573_v31 = vand.u32 4294901760, %v14538_v22  ;;  %v14684_v47 = vsub.f32 %v14537_v5, %v14570_v45 }
0x14b9   :  { %v20725_v3 = vpack.c.bf16 %v13548_v29, %v13541_v38  ;;  %v13554_v15 = vsub.f32 %v13552_v33, %v13553_v10  ;;  %v20753_v16 = vpack.c.bf16 %v13560_v37, %v13553_v10  ;;  %v13979_v56 = vmul.f32 %v13977_v58, %v23184_v57 }
0x14ba   :  { %v13562_v17 = vand.u32 4294901760, %v13561_v43  ;;  %v13978_v23 = vmul.f32 %v13977_v58, %v23187_v27  ;;  %v23259_v0 = vpack.c.bf16 %v14576_v36, %v14573_v31  ;;  %v14691_v58 = vsub.f32 %v14538_v22, %v14573_v31 }
0x14bb   :  { %19370 = vmatmul.mubr.f32.vlgmr.msra.gmra.mrb[20].mxu1 %v23582_v20  ;;  %20726 = vmatprep.subr.bf16.mxu1 %v20725_v3  ;;  %v13555_v62 = vand.u32 4294901760, %v13554_v15 }
0x14bc   :  { %20728 = vmatpush3.bf16.msra.mxu1 %v20725_v3  ;;  %19380 = vmatprep.mubr.f32.mxu1 %v23583_v7 }
0x14bd   :  { %v20729_v44 = vpack.c.bf16 %v13562_v17, %v13555_v62  ;;  %v14533_v17 = vld [vmem:[#allocation20 + $0x108] sm:$0xff] }
0x14be   :  { %v14558_v62 = vand.u32 4294901760, %v14533_v17 }
0x14bf   :  { %20730 = vmatprep.subr.bf16.mxu1 %v20729_v44 }
0x14c0   :  { %20732 = vmatpush3.bf16.msra.mxu1 %v20729_v44  ;;  %v14534_v44 = vld [vmem:[#allocation20 + $0x110] sm:$0xff]  ;;  %v14656_v9 = vsub.f32 %v14533_v17, %v14558_v62 }
0x14c1   :  { %20734 = vmatprep.subr.bf16.mxu1 %v20733_v24 }
0x14c2   :  { %v14657_v42 = vand.u32 4294901760, %v14656_v9 }
0x14c3   :  { %19381 = vmatmul.mubr.f32.vlgmr.msra.gmra.mrb[20].mxu1 %v23584_v53 }
0x14c4   :  { %20736 = vmatpush3.bf16.msra.mxu1 %v20733_v24  ;;  %19391 = vmatprep.mubr.f32.mxu1 %v23585_v19  ;;  %v14561_v19 = vand.u32 4294901760, %v14534_v44  ;;  %v14658_v13 = vsub.f32 %v14656_v9, %v14657_v42 }
0x14c5   :  { %20738 = vmatprep.subr.bf16.mxu1 %v20737_v14 }
0x14c6   :  { %v14663_v41 = vsub.f32 %v14534_v44, %v14561_v19  ;;  %v14659_v60 = vand.u32 4294901760, %v14658_v13  ;;  %v21926_v13 = vmov 0.0|0.0  }
0x14c8   :  { %20740 = vmatpush3.bf16.msra.mxu1 %v20737_v14  ;;  %v14664_v48 = vand.u32 4294901760, %v14663_v41 }
0x14c9   :  { %20742 = vmatprep.subr.bf16.mxu1 %v20717_v49 }
0x14cb   :  { %19392 = vmatmul.mubr.f32.vlgmr.msra.gmra.mrb[20].mxu1 %v23586_v50 }
0x14cc   :  { %20744 = vmatpush3.bf16.msra.mxu1 %v20717_v49  ;;  %19402 = vmatprep.mubr.f32.mxu1 %v23587_v1 }
0x14cd   :  { %20746 = vmatprep.subr.bf16.mxu1 %v20721_v28 }
0x14d0   :  { %20748 = vmatpush3.bf16.msra.mxu1 %v20721_v28 }
0x14d1   :  { %20750 = vmatprep.subr.bf16.mxu1 %v20749_v12 }
0x14d3   :  { %19403 = vmatmul.mubr.f32.vlgmr.msra.gmra.mrb[20].mxu1 %v23588_v61  ;;  %v14536_v61 = vld [vmem:[#allocation20 + $0x120] sm:$0xff] }
0x14d4   :  { %20752 = vmatpush3.bf16.msra.mxu1 %v20749_v12  ;;  %19413 = vmatprep.mubr.f32.mxu1 %v23583_v7  ;;  %v14567_v59 = vand.u32 4294901760, %v14536_v61 }
0x14d5   :  { %20754 = vmatprep.subr.bf16.mxu1 %v20753_v16 }
0x14d6   :  { %v23255_v52 = vpack.c.bf16 %v14570_v45, %v14567_v59  ;;  %v14677_v21 = vsub.f32 %v14536_v61, %v14567_v59 }
0x14d8   :  { %20756 = vmatpush3.bf16.msra.mxu1 %v20753_v16  ;;  %v14532_v16 = vld [vmem:[#allocation20 + $0x100] sm:$0xff] }
0x14d9   :  { %20758 = vmatprep.subr.bf16.mxu1 %v20717_v49  ;;  %v14555_v20 = vand.u32 4294901760, %v14532_v16 }
0x14db   :  { %19414 = vmatmul.mubr.f32.vlgmr.msra.gmra.mrb[20].mxu1 %v23584_v53 }
0x14dc   :  { %20760 = vmatpush3.bf16.msra.mxu1 %v20717_v49  ;;  %19424 = vmatprep.mubr.f32.mxu1 %v23583_v7  ;;  %v20785_v49 = vpack.c.bf16 %v14113_v32, %v14106_v26  ;;  %v23247_v7 = vpack.c.bf16 %v14558_v62, %v14555_v20 }
0x14dd   :  { %20762 = vmatprep.subr.bf16.mxu1 %v20721_v28 }
0x14e0   :  { %20764 = vmatpush3.bf16.msra.mxu1 %v20721_v28 }
0x14e1   :  { %20814 = vmatprep.subr.bf16.mxu1 %v23247_v7 }
0x14e3   :  { %19425 = vmatmul.mubr.f32.vlgmr.msra.gmra.mrb[20].mxu1 %v23584_v53  ;;  %v14535_v53 = vld [vmem:[#allocation20 + $0x118] sm:$0xff] }
0x14e4   :  { %v14564_v50 = vand.u32 4294901760, %v14535_v53  ;;  %20816 = vmatpush3.bf16.msra.mxu1 %v23247_v7 }
0x14e6   :  { %v23251_v1 = vpack.c.bf16 %v14564_v50, %v14561_v19  ;;  %v14670_v26 = vsub.f32 %v14535_v53, %v14564_v50 }
0x14e8   :  { %20818 = vmatprep.subr.bf16.mxu1 %v23251_v1  ;;  %v14671_v55 = vand.u32 4294901760, %v14670_v26 }
0x14e9   :  { %20820 = vmatpush3.bf16.msra.mxu1 %v23251_v1 }
0x14ea   :  { %20822 = vmatprep.subr.bf16.mxu1 %v23255_v52  ;;  %v14672_v11 = vsub.f32 %v14670_v26, %v14671_v55 }
0x14ed   :  { %20824 = vmatpush3.bf16.msra.mxu1 %v23255_v52 }
0x14ee   :  { %20826 = vmatprep.subr.bf16.mxu1 %v23259_v0 }
0x14f1   :  { %20828 = vmatpush3.bf16.msra.mxu1 %v23259_v0 }
0x15b6   :  { %v19426_v4 = vpop.f32.mrb[20].mxu1 }
0x15b7   :  { %v13981_v24 = vadd.f32 %v19426_v4, %v13979_v56  ;;  %v13965_v2 = vpop.f32.mrb[21].mxu1  ;;  %v14698_v56 = vsub.f32 %v14539_v6, %v14576_v36 }
0x15b8   :  { %v13980_v25 = vadd.f32 %v13978_v23, %v13965_v2  ;;  %v14692_v2 = vand.u32 4294901760, %v14691_v58 }
0x15b9   :  { %v13999_v28 = vsel %vm1991_vm3, %v13981_v24, 0 }
0x15ba   :  { %v14080_v33 = vand.u32 4294901760, %v13999_v28  ;;  %v13996_v34 = vsel %vm1991_vm3, %v13980_v25, 0  ;;  %v14699_v25 = vand.u32 4294901760, %v14698_v56 }
0x15bb   :  { %v14070_v12 = vand.u32 4294901760, %v13996_v34 }
0x15bc   :  { %v14081_v37 = vsub.f32 %v13999_v28, %v14080_v33  ;;  %v20889_v17 = vpack.c.bf16 %v14699_v25, %v14692_v2 }
0x15bd   :  { %v14071_v29 = vsub.f32 %v13996_v34, %v14070_v12  ;;  %v14700_v34 = vsub.f32 %v14698_v56, %v14699_v25  ;;  %v15599_v25 = vld [vmem:[#allocation24] sm:$0xff] }
0x15be   :  { %v14082_v10 = vand.u32 4294901760, %v14081_v37 }
0x15bf   :  { %v14072_v38 = vand.u32 4294901760, %v14071_v29 }
0x15c0   :  { %v14083_v14 = vsub.f32 %v14081_v37, %v14082_v10 }
0x15c1   :  { %v14073_v43 = vsub.f32 %v14071_v29, %v14072_v38 }
0x15c2   :  { %v14084_v15 = vand.u32 4294901760, %v14083_v14  ;;  %v20853_v14 = vpack.c.bf16 %v14684_v47, %v14677_v21 }
0x15c3   :  { %v14074_v3 = vand.u32 4294901760, %v14073_v43  ;;  %v20857_v43 = vpack.c.bf16 %v14698_v56, %v14691_v58 }
0x15c5   :  { %19435 = vmatprep.mubr.f32.mxu0 %v14074_v3 }
0x15c6   :  { %19436 = vmatmul.mubr.f32.vlgmr.msra.gmra.mrb[28].mxu0 %v14084_v15  ;;  %v20881_v15 = vpack.c.bf16 %v14671_v55, %v14664_v48 }
0x15c7   :  { %20776 = vmatpush3.bf16.msra.mxu0 %v20773_v35  ;;  %19446 = vmatprep.mubr.f32.mxu0 %v14070_v12  ;;  %v14665_v35 = vsub.f32 %v14663_v41, %v14664_v48 }
0x15c8   :  { %20778 = vmatprep.subr.bf16.mxu0 %v20777_v40 }
0x15c9   :  { %v14666_v30 = vand.u32 4294901760, %v14665_v35 }
0x15cb   :  { %20780 = vmatpush3.bf16.msra.mxu0 %v20777_v40  ;;  %v14678_v40 = vand.u32 4294901760, %v14677_v21 }
0x15cc   :  { %20782 = vmatprep.subr.bf16.mxu0 %v20781_v8 }
0x15ce   :  { %19447 = vmatmul.mubr.f32.vlgmr.msra.gmra.mrb[28].mxu0 %v14080_v33 }
0x15cf   :  { %20784 = vmatpush3.bf16.msra.mxu0 %v20781_v8  ;;  %19457 = vmatprep.mubr.f32.mxu0 %v14071_v29  ;;  %v14685_v8 = vand.u32 4294901760, %v14684_v47 }
0x15d0   :  { %20786 = vmatprep.subr.bf16.mxu0 %v20785_v49 }
0x15d3   :  { %20788 = vmatpush3.bf16.msra.mxu0 %v20785_v49  ;;  %v14673_v49 = vand.u32 4294901760, %v14672_v11 }
0x15d4   :  { %20790 = vmatprep.subr.bf16.mxu0 %v23227_v63 }
0x15d5   :  { %v20833_v4 = vpack.c.bf16 %v14673_v49, %v14666_v30 }
0x15d6   :  { %19458 = vmatmul.mubr.f32.vlgmr.msra.gmra.mrb[28].mxu0 %v14081_v37  ;;  %v14701_v37 = vand.u32 4294901760, %v14700_v34 }
0x15d7   :  { %20792 = vmatpush3.bf16.msra.mxu0 %v23227_v63  ;;  %19468 = vmatprep.mubr.f32.mxu0 %v14072_v38  ;;  %v20849_v38 = vpack.c.bf16 %v14670_v26, %v14663_v41 }
0x15d8   :  { %20794 = vmatprep.subr.bf16.mxu0 %v23231_v46 }
0x15db   :  { %20796 = vmatpush3.bf16.msra.mxu0 %v23231_v46 }
0x15dc   :  { %20798 = vmatprep.subr.bf16.mxu0 %v20797_v51 }
0x15de   :  { %19469 = vmatmul.mubr.f32.vlgmr.msra.gmra.mrb[28].mxu0 %v14082_v10 }
0x15df   :  { %20800 = vmatpush3.bf16.msra.mxu0 %v20797_v51  ;;  %19479 = vmatprep.mubr.f32.mxu0 %v14070_v12  ;;  %v14679_v51 = vsub.f32 %v14677_v21, %v14678_v40 }
0x15e0   :  { %20802 = vmatprep.subr.bf16.mxu0 %v20801_v54 }
0x15e1   :  { %v14680_v23 = vand.u32 4294901760, %v14679_v51 }
0x15e3   :  { %20804 = vmatpush3.bf16.msra.mxu0 %v20801_v54  ;;  %v14686_v54 = vsub.f32 %v14684_v47, %v14685_v8 }
0x15e4   :  { %20806 = vmatprep.subr.bf16.mxu0 %v23227_v63 }
0x15e5   :  { %v14687_v24 = vand.u32 4294901760, %v14686_v54 }
0x15e6   :  { %19480 = vmatmul.mubr.f32.vlgmr.msra.gmra.mrb[28].mxu0 %v14080_v33 }
0x15e7   :  { %20808 = vmatpush3.bf16.msra.mxu0 %v23227_v63  ;;  %19490 = vmatprep.mubr.f32.mxu0 %v14070_v12  ;;  %v14649_v63 = vsub.f32 %v14532_v16, %v14555_v20  ;;  %v20837_v28 = vpack.c.bf16 %v14687_v24, %v14680_v23  ;;  %v20885_v16 = vpack.c.bf16 %v14685_v8, %v14678_v40  ;;  %v16693_v20 = vld [vmem:[#allocation18 + $0x4] ss:$0 sm:$0xff] }
0x15e8   :  { %20810 = vmatprep.subr.bf16.mxu0 %v23231_v46 }
0x15e9   :  { %v14650_v39 = vand.u32 4294901760, %v14649_v63  ;;  %v20845_v10 = vpack.c.bf16 %v14656_v9, %v14649_v63 }
0x15eb   :  { %20812 = vmatpush3.bf16.msra.mxu0 %v23231_v46  ;;  %v14651_v46 = vsub.f32 %v14649_v63, %v14650_v39  ;;  %v20877_v3 = vpack.c.bf16 %v14657_v42, %v14650_v39 }
0x15ec   :  { %20909 = vmatprep.subr.bf16.mxu0 %v21926_v13 }
0x15ed   :  { %v14652_v32 = vand.u32 4294901760, %v14651_v46 }
0x15ee   :  { %19491 = vmatmul.mubr.f32.vlgmr.msra.gmra.mrb[28].mxu0 %v14080_v33  ;;  %v14693_v33 = vsub.f32 %v14691_v58, %v14692_v2 }
0x15ef   :  { %v20829_v18 = vpack.c.bf16 %v14659_v60, %v14652_v32 }
0x15f0   :  { %v14694_v12 = vand.u32 4294901760, %v14693_v33  ;;  %v15614_v33 = vand.u32 4294901760, %v15599_v25 }
0x15f1   :  { %20830 = vmatprep.subr.bf16.mxu1 %v20829_v18 }
0x15f2   :  { %v20841_v29 = vpack.c.bf16 %v14701_v37, %v14694_v12  ;;  %v15694_v37 = vsub.f32 %v15599_v25, %v15614_v33  ;;  %v16106_v25 = vld [vmem:[#allocation27 + $0x38] sm:$0xff] }
0x16c1   :  { %v19492_v62 = vpop.f32.mrb[28].mxu0 }
0x16c2   :  { %v21055_v44 = vadd.f32 %v19492_v62, %v16693_v20  ;;  %v14519_v53 = vpop.f32.mrb[29].mxu0 }
0x16c3   :  { %v21056_v19 = vadd.f32 %v16693_v20, %v14519_v53 }
0x16c4   :  { %v14530_v50 = vmax.f32 %v21055_v44, 0.0 }
0x16c5   :  { %v14529_v61 = vmax.f32 %v21056_v19, 0.0 }
0x16c6   :  { %v14552_v5 = vsel %vm3095_vm4, %v14530_v50, 0 }
0x16c7   :  { %v14637_v59 = vand.u32 4294901760, %v14552_v5  ;;  %v14549_v45 = vsel %vm3095_vm4, %v14529_v61, 0 }
0x16c8   :  { %v14627_v63 = vand.u32 4294901760, %v14549_v45 }
0x16c9   :  { %v14638_v9 = vsub.f32 %v14552_v5, %v14637_v59 }
0x16ca   :  { %v14628_v22 = vsub.f32 %v14549_v45, %v14627_v63 }
0x16cb   :  { %v14639_v6 = vand.u32 4294901760, %v14638_v9 }
0x16cc   :  { %v14629_v31 = vand.u32 4294901760, %v14628_v22 }
0x16cd   :  { %v14640_v36 = vsub.f32 %v14638_v9, %v14639_v6 }
0x16ce   :  { %v14630_v39 = vsub.f32 %v14628_v22, %v14629_v31 }
0x16cf   :  { %v14641_v46 = vand.u32 4294901760, %v14640_v36 }
0x16d0   :  { %v14631_v42 = vand.u32 4294901760, %v14630_v39 }
0x16d2   :  { %19509 = vmatprep.mubr.f32.mxu1 %v14631_v42 }
0x16d3   :  { %19510 = vmatmul.mubr.f32.vlgmr.msra.gmra.mrb[22].mxu1 %v14641_v46 }
0x16d4   :  { %20832 = vmatpush3.bf16.msra.mxu1 %v20829_v18  ;;  %19528 = vmatprep.mubr.f32.mxu1 %v14627_v63 }
0x16d5   :  { %20834 = vmatprep.subr.bf16.mxu1 %v20833_v4 }
0x16d8   :  { %20836 = vmatpush3.bf16.msra.mxu1 %v20833_v4 }
0x16d9   :  { %20838 = vmatprep.subr.bf16.mxu1 %v20837_v28 }
0x16dc   :  { %20840 = vmatpush3.bf16.msra.mxu1 %v20837_v28  ;;  %v15600_v28 = vld [vmem:[#allocation24 + $0x8] sm:$0xff] }
0x16dd   :  { %20842 = vmatprep.subr.bf16.mxu1 %v20841_v29  ;;  %v15617_v34 = vand.u32 4294901760, %v15600_v28 }
0x16df   :  { %v23308_v12 = vpack.c.bf16 %v15617_v34, %v15614_v33 }
0x16e0   :  { %20844 = vmatpush3.bf16.msra.mxu1 %v20841_v29  ;;  %v15701_v29 = vsub.f32 %v15600_v28, %v15617_v34  ;;  %v16139_v34 = vand.u32 4294901760, %v16106_v25 }
0x16e1   :  { %20846 = vmatprep.subr.bf16.mxu1 %v20845_v10 }
0x16e3   :  { %19529 = vmatmul.mubr.f32.vlgmr.msra.gmra.mrb[22].mxu1 %v14637_v59 }
0x16e4   :  { %20848 = vmatpush3.bf16.msra.mxu1 %v20845_v10  ;;  %19547 = vmatprep.mubr.f32.mxu1 %v14628_v22  ;;  %v15601_v10 = vld [vmem:[#allocation24 + $0x10] sm:$0xff] }
0x16e5   :  { %20850 = vmatprep.subr.bf16.mxu1 %v20849_v38 }
0x16e8   :  { %20852 = vmatpush3.bf16.msra.mxu1 %v20849_v38  ;;  %v15602_v38 = vld [vmem:[#allocation24 + $0x18] sm:$0xff] }
0x16e9   :  { %20854 = vmatprep.subr.bf16.mxu1 %v20853_v14 }
0x16ec   :  { %20856 = vmatpush3.bf16.msra.mxu1 %v20853_v14  ;;  %v15620_v14 = vand.u32 4294901760, %v15601_v10 }
0x16ed   :  { %20858 = vmatprep.subr.bf16.mxu1 %v20857_v43 }
0x16f0   :  { %20860 = vmatpush3.bf16.msra.mxu1 %v20857_v43  ;;  %v15623_v43 = vand.u32 4294901760, %v15602_v38 }
0x16f1   :  { %20862 = vmatprep.subr.bf16.mxu1 %v23247_v7 }
0x16f2   :  { %v15715_v20 = vsub.f32 %v15602_v38, %v15623_v43 }
0x16f3   :  { %19548 = vmatmul.mubr.f32.vlgmr.msra.gmra.mrb[22].mxu1 %v14638_v9 }
0x16f4   :  { %20864 = vmatpush3.bf16.msra.mxu1 %v23247_v7  ;;  %19566 = vmatprep.mubr.f32.mxu1 %v14629_v31  ;;  %v15716_v50 = vand.u32 4294901760, %v15715_v20 }
0x16f5   :  { %20866 = vmatprep.subr.bf16.mxu1 %v23251_v1 }
0x16f8   :  { %20868 = vmatpush3.bf16.msra.mxu1 %v23251_v1 }
0x16f9   :  { %20870 = vmatprep.subr.bf16.mxu1 %v23255_v52 }
0x16fc   :  { %20872 = vmatpush3.bf16.msra.mxu1 %v23255_v52 }
0x16fd   :  { %20874 = vmatprep.subr.bf16.mxu1 %v23259_v0 }
0x1700   :  { %20876 = vmatpush3.bf16.msra.mxu1 %v23259_v0 }
0x1701   :  { %20878 = vmatprep.subr.bf16.mxu1 %v20877_v3 }
0x1703   :  { %19567 = vmatmul.mubr.f32.vlgmr.msra.gmra.mrb[22].mxu1 %v14639_v6  ;;  %v20940_v6 = vpack.c.bf16 %v15701_v29, %v15694_v37 }
0x1704   :  { %20880 = vmatpush3.bf16.msra.mxu1 %v20877_v3  ;;  %19585 = vmatprep.mubr.f32.mxu1 %v14627_v63  ;;  %v15695_v3 = vand.u32 4294901760, %v15694_v37 }
0x1705   :  { %20882 = vmatprep.subr.bf16.mxu1 %v20881_v15 }
0x1706   :  { %v15696_v62 = vsub.f32 %v15694_v37, %v15695_v3 }
0x1708   :  { %20884 = vmatpush3.bf16.msra.mxu1 %v20881_v15  ;;  %v15702_v15 = vand.u32 4294901760, %v15701_v29  ;;  %v15697_v53 = vand.u32 4294901760, %v15696_v62 }
0x1709   :  { %20886 = vmatprep.subr.bf16.mxu1 %v20885_v16 }
0x170a   :  { %v15703_v44 = vsub.f32 %v15701_v29, %v15702_v15  ;;  %v20952_v36 = vpack.c.bf16 %v15702_v15, %v15695_v3  ;;  %v16251_v29 = vsub.f32 %v16106_v25, %v16139_v34 }
0x170c   :  { %20888 = vmatpush3.bf16.msra.mxu1 %v20885_v16  ;;  %v23312_v16 = vpack.c.bf16 %v15623_v43, %v15620_v14  ;;  %v15704_v61 = vand.u32 4294901760, %v15703_v44  ;;  %v16252_v44 = vand.u32 4294901760, %v16251_v29 }
0x170d   :  { %20890 = vmatprep.subr.bf16.mxu1 %v20889_v17 }
0x170e   :  { %v20934_v45 = vpack.c.bf16 %v15704_v61, %v15697_v53 }
0x1710   :  { %20892 = vmatpush3.bf16.msra.mxu1 %v20889_v17  ;;  %v15708_v17 = vsub.f32 %v15601_v10, %v15620_v14 }
0x1711   :  { %20894 = vmatprep.subr.bf16.mxu1 %v23247_v7 }
0x1712   :  { %v15709_v19 = vand.u32 4294901760, %v15708_v17  ;;  %v20943_v31 = vpack.c.bf16 %v15715_v20, %v15708_v17 }
0x1713   :  { %19586 = vmatmul.mubr.f32.vlgmr.msra.gmra.mrb[22].mxu1 %v14637_v59 }
0x1714   :  { %20896 = vmatpush3.bf16.msra.mxu1 %v23247_v7  ;;  %19604 = vmatprep.mubr.f32.mxu1 %v14627_v63  ;;  %v21928_v7 = vmov 0.0   ;;  %v15710_v5 = vsub.f32 %v15708_v17, %v15709_v19  ;;  %v20955_v39 = vpack.c.bf16 %v15716_v50, %v15709_v19 }
0x1715   :  { %20898 = vmatprep.subr.bf16.mxu1 %v23251_v1  ;;  %19611 = vmatprep.mubr.msk.f32.mxu0 %vm21927_vm5, %v21928_v7 }
0x1716   :  { %v15711_v63 = vand.u32 4294901760, %v15710_v5 }
0x1718   :  { %20900 = vmatpush3.bf16.msra.mxu1 %v23251_v1  ;;  %v15136_v1 = vld [vmem:[#allocation11] sm:$0x3] }
0x1719   :  { %20902 = vmatprep.subr.bf16.mxu1 %v23255_v52 }
0x171c   :  { %20904 = vmatpush3.bf16.msra.mxu1 %v23255_v52  ;;  %v15138_v52 = vsel %vm1386_vm2, %v15136_v1, 0 }
0x171d   :  { %20906 = vmatprep.subr.bf16.mxu1 %v23259_v0  ;;  %v15207_v41 = vand.u32 4294901760, %v15138_v52 }
0x171f   :  { %v15208_v26 = vsub.f32 %v15138_v52, %v15207_v41 }
0x1720   :  { %20908 = vmatpush3.bf16.msra.mxu1 %v23259_v0  ;;  %v16694_v0 = vld [vmem:[#allocation21 + $0x4] ss:$0 sm:$0xff] }
0x1721   :  { %20963 = vmatprep.subr.bf16.mxu1 %v21926_v13  ;;  %v15209_v55 = vand.u32 4294901760, %v15208_v26 }
0x1723   :  { %19605 = vmatmul.mubr.f32.vlgmr.msra.gmra.mrb[22].mxu1 %v14637_v59  ;;  %v15210_v11 = vsub.f32 %v15208_v26, %v15209_v55  ;;  %v15717_v59 = vsub.f32 %v15715_v20, %v15716_v50  ;;  %v16253_v50 = vsub.f32 %v16251_v29, %v16252_v44 }
0x1724   :  { %19731 = vmatprep.mubr.msk.f32.mxu1 %vm21927_vm5, %v21928_v7 }
0x1725   :  { %v15211_v54 = vand.u32 4294901760, %v15210_v11  ;;  %v15718_v9 = vand.u32 4294901760, %v15717_v59  ;;  %v16254_v5 = vand.u32 4294901760, %v16253_v50 }
0x1727   :  { %v20937_v22 = vpack.c.bf16 %v15718_v9, %v15711_v63  ;;  %v16695_v9 = vld [vmem:[#allocation25] ss:$0 sm:$0xff] }
0x17f6   :  { %v19606_v32 = vpop.f32.mrb[22].mxu1 }
0x17f7   :  { %v21057_v60 = vadd.f32 %v19606_v32, %v16694_v0  ;;  %v15124_v48 = vpop.f32.mrb[23].mxu1 }
0x17f8   :  { %v21058_v18 = vadd.f32 %v16694_v0, %v15124_v48  ;;  %v16100_v48 = vld [vmem:[#allocation27 + $0x8] sm:$0xff] }
0x17f9   :  { %v15135_v35 = vadd.f32 %v21057_v60, %v23184_v57  ;;  %v16099_v60 = vld [vmem:[#allocation27] sm:$0xff] }
0x17fa   :  { %v15134_v21 = vadd.f32 %v21058_v18, %v23187_v27  ;;  %v16121_v18 = vand.u32 4294901760, %v16100_v48 }
0x17fb   :  { %v15144_v47 = vand.u32 4294901760, %v15135_v35 }
0x17fc   :  { %v15141_v30 = vand.u32 4294901760, %v15134_v21  ;;  %v23340_v11 = vsub.f32 %v16100_v48, %v16121_v18 }
0x17fd   :  { %v15226_v40 = vsub.f32 %v15135_v35, %v15144_v47  ;;  %v16101_v35 = vld [vmem:[#allocation27 + $0x10] sm:$0xff] }
0x17fe   :  { %v20910_v8 = vpack.c.bf16 %v15144_v47, %v15141_v30  ;;  %v15219_v49 = vsub.f32 %v15134_v21, %v15141_v30  ;;  %v16102_v21 = vld [vmem:[#allocation27 + $0x18] sm:$0xff]  ;;  %v16124_v30 = vand.u32 4294901760, %v16101_v35 }
0x17ff   :  { %v15227_v51 = vand.u32 4294901760, %v15226_v40 }
0x1800   :  { %v15220_v58 = vand.u32 4294901760, %v15219_v49  ;;  %20911 = vmatpush3.bf16.msra.mxu0 %v20910_v8  ;;  %v20916_v56 = vpack.c.bf16 %v15226_v40, %v15219_v49 }
0x1801   :  { %v15228_v4 = vsub.f32 %v15226_v40, %v15227_v51  ;;  %20912 = vmatprep.subr.bf16.mxu0 %v21926_v13  ;;  %v16127_v40 = vand.u32 4294901760, %v16102_v21 }
0x1802   :  { %v15221_v23 = vsub.f32 %v15219_v49, %v15220_v58  ;;  %v20922_v24 = vpack.c.bf16 %v15227_v51, %v15220_v58  ;;  %v23346_v49 = vsub.f32 %v16101_v35, %v16124_v30  ;;  %v16103_v58 = vld [vmem:[#allocation27 + $0x20] sm:$0xff] }
0x1803   :  { %19612 = vmatmul.mubr.f32.vlgmr.msra.gmra.mrb[30].mxu0 %v15211_v54  ;;  %v15229_v57 = vand.u32 4294901760, %v15228_v4  ;;  %v23348_v51 = vsub.f32 %v16102_v21, %v16127_v40  ;;  %v16130_v4 = vand.u32 4294901760, %v16103_v58 }
0x1804   :  { %v15222_v2 = vand.u32 4294901760, %v15221_v23  ;;  %19618 = vmatprep.mubr.msk.f32.mxu0 %vm21927_vm5, %v21928_v7 }
0x1805   :  { %v20991_v54 = vpack.c.bf16 %v23348_v51, %v23346_v49 }
0x1806   :  { %v20913_v27 = vpack.c.bf16 %v15229_v57, %v15222_v2  ;;  %v16230_v57 = vsub.f32 %v16103_v58, %v16130_v4 }
0x1808   :  { %20914 = vmatpush3.bf16.msra.mxu0 %v20913_v27  ;;  %v16105_v27 = vld [vmem:[#allocation27 + $0x30] sm:$0xff]  ;;  %v16231_v43 = vand.u32 4294901760, %v16230_v57 }
0x1809   :  { %20915 = vmatprep.subr.bf16.mxu0 %v21926_v13  ;;  %v16136_v33 = vand.u32 4294901760, %v16105_v27 }
0x180a   :  { %v16232_v15 = vsub.f32 %v16230_v57, %v16231_v43 }
0x180b   :  { %19619 = vmatmul.mubr.f32.vlgmr.msra.gmra.mrb[30].mxu0 %v15207_v41  ;;  %v16244_v37 = vsub.f32 %v16105_v27, %v16136_v33  ;;  %v23371_v14 = vpack.c.bf16 %v16139_v34, %v16136_v33 }
0x180c   :  { %20917 = vmatpush3.bf16.msra.mxu0 %v20916_v56  ;;  %19625 = vmatprep.mubr.msk.f32.mxu0 %vm21927_vm5, %v21928_v7  ;;  %v16104_v56 = vld [vmem:[#allocation27 + $0x28] sm:$0xff]  ;;  %v16233_v17 = vand.u32 4294901760, %v16232_v15 }
0x180d   :  { %20918 = vmatprep.subr.bf16.mxu0 %v21926_v13  ;;  %v16133_v23 = vand.u32 4294901760, %v16104_v56  ;;  %v20997_v10 = vpack.c.bf16 %v16251_v29, %v16244_v37  ;;  %v16245_v62 = vand.u32 4294901760, %v16244_v37 }
0x180f   :  { %v16237_v2 = vsub.f32 %v16104_v56, %v16133_v23  ;;  %v23366_v38 = vpack.c.bf16 %v16133_v23, %v16130_v4  ;;  %v16246_v19 = vsub.f32 %v16244_v37, %v16245_v62  ;;  %v21021_v63 = vpack.c.bf16 %v16252_v44, %v16245_v62  ;;  %v16696_v56 = vld [vmem:[#allocation28] ss:$0 sm:$0xff] }
0x1811   :  { %v20994_v28 = vpack.c.bf16 %v16237_v2, %v16230_v57  ;;  %v16238_v3 = vand.u32 4294901760, %v16237_v2  ;;  %v16247_v61 = vand.u32 4294901760, %v16246_v19 }
0x1813   :  { %19626 = vmatmul.mubr.f32.vlgmr.msra.gmra.mrb[30].mxu0 %v15208_v26  ;;  %v20985_v59 = vpack.c.bf16 %v16254_v5, %v16247_v61 }
0x1814   :  { %20920 = vmatpush3.bf16.msra.mxu0 %v20910_v8  ;;  %19632 = vmatprep.mubr.msk.f32.mxu0 %vm21927_vm5, %v21928_v7 }
0x1815   :  { %20921 = vmatprep.subr.bf16.mxu0 %v21926_v13 }
0x181b   :  { %19633 = vmatmul.mubr.f32.vlgmr.msra.gmra.mrb[30].mxu0 %v15209_v55  ;;  %v16118_v55 = vand.u32 4294901760, %v16099_v60 }
0x181c   :  { %20923 = vmatpush3.bf16.msra.mxu0 %v20922_v24  ;;  %19639 = vmatprep.mubr.msk.f32.mxu0 %vm21927_vm5, %v21928_v7 }
0x181d   :  { %20924 = vmatprep.subr.bf16.mxu0 %v21926_v13  ;;  %v23338_v47 = vsub.f32 %v16099_v60, %v16118_v55  ;;  %v23357_v24 = vpack.c.bf16 %v16121_v18, %v16118_v55 }
0x181f   :  { %20965 = vmatpush3.bf16.msra.mxu1 %v23357_v24 }
0x1820   :  { %20966 = vmatprep.subr.bf16.mxu1 %v21926_v13 }
0x1823   :  { %19640 = vmatmul.mubr.f32.vlgmr.msra.gmra.mrb[30].mxu0 %v15207_v41 }
0x1824   :  { %20926 = vmatpush3.bf16.msra.mxu0 %v20910_v8  ;;  %19646 = vmatprep.mubr.msk.f32.mxu0 %vm21927_vm5, %v21928_v7  ;;  %v20988_v8 = vpack.c.bf16 %v23340_v11, %v23338_v47 }
0x1825   :  { %20927 = vmatprep.subr.bf16.mxu0 %v21926_v13 }
0x182b   :  { %19647 = vmatmul.mubr.f32.vlgmr.msra.gmra.mrb[30].mxu0 %v15207_v41 }
0x182c   :  { %19657 = vmatprep.mubr.msk.f32.mxu0 %vm21927_vm5, %v21928_v7  ;;  %20929 = vmatpush3.bf16.msra.mxu0 %v23308_v12 }
0x182d   :  { %20930 = vmatprep.subr.bf16.mxu0 %v21926_v13 }
0x1830   :  { %20932 = vmatpush3.bf16.msra.mxu0 %v23312_v16 }
0x1831   :  { %20933 = vmatprep.subr.bf16.mxu0 %v21926_v13 }
0x18fe   :  { %v15595_v42 = vpop.f32.mrb[30].mxu0 }
0x18ff   :  { %v15611_v46 = vsel %vm1991_vm3, %v15595_v42, 0  ;;  %v19648_v1 = vpop.f32.mrb[31].mxu0 }
0x1900   :  { %v15682_v52 = vand.u32 4294901760, %v15611_v46 }
0x1902   :  { %v15683_v41 = vsub.f32 %v15611_v46, %v15682_v52 }
0x1904   :  { %v15684_v26 = vand.u32 4294901760, %v15683_v41 }
0x1906   :  { %v15685_v0 = vsub.f32 %v15683_v41, %v15684_v26 }
0x1908   :  { %v15686_v32 = vand.u32 4294901760, %v15685_v0 }
0x190a   :  { %19658 = vmatmul.mubr.f32.vlgmr.msra.gmra.mrb[32].mxu0 %v15686_v32 }
0x190b   :  { %20935 = vmatpush3.bf16.msra.mxu0 %v20934_v45  ;;  %19668 = vmatprep.mubr.msk.f32.mxu0 %vm21927_vm5, %v21928_v7  ;;  %v21018_v45 = vpack.c.bf16 %v16238_v3, %v16231_v43 }
0x190c   :  { %20936 = vmatprep.subr.bf16.mxu0 %v21926_v13 }
0x190f   :  { %20938 = vmatpush3.bf16.msra.mxu0 %v20937_v22 }
0x1910   :  { %20939 = vmatprep.subr.bf16.mxu0 %v21926_v13 }
0x1912   :  { %19669 = vmatmul.mubr.f32.vlgmr.msra.gmra.mrb[32].mxu0 %v15682_v52 }
0x1913   :  { %20941 = vmatpush3.bf16.msra.mxu0 %v20940_v6  ;;  %19679 = vmatprep.mubr.msk.f32.mxu0 %vm21927_vm5, %v21928_v7  ;;  %v16203_v6 = vand.u32 4294901760, %v23338_v47 }
0x1914   :  { %20942 = vmatprep.subr.bf16.mxu0 %v21926_v13 }
0x1915   :  { %v16204_v46 = vsub.f32 %v23338_v47, %v16203_v6 }
0x1917   :  { %20944 = vmatpush3.bf16.msra.mxu0 %v20943_v31  ;;  %v16205_v60 = vand.u32 4294901760, %v16204_v46 }
0x1918   :  { %20945 = vmatprep.subr.bf16.mxu0 %v21926_v13 }
0x191a   :  { %19680 = vmatmul.mubr.f32.vlgmr.msra.gmra.mrb[32].mxu0 %v15683_v41  ;;  %v16217_v41 = vand.u32 4294901760, %v23346_v49 }
0x191b   :  { %20947 = vmatpush3.bf16.msra.mxu0 %v23308_v12  ;;  %19690 = vmatprep.mubr.msk.f32.mxu0 %vm21927_vm5, %v21928_v7 }
0x191c   :  { %20948 = vmatprep.subr.bf16.mxu0 %v21926_v13  ;;  %v16218_v55 = vsub.f32 %v23346_v49, %v16217_v41 }
0x191f   :  { %20950 = vmatpush3.bf16.msra.mxu0 %v23312_v16 }
0x1920   :  { %20951 = vmatprep.subr.bf16.mxu0 %v21926_v13 }
0x1922   :  { %19691 = vmatmul.mubr.f32.vlgmr.msra.gmra.mrb[32].mxu0 %v15684_v26  ;;  %v16224_v26 = vand.u32 4294901760, %v23348_v51 }
0x1923   :  { %20953 = vmatpush3.bf16.msra.mxu0 %v20952_v36  ;;  %19701 = vmatprep.mubr.msk.f32.mxu0 %vm21927_vm5, %v21928_v7 }
0x1924   :  { %20954 = vmatprep.subr.bf16.mxu0 %v21926_v13  ;;  %v16225_v18 = vsub.f32 %v23348_v51, %v16224_v26  ;;  %v21015_v51 = vpack.c.bf16 %v16224_v26, %v16217_v41 }
0x1927   :  { %20956 = vmatpush3.bf16.msra.mxu0 %v20955_v39  ;;  %v16210_v39 = vand.u32 4294901760, %v23340_v11 }
0x1928   :  { %20957 = vmatprep.subr.bf16.mxu0 %v21926_v13 }
0x1929   :  { %v21012_v49 = vpack.c.bf16 %v16210_v39, %v16203_v6 }
0x192a   :  { %19702 = vmatmul.mubr.f32.vlgmr.msra.gmra.mrb[32].mxu0 %v15682_v52 }
0x192b   :  { %20959 = vmatpush3.bf16.msra.mxu0 %v23308_v12  ;;  %19712 = vmatprep.mubr.msk.f32.mxu0 %vm21927_vm5, %v21928_v7  ;;  %v23361_v12 = vpack.c.bf16 %v16127_v40, %v16124_v30  ;;  %v16226_v30 = vand.u32 4294901760, %v16225_v18 }
0x192c   :  { %20960 = vmatprep.subr.bf16.mxu0 %v21926_v13 }
0x192d   :  { %20968 = vmatpush3.bf16.msra.mxu1 %v23361_v12 }
0x192e   :  { %20969 = vmatprep.subr.bf16.mxu1 %v21926_v13 }
0x192f   :  { %20962 = vmatpush3.bf16.msra.mxu0 %v23312_v16  ;;  %v16239_v16 = vsub.f32 %v16237_v2, %v16238_v3 }
0x1930   :  { %20987 = vmatprep.subr.bf16.mxu0 %v21926_v13 }
0x1931   :  { %20971 = vmatpush3.bf16.msra.mxu1 %v23366_v38  ;;  %v16240_v20 = vand.u32 4294901760, %v16239_v16 }
0x1932   :  { %19713 = vmatmul.mubr.f32.vlgmr.msra.gmra.mrb[32].mxu0 %v15682_v52  ;;  %20972 = vmatprep.subr.bf16.mxu1 %v21926_v13  ;;  %v16211_v52 = vsub.f32 %v23340_v11, %v16210_v39  ;;  %v16219_v11 = vand.u32 4294901760, %v16218_v55 }
0x1933   :  { %20989 = vmatpush3.bf16.msra.mxu0 %v20988_v8  ;;  %19769 = vmatprep.mubr.msk.f32.mxu0 %vm21927_vm5, %v21928_v7  ;;  %v20982_v53 = vpack.c.bf16 %v16240_v20, %v16233_v17 }
0x1934   :  { %20990 = vmatprep.subr.bf16.mxu0 %v21926_v13  ;;  %v16212_v48 = vand.u32 4294901760, %v16211_v52  ;;  %v20979_v8 = vpack.c.bf16 %v16226_v30, %v16219_v11 }
0x1935   :  { %20974 = vmatpush3.bf16.msra.mxu1 %v23371_v14 }
0x1936   :  { %20975 = vmatprep.subr.bf16.mxu1 %v21926_v13  ;;  %v20976_v47 = vpack.c.bf16 %v16212_v48, %v16205_v60 }
0x1937   :  { %20992 = vmatpush3.bf16.msra.mxu0 %v20991_v54 }
0x1938   :  { %20993 = vmatprep.subr.bf16.mxu0 %v21926_v13 }
0x193b   :  { %20995 = vmatpush3.bf16.msra.mxu0 %v20994_v28 }
0x193c   :  { %20996 = vmatprep.subr.bf16.mxu0 %v21926_v13 }
0x193f   :  { %20998 = vmatpush3.bf16.msra.mxu0 %v20997_v10 }
0x1940   :  { %20999 = vmatprep.subr.bf16.mxu0 %v21926_v13 }
0x1a05   :  { %v16094_v22 = vpop.f32.mrb[32].mxu0 }
0x1a06   :  { %v21059_v31 = vadd.f32 %v16695_v9, %v16094_v22  ;;  %v19714_v36 = vpop.f32.mrb[33].mxu0 }
0x1a08   :  { %v16098_v42 = vmax.f32 %v21059_v31, 0.0 }
0x1a0a   :  { %v16115_v1 = vsel %vm3095_vm4, %v16098_v42, 0 }
0x1a0b   :  { %v16190_v0 = vand.u32 4294901760, %v16115_v1 }
0x1a0d   :  { %v16191_v32 = vsub.f32 %v16115_v1, %v16190_v0 }
0x1a0f   :  { %v16192_v35 = vand.u32 4294901760, %v16191_v32  ;;  %19770 = vmatmul.mubr.f32.vlgmr.msra.gmra.mrb[34].mxu0 %v16191_v32 }
0x1a10   :  { %21001 = vmatpush3.bf16.msra.mxu0 %v23357_v24  ;;  %19788 = vmatprep.mubr.msk.f32.mxu0 %vm21927_vm5, %v21928_v7 }
0x1a11   :  { %21002 = vmatprep.subr.bf16.mxu0 %v21926_v13  ;;  %v16193_v21 = vsub.f32 %v16191_v32, %v16192_v35 }
0x1a13   :  { %v16194_v40 = vand.u32 4294901760, %v16193_v21 }
0x1a14   :  { %21004 = vmatpush3.bf16.msra.mxu0 %v23361_v12 }
0x1a15   :  { %19732 = vmatmul.mubr.f32.vlgmr.msra.gmra.mrb[24].mxu1 %v16194_v40  ;;  %21005 = vmatprep.subr.bf16.mxu0 %v21926_v13 }
0x1a16   :  { %20977 = vmatpush3.bf16.msra.mxu1 %v20976_v47  ;;  %19750 = vmatprep.mubr.msk.f32.mxu1 %vm21927_vm5, %v21928_v7 }
0x1a17   :  { %20978 = vmatprep.subr.bf16.mxu1 %v21926_v13 }
0x1a18   :  { %21007 = vmatpush3.bf16.msra.mxu0 %v23366_v38 }
0x1a19   :  { %21008 = vmatprep.subr.bf16.mxu0 %v21926_v13 }
0x1a1a   :  { %20980 = vmatpush3.bf16.msra.mxu1 %v20979_v8 }
0x1a1b   :  { %20981 = vmatprep.subr.bf16.mxu1 %v21926_v13 }
0x1a1c   :  { %21010 = vmatpush3.bf16.msra.mxu0 %v23371_v14 }
0x1a1d   :  { %21011 = vmatprep.subr.bf16.mxu0 %v21926_v13 }
0x1a1e   :  { %20983 = vmatpush3.bf16.msra.mxu1 %v20982_v53 }
0x1a1f   :  { %19789 = vmatmul.mubr.f32.vlgmr.msra.gmra.mrb[34].mxu0 %v16192_v35  ;;  %20984 = vmatprep.subr.bf16.mxu1 %v21926_v13 }
0x1a20   :  { %21013 = vmatpush3.bf16.msra.mxu0 %v21012_v49  ;;  %19807 = vmatprep.mubr.msk.f32.mxu0 %vm21927_vm5, %v21928_v7 }
0x1a21   :  { %21014 = vmatprep.subr.bf16.mxu0 %v21926_v13 }
0x1a22   :  { %20986 = vmatpush3.bf16.msra.mxu1 %v20985_v59 }
0x1a24   :  { %21016 = vmatpush3.bf16.msra.mxu0 %v21015_v51 }
0x1a25   :  { %19751 = vmatmul.mubr.f32.vlgmr.msra.gmra.mrb[24].mxu1 %v16190_v0  ;;  %21017 = vmatprep.subr.bf16.mxu0 %v21926_v13 }
0x1a28   :  { %21019 = vmatpush3.bf16.msra.mxu0 %v21018_v45 }
0x1a29   :  { %21020 = vmatprep.subr.bf16.mxu0 %v21926_v13 }
0x1a2c   :  { %21022 = vmatpush3.bf16.msra.mxu0 %v21021_v63 }
0x1a2d   :  { %21023 = vmatprep.subr.bf16.mxu0 %v21926_v13 }
0x1a2f   :  { %19808 = vmatmul.mubr.f32.vlgmr.msra.gmra.mrb[34].mxu0 %v16190_v0 }
0x1a30   :  { %21025 = vmatpush3.bf16.msra.mxu0 %v23357_v24  ;;  %19826 = vmatprep.mubr.msk.f32.mxu0 %vm21927_vm5, %v21928_v7 }
0x1a31   :  { %21026 = vmatprep.subr.bf16.mxu0 %v21926_v13 }
0x1a34   :  { %21028 = vmatpush3.bf16.msra.mxu0 %v23361_v12 }
0x1a35   :  { %21029 = vmatprep.subr.bf16.mxu0 %v21926_v13 }
0x1a38   :  { %21031 = vmatpush3.bf16.msra.mxu0 %v23366_v38 }
0x1a39   :  { %21032 = vmatprep.subr.bf16.mxu0 %v21926_v13 }
0x1a3c   :  { %21034 = vmatpush3.bf16.msra.mxu0 %v23371_v14 }
0x1a3f   :  { %19827 = vmatmul.mubr.f32.vlgmr.msra.gmra.mrb[34].mxu0 %v16190_v0 }
0x1af8   :  { %v16307_v54 = vpop.f32.mrb[24].mxu1 }
0x1af9   :  { %v19752_v58 = vpop.f32.mrb[25].mxu1  ;;  %v21060_v4 = vadd.f32 %v16696_v56, %v16307_v54 }
0x1b12   :  { %v16650_v7 = vpop.f32.mrb[34].mxu0 }
0x1b13   :  { %v21061_v23 = vadd.f32 %v21060_v4, %v16650_v7  ;;  %v19828_v24 = vpop.f32.mrb[35].mxu0 }
0x1b15   :  { %16655 = vst.msk [vmem:[#allocation30] sm:$0x3] %vm16654_vm6, %v21061_v23 }
0x1b16   :  { %21868 = shalt.err (!%p21865_p9)
}
0x1b17   :  { %s23589_s17 = sld [smem:[#allocation63_spill]] }
0x1b1d   :  { %s21869_s13 = scalar_lea.hbm %s23589_s17, 32 }
0x1b1e   :  { %p21870_p10 = scmp.ne.s32.totalorder %s23589_s17, %s21869_s13  ;;  %p21873_p11 = scmp.lt.u32.totalorder %s21869_s13, %s23589_s17 }
0x1b20   :  { %p21875_p12 = pnand %p21873_p11, %p21870_p10 }
0x1b22   :  { %21878 = shalt.err (!%p21875_p12)
}
0x1b23   :  { %16665 = dma.vmem_to_hbm [thread:$0]  %s16663_s24, 32, %s23589_s17, [#allocation4]  }
0x1b24   :  { %21901 = dma.done.wait [#allocation4], 32  }
0x1b25   :  { %21902 = vsyncadd [#allocation4], 4294967264 }
0x1b26   :  { %16669 = vsyncpa [#allocation3], 1 }
0x1b27   :  { %16670 = vsyncpa [#allocation7], 1 }
0x1b28   :  { %16671 = vsyncpa [#allocation10], 1 }
0x1b29   :  { %16672 = vsyncpa [#allocation13], 1 }
0x1b2a   :  { %16673 = vsyncpa [#allocation16], 1 }
0x1b2b   :  { %16674 = vsyncpa [#allocation19], 1 }
0x1b2c   :  { %16675 = vsyncpa [#allocation22], 1 }
0x1b2d   :  { %16676 = vsyncpa [#allocation26], 1 }
0x1b2e   :  { %16677 = vsyncpa [#allocation29], 1 }
0x1b2f   :  { %16678 = vsyncpa [#allocation4], 1 }
0x1b30   :  { %16679 = vsyncpa [#allocation5], 1 }

</bundles_post_ra>
